<compile_context>
chip_gen: v5e
topology: v5e:2x2
jax: 0.10.0
libtpu: 0.0.40
codegen_flags: <defaults>
</compile_context>

<pallas_src>
import math
import functools

import jax
import jax.numpy as jnp
from jax.experimental import pallas as pl
from jax.experimental.pallas import tpu as pltpu


# ----------------------------- shared math helpers --------------------------------

def _layernorm(z, g, b, eps=1e-6):
    mu = jnp.mean(z, axis=-1, keepdims=True)
    var = jnp.mean((z - mu) ** 2, axis=-1, keepdims=True)
    return (z - mu) * jax.lax.rsqrt(var + eps) * g + b


def _positional_encoding(T, D):
    position = jnp.arange(T, dtype=jnp.float32)[:, None]
    div_term = jnp.exp(jnp.arange(0, D, 2, dtype=jnp.float32) * (-math.log(10000.0) / D))
    pe_sin = jnp.sin(position * div_term)
    pe_cos = jnp.cos(position * div_term)
    return jnp.stack([pe_sin, pe_cos], axis=-1).reshape(T, D)


# ----------------------------- in-kernel helpers -----------------------------------

def _matmul(x3, w, b, out_dtype=jnp.float32):
    """(B, T, Din) activations @ (Din, Dout) bf16 weights + (1, Dout) f32 bias.

    One full-width 2D MXU matmul on the flattened (B*T, Din) view, f32 accumulation,
    single cast of the result to `out_dtype`."""
    Bb, Tt, Din = x3.shape
    y = jnp.dot(x3.reshape(Bb * Tt, Din).astype(w.dtype), w,
                preferred_element_type=jnp.float32)
    y = (y + b).astype(out_dtype)
    return y.reshape(Bb, Tt, w.shape[-1])


def _mha(q, k, v, add_bias, pad, num_heads):
    """Head-batched multi-head attention (q-scale already folded into q weights).

    q: (B, Tq, D) bf16; k, v: (B, Tk, D) bf16.
    add_bias: f32 additive bias broadcastable against (H*B, Tq, Tk) scores
              (causal: (1, Tq, Tk); source mask: (H*B, 1, Tk)).
    pad: optional (H*B, 1, Tk) {0,1} multiplier applied POST-softmax (JoeyNMT).
    Returns (B, Tq, D) bf16 concatenated head contexts.

    Heads are split ONCE (static lane slices stacked along a leading head-major
    axis), so the score / context matmuls are two rank-3 batched dot_generals over
    H*B instead of a per-head Python loop, and the probabilities are cast to bf16
    exactly once.  Fully-masked rows give a uniform distribution (matches the
    reference / JoeyNMT semantics)."""
    B, Tq, D = q.shape
    hd = D // num_heads
    bf16 = jnp.bfloat16

    def split_heads(x):                       # (B, T, D) -> (H*B, T, hd), head-major
        return jnp.concatenate(
            [x[:, :, h * hd:(h + 1) * hd] for h in range(num_heads)], axis=0)

    qh, kh, vh = split_heads(q), split_heads(k), split_heads(v)

    s = jnp.einsum('gqd,gkd->gqk', qh, kh, preferred_element_type=jnp.float32)
    s = s + add_bias
    m = jnp.max(s, axis=-1, keepdims=True)
    e = jnp.exp(s - m)
    # approx reciprocal runs on the EUP slot; tiny deviation from exact division.
    a = e * pl.reciprocal(jnp.sum(e, axis=-1, keepdims=True), approx=True)
    if pad is not None:
        a = a * pad                           # post-softmax key padding (no renorm)
    ctx = jnp.einsum('gqk,gkd->gqd', a.astype(bf16), vh,
                     preferred_element_type=jnp.float32).astype(bf16)
    # merge heads back to (B, Tq, D): leading-dim slices + one lane concat
    return jnp.concatenate(
        [ctx[h * B:(h + 1) * B] for h in range(num_heads)], axis=-1)


# ----------------------------- Pallas kernels --------------------------------------

def _decoder_layer_kernel(num_heads,
                          x_ref, enc_ref, pad_ref, srcb_ref,
                          ln1g, ln1b, ln2g, ln2b, lnfg, lnfb,
                          swqkv, sbqkv, swo, sbo,
                          cwq, cbq, cwkv, cbkv, cwo, cbo,
                          w1, b1, w2, b2,
                          flng, flnb,
                          xln_ref, xbf_ref,
                          causal_ref):
    """One decoder layer; grid = (layer,).

    xln_ref (B, T, D) is the residual stream, resident in VMEM across the layer
    axis.  At the last layer it is overwritten with the final-LayerNorm output and
    a flattened bf16 copy is emitted for the vocabulary projection."""
    l = pl.program_id(0)
    last = pl.num_programs(0) - 1
    B, T, D = x_ref.shape

    @pl.when(l == 0)
    def _():
        xln_ref[...] = x_ref[...]             # x already has positional encoding added
        # causal additive bias generated ONCE into scratch and reused by all layers
        row = jax.lax.broadcasted_iota(jnp.int32, (T, T), 0)
        col = jax.lax.broadcasted_iota(jnp.int32, (T, T), 1)
        causal_ref[...] = jnp.where(row >= col, 0.0, -1e30)

    x = xln_ref[...]                          # (B, T, D) f32 residual stream
    enc = enc_ref[...]                        # (B, S, D) bf16
    pad = pad_ref[...]                        # (H*B, 1, T) {0,1}, post-softmax
    src_bias = srcb_ref[...]                  # (H*B, 1, S) additive (0 / -1e30)
    causal_bias = causal_ref[...][None]       # (1, T, T)

    # --- target-target self attention (pre-LN), fused QKV projection ---
    h = _layernorm(x, ln1g[0], ln1b[0])
    qkv = _matmul(h, swqkv[0], sbqkv[0], out_dtype=jnp.bfloat16)      # (B, T, 3D) bf16
    ctx = _mha(qkv[:, :, :D], qkv[:, :, D:2 * D], qkv[:, :, 2 * D:],
               causal_bias, pad, num_heads)
    h1 = _matmul(ctx, swo[0], sbo[0]) + x                             # dropout == identity

    # --- source-target cross attention, fused KV projection ---
    h = _layernorm(h1, ln2g[0], ln2b[0])
    q = _matmul(h, cwq[0], cbq[0], out_dtype=jnp.bfloat16)            # (B, T, D) bf16
    kv = _matmul(enc, cwkv[0], cbkv[0], out_dtype=jnp.bfloat16)       # (B, S, 2D) bf16
    ctx = _mha(q, kv[:, :, :D], kv[:, :, D:], src_bias, None, num_heads)
    h2 = _matmul(ctx, cwo[0], cbo[0]) + h1

    # --- position-wise feed forward (LN -> Linear -> ReLU -> Linear -> +residual) ---
    z = _layernorm(h2, lnfg[0], lnfb[0])
    z = jnp.maximum(_matmul(z, w1[0], b1[0], out_dtype=jnp.bfloat16), 0.0)   # (B,T,F) bf16
    z = _matmul(z, w2[0], b2[0])
    new_x = z + h2
    xln_ref[...] = new_x

    @pl.when(l == last)
    def _():
        xn = _layernorm(new_x, flng[...], flnb[...])                  # final LayerNorm
        xln_ref[...] = xn
        xbf_ref[...] = xn.reshape(B * T, D).astype(jnp.bfloat16)


def _vocab_kernel(xbf_ref, wout_ref, logits_ref):
    """Bias-free output projection on pre-normalized, pre-cast bf16 activations.

    grid = (vocab_tiles,); no cross-step state, so the axis can be 'parallel'."""
    logits_ref[...] = jnp.dot(xbf_ref[...], wout_ref[...],
                              preferred_element_type=jnp.float32)


# ----------------------------- parameter prep --------------------------------------

PREP_LAYER_ORDER = [
    "ln1_g", "ln1_b", "ln2_g", "ln2_b", "lnf_g", "lnf_b",
    "swqkv", "sbqkv", "swo", "sbo",
    "cwq", "cbq", "cwkv", "cbkv", "cwo", "cbo",
    "w1", "b1", "w2", "b2",
]


def prepare_params(raw, num_heads):
    """Fold 1/sqrt(head_dim) into the query projections, fuse QKV / KV weights,
    cast matmul weights to bf16 (LN params & biases stay f32)."""
    D = raw["swq"].shape[-1]
    scale = 1.0 / math.sqrt(D // num_heads)
    bf16, f32 = jnp.bfloat16, jnp.float32
    p = {}
    for n in ["ln1_g", "ln1_b", "ln2_g", "ln2_b", "lnf_g", "lnf_b",
              "sbo", "cbo", "b1", "b2", "fln_g", "fln_b"]:
        p[n] = raw[n].astype(f32)
    p["swqkv"] = jnp.concatenate([raw["swq"] * scale, raw["swk"], raw["swv"]],
                                 axis=-1).astype(bf16)
    p["sbqkv"] = jnp.concatenate([raw["sbq"] * scale, raw["sbk"], raw["sbv"]],
                                 axis=-1).astype(f32)
    p["swo"] = raw["swo"].astype(bf16)
    p["cwq"] = (raw["cwq"] * scale).astype(bf16)
    p["cbq"] = (raw["cbq"] * scale).astype(f32)
    p["cwkv"] = jnp.concatenate([raw["cwk"], raw["cwv"]], axis=-1).astype(bf16)
    p["cbkv"] = jnp.concatenate([raw["cbk"], raw["cbv"]], axis=-1).astype(f32)
    p["cwo"] = raw["cwo"].astype(bf16)
    p["w1"] = raw["w1"].astype(bf16)
    p["w2"] = raw["w2"].astype(bf16)
    p["w_out"] = raw["w_out"].astype(bf16)
    return p


# ----------------------------- wrapper ----------------------------------------------

def _vmem_limit_bytes(resident_bytes, headroom=16 << 20, floor=32 << 20):
    """Scoped-VMEM limit derived from estimated resident bytes, clamped to the
    physical VMEM of the current part (64 MiB on v7x, 128 MiB on v5e/v6e)."""
    try:
        cap = int(pltpu.get_tpu_info().vmem_capacity_bytes)
    except Exception:
        cap = 64 << 20                         # conservative default (v7x per-TC)
    return int(min(max(int(resident_bytes) + headroom, floor), cap - (8 << 20)))


def transformer_decoder_forward(trg_embed, enc_output, src_mask, trg_mask, raw_params,
                                num_heads):
    """Mirrors TransformerDecoder.forward; returns (output, x, None, None)."""
    B, T, D = trg_embed.shape
    S = enc_output.shape[1]
    L = raw_params["swq"].shape[0]
    F = raw_params["w1"].shape[-1]
    V = raw_params["w_out"].shape[-1]
    H = num_heads
    f32, bf16 = jnp.float32, jnp.bfloat16

    params = prepare_params(raw_params, num_heads)

    x = (trg_embed + _positional_encoding(T, D)[None]).astype(f32)   # PE; emb_dropout == id
    enc_bf = enc_output.astype(bf16)          # only ever consumed as a bf16 matmul operand
    # masks pre-tiled per (head, batch), head-major, matching the in-kernel head split
    pad_t = jnp.tile(trg_mask.astype(f32), (H, 1, 1))                  # (H*B, 1, T)
    srcb_t = jnp.tile((src_mask.astype(f32) - 1.0) * 1e30, (H, 1, 1))  # (H*B, 1, S)

    stacked = [params[n] for n in PREP_LAYER_ORDER]

    def _nbytes(a):
        return int(a.size) * a.dtype.itemsize

    # --- VMEM budget for the layer call (per-layer weight slab is double-buffered) ---
    per_layer_w = sum(_nbytes(p) // L for p in stacked)
    const_b = _nbytes(x) + _nbytes(enc_bf) + _nbytes(pad_t) + _nbytes(srcb_t) + 2 * D * 4
    out_b = B * T * D * (4 + 2)
    scratch_b = T * T * 4
    act_b = 2 * ((B * T * 3 * D + B * S * 2 * D) * 2          # bf16 qkv / kv
                 + 2 * H * B * T * max(T, S) * 4              # f32 scores + probs
                 + B * T * F * 6                              # ffn intermediate f32+bf16
                 + 6 * B * T * D * 4)                         # misc residual temps
    layer_vmem = _vmem_limit_bytes(const_b + 2 * per_layer_w + out_b + scratch_b + act_b)

    const3 = lambda l: (0, 0, 0)
    layer_in_specs = ([
        # constant blocks: fetched once, single-buffered (no wasted double-buffer VMEM)
        pl.BlockSpec((B, T, D), const3, pipeline_mode=pl.Buffered(1)),      # x (+PE)
        pl.BlockSpec((B, S, D), const3, pipeline_mode=pl.Buffered(1)),      # enc (bf16)
        pl.BlockSpec((H * B, 1, T), const3, pipeline_mode=pl.Buffered(1)),  # pad mask
        pl.BlockSpec((H * B, 1, S), const3, pipeline_mode=pl.Buffered(1)),  # src bias
    ] + [pl.BlockSpec((1,) + p.shape[1:], lambda l: (l, 0, 0)) for p in stacked]
      + [pl.BlockSpec((1, D), lambda l: (0, 0), pipeline_mode=pl.Buffered(1)),   # final LN g
         pl.BlockSpec((1, D), lambda l: (0, 0), pipeline_mode=pl.Buffered(1))])  # final LN b

    # TODO(synk): for production D/F on v7x (64 MiB VMEM) add an inner K/F chunking
    # grid axis for the QKV / FFN weight slabs, and optionally a leading "parallel"
    # token-shard axis so both TensorCores work on the layer stack.
    x_ln, x_ln_bf = pl.pallas_call(
        functools.partial(_decoder_layer_kernel, num_heads),
        out_shape=(jax.ShapeDtypeStruct((B, T, D), f32),
                   jax.ShapeDtypeStruct((B * T, D), bf16)),
        grid_spec=pltpu.PrefetchScalarGridSpec(
            num_scalar_prefetch=0,
            grid=(L,),                                    # weight axis only: each layer's
            in_specs=layer_in_specs,                      # weights are DMA'd exactly once
            out_specs=[pl.BlockSpec((B, T, D), const3),
                       pl.BlockSpec((B * T, D), lambda l: (0, 0))],
            scratch_shapes=[pltpu.VMEM((T, T), f32)],     # causal bias, built once
        ),
        compiler_params=pltpu.CompilerParams(
            dimension_semantics=("arbitrary",),
            vmem_limit_bytes=layer_vmem),
    )(x, enc_bf, pad_t, srcb_t, *stacked, params["fln_g"], params["fln_b"])

    # --- lane-dense vocab-tiled output projection (bias-free) ---
    vocab_tile = V
    for cand in (2048, 1024, 512, 256, 128):              # sweep-able; prefer wide tiles
        if V % cand == 0:
            vocab_tile = cand
            break
    # TODO(synk): V not a multiple of 128 falls back to a single whole-V tile; use a
    # masked last tile instead for very large, non-128-multiple vocabularies.
    nvt = V // vocab_tile

    vocab_vmem = _vmem_limit_bytes(
        B * T * D * 2 + 2 * D * vocab_tile * 2 + 2 * B * T * vocab_tile * 4)

    logits2d = pl.pallas_call(
        _vocab_kernel,
        out_shape=jax.ShapeDtypeStruct((B * T, V), f32),
        grid_spec=pltpu.PrefetchScalarGridSpec(
            num_scalar_prefetch=0,
            grid=(nvt,),
            in_specs=[pl.BlockSpec((B * T, D), lambda j: (0, 0),
                                   pipeline_mode=pl.Buffered(1)),
                      pl.BlockSpec((D, vocab_tile), lambda j: (0, j))],
            out_specs=pl.BlockSpec((B * T, vocab_tile), lambda j: (0, j)),
        ),
        compiler_params=pltpu.CompilerParams(
            dimension_semantics=("parallel",),            # no cross-step state (v7x dual-TC)
            vmem_limit_bytes=vocab_vmem),
    )(x_ln_bf, params["w_out"])

    return logits2d.reshape(B, T, V), x_ln, None, None


# ----------------------------- parameters & reference ------------------------------

def init_params(key, L, D, F, V):
    specs = [
        ("ln1_g", (L, 1, D), "ones"), ("ln1_b", (L, 1, D), "zeros"),
        ("ln2_g", (L, 1, D), "ones"), ("ln2_b", (L, 1, D), "zeros"),
        ("lnf_g", (L, 1, D), "ones"), ("lnf_b", (L, 1, D), "zeros"),
        ("swq", (L, D, D), "w"), ("sbq", (L, 1, D), "b"),
        ("swk", (L, D, D), "w"), ("sbk", (L, 1, D), "b"),
        ("swv", (L, D, D), "w"), ("sbv", (L, 1, D), "b"),
        ("swo", (L, D, D), "w"), ("sbo", (L, 1, D), "b"),
        ("cwq", (L, D, D), "w"), ("cbq", (L, 1, D), "b"),
        ("cwk", (L, D, D), "w"), ("cbk", (L, 1, D), "b"),
        ("cwv", (L, D, D), "w"), ("cbv", (L, 1, D), "b"),
        ("cwo", (L, D, D), "w"), ("cbo", (L, 1, D), "b"),
        ("w1", (L, D, F), "w"), ("b1", (L, 1, F), "b"),
        ("w2", (L, F, D), "w"), ("b2", (L, 1, D), "b"),
        ("fln_g", (1, D), "ones"), ("fln_b", (1, D), "zeros"),
        ("w_out", (D, V), "w"),
    ]
    keys = jax.random.split(key, len(specs))
    p = {}
    for (name, shape, kind), kk in zip(specs, keys):
        if kind == "ones":
            p[name] = jnp.ones(shape, jnp.float32)
        elif kind == "zeros":
            p[name] = jnp.zeros(shape, jnp.float32)
        elif kind == "w":
            w = jax.random.normal(kk, shape, jnp.float32) / math.sqrt(shape[-2])
            # pre-round matmul weights through bf16 so kernel & reference share values
            p[name] = w.astype(jnp.bfloat16).astype(jnp.float32)
        else:
            p[name] = 0.02 * jax.random.normal(kk, shape, jnp.float32)
    return p


def _mha_ref(q_in, kv_in, wq, bq, wk, bk, wv, bv, wo, bo, mask, num_heads, pad=None):
    """Pure-JAX f32 reference MHA (JoeyNMT semantics), per batch element."""
    D = q_in.shape[-1]
    hd = D // num_heads
    q = jnp.dot(q_in, wq) + bq
    k = jnp.dot(kv_in, wk) + bk
    v = jnp.dot(kv_in, wv) + bv
    scale = 1.0 / math.sqrt(hd)
    out = jnp.zeros((q_in.shape[0], wo.shape[-1]), jnp.float32)
    for h in range(num_heads):
        sl = slice(h * hd, (h + 1) * hd)
        scores = jnp.dot(q[:, sl] * scale, k[:, sl].T)
        scores = jnp.where(mask > 0.0, scores, -1e30)
        m = jnp.max(scores, axis=-1, keepdims=True)
        e = jnp.exp(scores - m)
        attn = e / jnp.sum(e, axis=-1, keepdims=True)
        if pad is not None:
            attn = attn * pad
        out = out + jnp.dot(jnp.dot(attn, v[:, sl]), wo[sl, :])
    return out + bo


def reference_forward(trg_embed, enc_output, src_mask, trg_mask, params, num_heads):
    """Pure-JAX f32 reference replicating the PyTorch forward semantics."""
    B, T, D = trg_embed.shape
    L = params["swq"].shape[0]
    x = trg_embed + _positional_encoding(T, D)[None]
    sub = jnp.tril(jnp.ones((T, T), jnp.float32))
    logits_all, xln_all = [], []
    for b in range(B):
        xb = x[b]
        enc = enc_output[b]
        pad = trg_mask[b].astype(jnp.float32)
        srcm = src_mask[b].astype(jnp.float32)
        for l in range(L):
            g = lambda n: params[n][l]
            h1 = _layernorm(xb, g("ln1_g")[0], g("ln1_b")[0])
            h1 = _mha_ref(h1, h1, g("swq"), g("sbq")[0], g("swk"), g("sbk")[0],
                          g("swv"), g("sbv")[0], g("swo"), g("sbo")[0],
                          sub, num_heads, pad=pad)
            h1 = h1 + xb
            h2 = _layernorm(h1, g("ln2_g")[0], g("ln2_b")[0])
            h2 = _mha_ref(h2, enc, g("cwq"), g("cbq")[0], g("cwk"), g("cbk")[0],
                          g("cwv"), g("cbv")[0], g("cwo"), g("cbo")[0],
                          srcm, num_heads)
            h2 = h2 + h1
            z = _layernorm(h2, g("lnf_g")[0], g("lnf_b")[0])
            z = jnp.maximum(jnp.dot(z, g("w1")) + g("b1")[0], 0.0)
            z = jnp.dot(z, g("w2")) + g("b2")[0]
            xb = z + h2
        xn = _layernorm(xb, params["fln_g"][0], params["fln_b"][0])
        xln_all.append(xn)
        logits_all.append(jnp.dot(xn, params["w_out"]))
    return jnp.stack(logits_all), jnp.stack(xln_all)


# ----------------------------- main -------------------------------------------------

if __name__ == "__main__":
    # small but lane-dense shapes (D, V multiples of 128; T multiple of 8)
    B, T, S, D, H, F, V, L = 2, 8, 8, 128, 4, 256, 256, 2

    key = jax.random.PRNGKey(0)
    k_embed, k_enc, k_params = jax.random.split(key, 3)
    trg_embed = jax.random.normal(k_embed, (B, T, D), jnp.float32)
    enc_output = jax.random.normal(k_enc, (B, S, D), jnp.float32)
    # padding masks (1 = keep, 0 = pad); batch 1 has some padding
    trg_mask = jnp.ones((B, 1, T), jnp.float32).at[1, 0, T - 2:].set(0.0)
    src_mask = jnp.ones((B, 1, S), jnp.float32).at[1, 0, S - 1:].set(0.0)

    params = init_params(k_params, L, D, F, V)

    out, x_ln, _, _ = transformer_decoder_forward(
        trg_embed, enc_output, src_mask, trg_mask, params, num_heads=H)
    jax.block_until_ready((out, x_ln))

    ref_out, ref_xln = reference_forward(
        trg_embed, enc_output, src_mask, trg_mask, params, num_heads=H)

    # bf16 matmul operands + approx reciprocal in the kernel vs pure-f32 reference
    assert jnp.allclose(out, ref_out, atol=1e-1, rtol=1e-1), \
        float(jnp.max(jnp.abs(out - ref_out)))
    assert jnp.allclose(x_ln, ref_xln, atol=1e-1, rtol=1e-1), \
        float(jnp.max(jnp.abs(x_ln - ref_xln)))

    print("KERNEL_OK")
</pallas_src>

<mosaic_0001>
module attributes {stable_mosaic.version = 11 : i64} {
  func.func @_decoder_layer_kernel(%arg0: i32, %arg1: memref<2x8x128xf32, #tpu.memory_space<vmem>>, %arg2: memref<2x8x128xbf16, #tpu.memory_space<vmem>>, %arg3: memref<8x1x8xf32, #tpu.memory_space<vmem>>, %arg4: memref<8x1x8xf32, #tpu.memory_space<vmem>>, %arg5: memref<1x1x128xf32, #tpu.memory_space<vmem>>, %arg6: memref<1x1x128xf32, #tpu.memory_space<vmem>>, %arg7: memref<1x1x128xf32, #tpu.memory_space<vmem>>, %arg8: memref<1x1x128xf32, #tpu.memory_space<vmem>>, %arg9: memref<1x1x128xf32, #tpu.memory_space<vmem>>, %arg10: memref<1x1x128xf32, #tpu.memory_space<vmem>>, %arg11: memref<1x128x384xbf16, #tpu.memory_space<vmem>>, %arg12: memref<1x1x384xf32, #tpu.memory_space<vmem>>, %arg13: memref<1x128x128xbf16, #tpu.memory_space<vmem>>, %arg14: memref<1x1x128xf32, #tpu.memory_space<vmem>>, %arg15: memref<1x128x128xbf16, #tpu.memory_space<vmem>>, %arg16: memref<1x1x128xf32, #tpu.memory_space<vmem>>, %arg17: memref<1x128x256xbf16, #tpu.memory_space<vmem>>, %arg18: memref<1x1x256xf32, #tpu.memory_space<vmem>>, %arg19: memref<1x128x128xbf16, #tpu.memory_space<vmem>>, %arg20: memref<1x1x128xf32, #tpu.memory_space<vmem>>, %arg21: memref<1x128x256xbf16, #tpu.memory_space<vmem>>, %arg22: memref<1x1x256xf32, #tpu.memory_space<vmem>>, %arg23: memref<1x256x128xbf16, #tpu.memory_space<vmem>>, %arg24: memref<1x1x128xf32, #tpu.memory_space<vmem>>, %arg25: memref<1x128xf32, #tpu.memory_space<vmem>>, %arg26: memref<1x128xf32, #tpu.memory_space<vmem>>, %arg27: memref<2x8x128xf32, #tpu.memory_space<vmem>>, %arg28: memref<16x128xbf16, #tpu.memory_space<vmem>>, %arg29: memref<8x8xf32, #tpu.memory_space<vmem>>) attributes {dimension_semantics = [#tpu.dimension_semantics<arbitrary>], iteration_bounds = array<i64: 2>, scalar_prefetch = 0 : i64, scratch_operands = 1 : i64, tpu.core_type = #tpu.core_type<tc>, window_params = [{pipeline_mode = #tpu.pipeline_mode<synchronous>, transform_indices = @transform_0, window_bounds = array<i64: 2, 8, 128>}, {pipeline_mode = #tpu.pipeline_mode<synchronous>, transform_indices = @transform_1, window_bounds = array<i64: 2, 8, 128>}, {pipeline_mode = #tpu.pipeline_mode<synchronous>, transform_indices = @transform_2, window_bounds = array<i64: 8, 1, 8>}, {pipeline_mode = #tpu.pipeline_mode<synchronous>, transform_indices = @transform_3, window_bounds = array<i64: 8, 1, 8>}, {transform_indices = @transform_4, window_bounds = array<i64: 1, 1, 128>}, {transform_indices = @transform_5, window_bounds = array<i64: 1, 1, 128>}, {transform_indices = @transform_6, window_bounds = array<i64: 1, 1, 128>}, {transform_indices = @transform_7, window_bounds = array<i64: 1, 1, 128>}, {transform_indices = @transform_8, window_bounds = array<i64: 1, 1, 128>}, {transform_indices = @transform_9, window_bounds = array<i64: 1, 1, 128>}, {transform_indices = @transform_10, window_bounds = array<i64: 1, 128, 384>}, {transform_indices = @transform_11, window_bounds = array<i64: 1, 1, 384>}, {transform_indices = @transform_12, window_bounds = array<i64: 1, 128, 128>}, {transform_indices = @transform_13, window_bounds = array<i64: 1, 1, 128>}, {transform_indices = @transform_14, window_bounds = array<i64: 1, 128, 128>}, {transform_indices = @transform_15, window_bounds = array<i64: 1, 1, 128>}, {transform_indices = @transform_16, window_bounds = array<i64: 1, 128, 256>}, {transform_indices = @transform_17, window_bounds = array<i64: 1, 1, 256>}, {transform_indices = @transform_18, window_bounds = array<i64: 1, 128, 128>}, {transform_indices = @transform_19, window_bounds = array<i64: 1, 1, 128>}, {transform_indices = @transform_20, window_bounds = array<i64: 1, 128, 256>}, {transform_indices = @transform_21, window_bounds = array<i64: 1, 1, 256>}, {transform_indices = @transform_22, window_bounds = array<i64: 1, 256, 128>}, {transform_indices = @transform_23, window_bounds = array<i64: 1, 1, 128>}, {pipeline_mode = #tpu.pipeline_mode<synchronous>, transform_indices = @transform_24, window_bounds = array<i64: 1, 128>}, {pipeline_mode = #tpu.pipeline_mode<synchronous>, transform_indices = @transform_25, window_bounds = array<i64: 1, 128>}, {pipeline_mode = #tpu.pipeline_mode<synchronous>, transform_indices = @transform_26, window_bounds = array<i64: 2, 8, 128>}, {pipeline_mode = #tpu.pipeline_mode<synchronous>, transform_indices = @transform_27, window_bounds = array<i64: 16, 128>}]} {
    %c0_i32 = arith.constant 0 : i32
    %0 = arith.cmpi eq, %arg0, %c0_i32 : i32
    %1 = arith.extui %0 : i1 to i32
    %c0_i32_0 = arith.constant 0 : i32
    %2 = arith.cmpi ne, %1, %c0_i32_0 : i32
    scf.if %2 {
      %c0_108 = arith.constant 0 : index
      %c0_109 = arith.constant 0 : index
      %c0_110 = arith.constant 0 : index
      %251 = vector.load %arg1[%c0_108, %c0_109, %c0_110] : memref<2x8x128xf32, #tpu.memory_space<vmem>>, vector<2x8x128xf32>
      %c0_111 = arith.constant 0 : index
      %c0_112 = arith.constant 0 : index
      %c0_113 = arith.constant 0 : index
      %252 = vector.load %arg27[%c0_111, %c0_112, %c0_113] : memref<2x8x128xf32, #tpu.memory_space<vmem>>, vector<2x8x128xf32>
      tpu.vector_store %arg27[%c0_111, %c0_112, %c0_113], %251 {strides = array<i32>} : memref<2x8x128xf32, #tpu.memory_space<vmem>>, vector<2x8x128xf32>,
      %253 = tpu.iota {dimensions = array<i32: 0>} : vector<8x8xi32>
      %254 = tpu.iota {dimensions = array<i32: 1>} : vector<8x8xi32>
      %255 = arith.cmpi sge, %253, %254 : vector<8x8xi32>
      %cst_114 = arith.constant 0.000000e+00 : f32
      %cst_115 = arith.constant -1.000000e+30 : f32
      %256 = vector.broadcast %cst_114 : f32 to vector<8x8xf32>
      %257 = vector.broadcast %cst_115 : f32 to vector<8x8xf32>
      %258 = arith.select %255, %256, %257 : vector<8x8xi1>, vector<8x8xf32>
      %c0_116 = arith.constant 0 : index
      %c0_117 = arith.constant 0 : index
      %259 = vector.load %arg29[%c0_116, %c0_117] : memref<8x8xf32, #tpu.memory_space<vmem>>, vector<8x8xf32>
      tpu.vector_store %arg29[%c0_116, %c0_117], %258 {strides = array<i32>} : memref<8x8xf32, #tpu.memory_space<vmem>>, vector<8x8xf32>,
    } else {
    }
    %c0 = arith.constant 0 : index
    %c0_1 = arith.constant 0 : index
    %c0_2 = arith.constant 0 : index
    %3 = vector.load %arg27[%c0, %c0_1, %c0_2] : memref<2x8x128xf32, #tpu.memory_space<vmem>>, vector<2x8x128xf32>
    %c0_3 = arith.constant 0 : index
    %c0_4 = arith.constant 0 : index
    %c0_5 = arith.constant 0 : index
    %4 = vector.load %arg2[%c0_3, %c0_4, %c0_5] : memref<2x8x128xbf16, #tpu.memory_space<vmem>>, vector<2x8x128xbf16>
    %c0_6 = arith.constant 0 : index
    %c0_7 = arith.constant 0 : index
    %c0_8 = arith.constant 0 : index
    %5 = vector.load %arg3[%c0_6, %c0_7, %c0_8] : memref<8x1x8xf32, #tpu.memory_space<vmem>>, vector<8x1x8xf32>
    %c0_9 = arith.constant 0 : index
    %c0_10 = arith.constant 0 : index
    %c0_11 = arith.constant 0 : index
    %6 = vector.load %arg4[%c0_9, %c0_10, %c0_11] : memref<8x1x8xf32, #tpu.memory_space<vmem>>, vector<8x1x8xf32>
    %c0_12 = arith.constant 0 : index
    %c0_13 = arith.constant 0 : index
    %7 = vector.load %arg29[%c0_12, %c0_13] : memref<8x8xf32, #tpu.memory_space<vmem>>, vector<8x8xf32>
    %8 = vector.shape_cast %7 : vector<8x8xf32> to vector<1x8x8xf32>
    %c0_14 = arith.constant 0 : index
    %c0_15 = arith.constant 0 : index
    %c0_16 = arith.constant 0 : index
    %9 = vector.load %arg5[%c0_14, %c0_15, %c0_16] : memref<1x1x128xf32, #tpu.memory_space<vmem>>, vector<1x1x128xf32>
    %10 = vector.shape_cast %9 : vector<1x1x128xf32> to vector<1x128xf32>
    %c0_17 = arith.constant 0 : index
    %c0_18 = arith.constant 0 : index
    %c0_19 = arith.constant 0 : index
    %11 = vector.load %arg6[%c0_17, %c0_18, %c0_19] : memref<1x1x128xf32, #tpu.memory_space<vmem>>, vector<1x1x128xf32>
    %12 = vector.shape_cast %11 : vector<1x1x128xf32> to vector<1x128xf32>
    %cst = arith.constant dense<0.000000e+00> : vector<2x8xf32>
    %13 = vector.multi_reduction <add>, %3, %cst [2] : vector<2x8x128xf32> to vector<2x8xf32>
    %14 = vector.shape_cast %13 : vector<2x8xf32> to vector<2x8x1xf32>
    %cst_20 = arith.constant 1.280000e+02 : f32
    %15 = vector.broadcast %cst_20 : f32 to vector<2x8x1xf32>
    %16 = arith.divf %14, %15 : vector<2x8x1xf32>
    %17 = vector.broadcast %16 : vector<2x8x1xf32> to vector<2x8x128xf32>
    %18 = arith.subf %3, %17 : vector<2x8x128xf32>
    %19 = arith.mulf %18, %18 : vector<2x8x128xf32>
    %cst_21 = arith.constant dense<0.000000e+00> : vector<2x8xf32>
    %20 = vector.multi_reduction <add>, %19, %cst_21 [2] : vector<2x8x128xf32> to vector<2x8xf32>
    %21 = vector.shape_cast %20 : vector<2x8xf32> to vector<2x8x1xf32>
    %cst_22 = arith.constant 1.280000e+02 : f32
    %22 = vector.broadcast %cst_22 : f32 to vector<2x8x1xf32>
    %23 = arith.divf %21, %22 : vector<2x8x1xf32>
    %24 = vector.broadcast %16 : vector<2x8x1xf32> to vector<2x8x128xf32>
    %25 = arith.subf %3, %24 : vector<2x8x128xf32>
    %cst_23 = arith.constant 9.99999997E-7 : f32
    %26 = vector.broadcast %cst_23 : f32 to vector<2x8x1xf32>
    %27 = arith.addf %23, %26 : vector<2x8x1xf32>
    %28 = math.rsqrt %27 : vector<2x8x1xf32>
    %29 = vector.broadcast %28 : vector<2x8x1xf32> to vector<2x8x128xf32>
    %30 = arith.mulf %25, %29 : vector<2x8x128xf32>
    %31 = vector.shape_cast %10 : vector<1x128xf32> to vector<1x1x128xf32>
    %32 = vector.broadcast %31 : vector<1x1x128xf32> to vector<2x8x128xf32>
    %33 = arith.mulf %30, %32 : vector<2x8x128xf32>
    %34 = vector.shape_cast %12 : vector<1x128xf32> to vector<1x1x128xf32>
    %35 = vector.broadcast %34 : vector<1x1x128xf32> to vector<2x8x128xf32>
    %36 = arith.addf %33, %35 : vector<2x8x128xf32>
    %c0_24 = arith.constant 0 : index
    %c0_25 = arith.constant 0 : index
    %c0_26 = arith.constant 0 : index
    %37 = vector.load %arg11[%c0_24, %c0_25, %c0_26] : memref<1x128x384xbf16, #tpu.memory_space<vmem>>, vector<1x128x384xbf16>
    %38 = vector.shape_cast %37 : vector<1x128x384xbf16> to vector<128x384xbf16>
    %c0_27 = arith.constant 0 : index
    %c0_28 = arith.constant 0 : index
    %c0_29 = arith.constant 0 : index
    %39 = vector.load %arg12[%c0_27, %c0_28, %c0_29] : memref<1x1x384xf32, #tpu.memory_space<vmem>>, vector<1x1x384xf32>
    %40 = vector.shape_cast %39 : vector<1x1x384xf32> to vector<1x384xf32>
    %41 = vector.shape_cast %36 : vector<2x8x128xf32> to vector<16x128xf32>
    %42 = arith.truncf %41 : vector<16x128xf32> to vector<16x128xbf16>
    %cst_30 = arith.constant dense<0.000000e+00> : vector<16x384xf32>
    %43 = tpu.matmul %42, %38, %cst_30 {dimension_numbers = #tpu.dot_dimension_numbers<[1], [0], [0], [1], [0, 0, 1, 1], [], []>} : vector<16x128xbf16>, vector<128x384xbf16>, vector<16x384xf32> -> vector<16x384xf32>
    %44 = vector.broadcast %40 : vector<1x384xf32> to vector<16x384xf32>
    %45 = arith.addf %43, %44 : vector<16x384xf32>
    %46 = arith.truncf %45 : vector<16x384xf32> to vector<16x384xbf16>
    %47 = vector.shape_cast %46 : vector<16x384xbf16> to vector<2x8x384xbf16>
    %48 = vector.extract_strided_slice %47 {offsets = [0, 0, 0], sizes = [2, 8, 128], strides = [1, 1, 1]} : vector<2x8x384xbf16> to vector<2x8x128xbf16>
    %49 = vector.extract_strided_slice %47 {offsets = [0, 0, 128], sizes = [2, 8, 128], strides = [1, 1, 1]} : vector<2x8x384xbf16> to vector<2x8x128xbf16>
    %50 = vector.extract_strided_slice %47 {offsets = [0, 0, 256], sizes = [2, 8, 128], strides = [1, 1, 1]} : vector<2x8x384xbf16> to vector<2x8x128xbf16>
    %51 = vector.extract_strided_slice %48 {offsets = [0, 0, 0], sizes = [2, 8, 32], strides = [1, 1, 1]} : vector<2x8x128xbf16> to vector<2x8x32xbf16>
    %52 = vector.extract_strided_slice %48 {offsets = [0, 0, 32], sizes = [2, 8, 32], strides = [1, 1, 1]} : vector<2x8x128xbf16> to vector<2x8x32xbf16>
    %53 = vector.extract_strided_slice %48 {offsets = [0, 0, 64], sizes = [2, 8, 32], strides = [1, 1, 1]} : vector<2x8x128xbf16> to vector<2x8x32xbf16>
    %54 = vector.extract_strided_slice %48 {offsets = [0, 0, 96], sizes = [2, 8, 32], strides = [1, 1, 1]} : vector<2x8x128xbf16> to vector<2x8x32xbf16>
    %55 = tpu.concatenate %51, %52, %53, %54 in 0 : vector<2x8x32xbf16>, vector<2x8x32xbf16>, vector<2x8x32xbf16>, vector<2x8x32xbf16> -> vector<8x8x32xbf16>
    %56 = vector.extract_strided_slice %49 {offsets = [0, 0, 0], sizes = [2, 8, 32], strides = [1, 1, 1]} : vector<2x8x128xbf16> to vector<2x8x32xbf16>
    %57 = vector.extract_strided_slice %49 {offsets = [0, 0, 32], sizes = [2, 8, 32], strides = [1, 1, 1]} : vector<2x8x128xbf16> to vector<2x8x32xbf16>
    %58 = vector.extract_strided_slice %49 {offsets = [0, 0, 64], sizes = [2, 8, 32], strides = [1, 1, 1]} : vector<2x8x128xbf16> to vector<2x8x32xbf16>
    %59 = vector.extract_strided_slice %49 {offsets = [0, 0, 96], sizes = [2, 8, 32], strides = [1, 1, 1]} : vector<2x8x128xbf16> to vector<2x8x32xbf16>
    %60 = tpu.concatenate %56, %57, %58, %59 in 0 : vector<2x8x32xbf16>, vector<2x8x32xbf16>, vector<2x8x32xbf16>, vector<2x8x32xbf16> -> vector<8x8x32xbf16>
    %61 = vector.extract_strided_slice %50 {offsets = [0, 0, 0], sizes = [2, 8, 32], strides = [1, 1, 1]} : vector<2x8x128xbf16> to vector<2x8x32xbf16>
    %62 = vector.extract_strided_slice %50 {offsets = [0, 0, 32], sizes = [2, 8, 32], strides = [1, 1, 1]} : vector<2x8x128xbf16> to vector<2x8x32xbf16>
    %63 = vector.extract_strided_slice %50 {offsets = [0, 0, 64], sizes = [2, 8, 32], strides = [1, 1, 1]} : vector<2x8x128xbf16> to vector<2x8x32xbf16>
    %64 = vector.extract_strided_slice %50 {offsets = [0, 0, 96], sizes = [2, 8, 32], strides = [1, 1, 1]} : vector<2x8x128xbf16> to vector<2x8x32xbf16>
    %65 = tpu.concatenate %61, %62, %63, %64 in 0 : vector<2x8x32xbf16>, vector<2x8x32xbf16>, vector<2x8x32xbf16>, vector<2x8x32xbf16> -> vector<8x8x32xbf16>
    "tpu.trace_start"() <{level = 10 : i32, message = "gqd,gkd->gqk"}> : () -> ()
    %cst_31 = arith.constant dense<0.000000e+00> : vector<8x8x8xf32>
    %66 = tpu.matmul %55, %60, %cst_31 {dimension_numbers = #tpu.dot_dimension_numbers<[2], [2], [1], [1], [0, 0, 0, 1, 1, 1], [0], [0]>} : vector<8x8x32xbf16>, vector<8x8x32xbf16>, vector<8x8x8xf32> -> vector<8x8x8xf32>
    "tpu.trace_stop"() : () -> ()
    %67 = vector.broadcast %8 : vector<1x8x8xf32> to vector<8x8x8xf32>
    %68 = arith.addf %66, %67 : vector<8x8x8xf32>
    %cst_32 = arith.constant dense<0xFF800000> : vector<8x8xf32>
    %69 = vector.multi_reduction <maximumf>, %68, %cst_32 [2] : vector<8x8x8xf32> to vector<8x8xf32>
    %70 = vector.shape_cast %69 : vector<8x8xf32> to vector<8x8x1xf32>
    %71 = vector.broadcast %70 : vector<8x8x1xf32> to vector<8x8x8xf32>
    %72 = arith.subf %68, %71 : vector<8x8x8xf32>
    %73 = math.exp %72 : vector<8x8x8xf32>
    %cst_33 = arith.constant dense<0.000000e+00> : vector<8x8xf32>
    %74 = vector.multi_reduction <add>, %73, %cst_33 [2] : vector<8x8x8xf32> to vector<8x8xf32>
    %75 = vector.shape_cast %74 : vector<8x8xf32> to vector<8x8x1xf32>
    %76 = tpu.reciprocal %75 {approx = true} : vector<8x8x1xf32> -> vector<8x8x1xf32>
    %77 = vector.broadcast %76 : vector<8x8x1xf32> to vector<8x8x8xf32>
    %78 = arith.mulf %73, %77 : vector<8x8x8xf32>
    %79 = vector.broadcast %5 : vector<8x1x8xf32> to vector<8x8x8xf32>
    %80 = arith.mulf %78, %79 : vector<8x8x8xf32>
    %81 = arith.truncf %80 : vector<8x8x8xf32> to vector<8x8x8xbf16>
    "tpu.trace_start"() <{level = 10 : i32, message = "gqk,gkd->gqd"}> : () -> ()
    %cst_34 = arith.constant dense<0.000000e+00> : vector<8x8x32xf32>
    %82 = tpu.matmul %81, %65, %cst_34 {dimension_numbers = #tpu.dot_dimension_numbers<[2], [1], [1], [2], [0, 0, 0, 1, 1, 2], [0], [0]>} : vector<8x8x8xbf16>, vector<8x8x32xbf16>, vector<8x8x32xf32> -> vector<8x8x32xf32>
    "tpu.trace_stop"() : () -> ()
    %83 = arith.truncf %82 : vector<8x8x32xf32> to vector<8x8x32xbf16>
    %84 = vector.extract_strided_slice %83 {offsets = [0, 0, 0], sizes = [2, 8, 32], strides = [1, 1, 1]} : vector<8x8x32xbf16> to vector<2x8x32xbf16>
    %85 = vector.extract_strided_slice %83 {offsets = [2, 0, 0], sizes = [2, 8, 32], strides = [1, 1, 1]} : vector<8x8x32xbf16> to vector<2x8x32xbf16>
    %86 = vector.extract_strided_slice %83 {offsets = [4, 0, 0], sizes = [2, 8, 32], strides = [1, 1, 1]} : vector<8x8x32xbf16> to vector<2x8x32xbf16>
    %87 = vector.extract_strided_slice %83 {offsets = [6, 0, 0], sizes = [2, 8, 32], strides = [1, 1, 1]} : vector<8x8x32xbf16> to vector<2x8x32xbf16>
    %88 = tpu.concatenate %84, %85, %86, %87 in 2 : vector<2x8x32xbf16>, vector<2x8x32xbf16>, vector<2x8x32xbf16>, vector<2x8x32xbf16> -> vector<2x8x128xbf16>
    %c0_35 = arith.constant 0 : index
    %c0_36 = arith.constant 0 : index
    %c0_37 = arith.constant 0 : index
    %89 = vector.load %arg13[%c0_35, %c0_36, %c0_37] : memref<1x128x128xbf16, #tpu.memory_space<vmem>>, vector<1x128x128xbf16>
    %90 = vector.shape_cast %89 : vector<1x128x128xbf16> to vector<128x128xbf16>
    %c0_38 = arith.constant 0 : index
    %c0_39 = arith.constant 0 : index
    %c0_40 = arith.constant 0 : index
    %91 = vector.load %arg14[%c0_38, %c0_39, %c0_40] : memref<1x1x128xf32, #tpu.memory_space<vmem>>, vector<1x1x128xf32>
    %92 = vector.shape_cast %91 : vector<1x1x128xf32> to vector<1x128xf32>
    %93 = vector.shape_cast %88 : vector<2x8x128xbf16> to vector<16x128xbf16>
    %cst_41 = arith.constant dense<0.000000e+00> : vector<16x128xf32>
    %94 = tpu.matmul %93, %90, %cst_41 {dimension_numbers = #tpu.dot_dimension_numbers<[1], [0], [0], [1], [0, 0, 1, 1], [], []>} : vector<16x128xbf16>, vector<128x128xbf16>, vector<16x128xf32> -> vector<16x128xf32>
    %95 = vector.broadcast %92 : vector<1x128xf32> to vector<16x128xf32>
    %96 = arith.addf %94, %95 : vector<16x128xf32>
    %97 = vector.shape_cast %96 : vector<16x128xf32> to vector<2x8x128xf32>
    %98 = arith.addf %97, %3 : vector<2x8x128xf32>
    %c0_42 = arith.constant 0 : index
    %c0_43 = arith.constant 0 : index
    %c0_44 = arith.constant 0 : index
    %99 = vector.load %arg7[%c0_42, %c0_43, %c0_44] : memref<1x1x128xf32, #tpu.memory_space<vmem>>, vector<1x1x128xf32>
    %100 = vector.shape_cast %99 : vector<1x1x128xf32> to vector<1x128xf32>
    %c0_45 = arith.constant 0 : index
    %c0_46 = arith.constant 0 : index
    %c0_47 = arith.constant 0 : index
    %101 = vector.load %arg8[%c0_45, %c0_46, %c0_47] : memref<1x1x128xf32, #tpu.memory_space<vmem>>, vector<1x1x128xf32>
    %102 = vector.shape_cast %101 : vector<1x1x128xf32> to vector<1x128xf32>
    %cst_48 = arith.constant dense<0.000000e+00> : vector<2x8xf32>
    %103 = vector.multi_reduction <add>, %98, %cst_48 [2] : vector<2x8x128xf32> to vector<2x8xf32>
    %104 = vector.shape_cast %103 : vector<2x8xf32> to vector<2x8x1xf32>
    %cst_49 = arith.constant 1.280000e+02 : f32
    %105 = vector.broadcast %cst_49 : f32 to vector<2x8x1xf32>
    %106 = arith.divf %104, %105 : vector<2x8x1xf32>
    %107 = vector.broadcast %106 : vector<2x8x1xf32> to vector<2x8x128xf32>
    %108 = arith.subf %98, %107 : vector<2x8x128xf32>
    %109 = arith.mulf %108, %108 : vector<2x8x128xf32>
    %cst_50 = arith.constant dense<0.000000e+00> : vector<2x8xf32>
    %110 = vector.multi_reduction <add>, %109, %cst_50 [2] : vector<2x8x128xf32> to vector<2x8xf32>
    %111 = vector.shape_cast %110 : vector<2x8xf32> to vector<2x8x1xf32>
    %cst_51 = arith.constant 1.280000e+02 : f32
    %112 = vector.broadcast %cst_51 : f32 to vector<2x8x1xf32>
    %113 = arith.divf %111, %112 : vector<2x8x1xf32>
    %114 = vector.broadcast %106 : vector<2x8x1xf32> to vector<2x8x128xf32>
    %115 = arith.subf %98, %114 : vector<2x8x128xf32>
    %cst_52 = arith.constant 9.99999997E-7 : f32
    %116 = vector.broadcast %cst_52 : f32 to vector<2x8x1xf32>
    %117 = arith.addf %113, %116 : vector<2x8x1xf32>
    %118 = math.rsqrt %117 : vector<2x8x1xf32>
    %119 = vector.broadcast %118 : vector<2x8x1xf32> to vector<2x8x128xf32>
    %120 = arith.mulf %115, %119 : vector<2x8x128xf32>
    %121 = vector.shape_cast %100 : vector<1x128xf32> to vector<1x1x128xf32>
    %122 = vector.broadcast %121 : vector<1x1x128xf32> to vector<2x8x128xf32>
    %123 = arith.mulf %120, %122 : vector<2x8x128xf32>
    %124 = vector.shape_cast %102 : vector<1x128xf32> to vector<1x1x128xf32>
    %125 = vector.broadcast %124 : vector<1x1x128xf32> to vector<2x8x128xf32>
    %126 = arith.addf %123, %125 : vector<2x8x128xf32>
    %c0_53 = arith.constant 0 : index
    %c0_54 = arith.constant 0 : index
    %c0_55 = arith.constant 0 : index
    %127 = vector.load %arg15[%c0_53, %c0_54, %c0_55] : memref<1x128x128xbf16, #tpu.memory_space<vmem>>, vector<1x128x128xbf16>
    %128 = vector.shape_cast %127 : vector<1x128x128xbf16> to vector<128x128xbf16>
    %c0_56 = arith.constant 0 : index
    %c0_57 = arith.constant 0 : index
    %c0_58 = arith.constant 0 : index
    %129 = vector.load %arg16[%c0_56, %c0_57, %c0_58] : memref<1x1x128xf32, #tpu.memory_space<vmem>>, vector<1x1x128xf32>
    %130 = vector.shape_cast %129 : vector<1x1x128xf32> to vector<1x128xf32>
    %131 = vector.shape_cast %126 : vector<2x8x128xf32> to vector<16x128xf32>
    %132 = arith.truncf %131 : vector<16x128xf32> to vector<16x128xbf16>
    %cst_59 = arith.constant dense<0.000000e+00> : vector<16x128xf32>
    %133 = tpu.matmul %132, %128, %cst_59 {dimension_numbers = #tpu.dot_dimension_numbers<[1], [0], [0], [1], [0, 0, 1, 1], [], []>} : vector<16x128xbf16>, vector<128x128xbf16>, vector<16x128xf32> -> vector<16x128xf32>
    %134 = vector.broadcast %130 : vector<1x128xf32> to vector<16x128xf32>
    %135 = arith.addf %133, %134 : vector<16x128xf32>
    %136 = arith.truncf %135 : vector<16x128xf32> to vector<16x128xbf16>
    %137 = vector.shape_cast %136 : vector<16x128xbf16> to vector<2x8x128xbf16>
    %c0_60 = arith.constant 0 : index
    %c0_61 = arith.constant 0 : index
    %c0_62 = arith.constant 0 : index
    %138 = vector.load %arg17[%c0_60, %c0_61, %c0_62] : memref<1x128x256xbf16, #tpu.memory_space<vmem>>, vector<1x128x256xbf16>
    %139 = vector.shape_cast %138 : vector<1x128x256xbf16> to vector<128x256xbf16>
    %c0_63 = arith.constant 0 : index
    %c0_64 = arith.constant 0 : index
    %c0_65 = arith.constant 0 : index
    %140 = vector.load %arg18[%c0_63, %c0_64, %c0_65] : memref<1x1x256xf32, #tpu.memory_space<vmem>>, vector<1x1x256xf32>
    %141 = vector.shape_cast %140 : vector<1x1x256xf32> to vector<1x256xf32>
    %142 = vector.shape_cast %4 : vector<2x8x128xbf16> to vector<16x128xbf16>
    %cst_66 = arith.constant dense<0.000000e+00> : vector<16x256xf32>
    %143 = tpu.matmul %142, %139, %cst_66 {dimension_numbers = #tpu.dot_dimension_numbers<[1], [0], [0], [1], [0, 0, 1, 1], [], []>} : vector<16x128xbf16>, vector<128x256xbf16>, vector<16x256xf32> -> vector<16x256xf32>
    %144 = vector.broadcast %141 : vector<1x256xf32> to vector<16x256xf32>
    %145 = arith.addf %143, %144 : vector<16x256xf32>
    %146 = arith.truncf %145 : vector<16x256xf32> to vector<16x256xbf16>
    %147 = vector.shape_cast %146 : vector<16x256xbf16> to vector<2x8x256xbf16>
    %148 = vector.extract_strided_slice %147 {offsets = [0, 0, 0], sizes = [2, 8, 128], strides = [1, 1, 1]} : vector<2x8x256xbf16> to vector<2x8x128xbf16>
    %149 = vector.extract_strided_slice %147 {offsets = [0, 0, 128], sizes = [2, 8, 128], strides = [1, 1, 1]} : vector<2x8x256xbf16> to vector<2x8x128xbf16>
    %150 = vector.extract_strided_slice %137 {offsets = [0, 0, 0], sizes = [2, 8, 32], strides = [1, 1, 1]} : vector<2x8x128xbf16> to vector<2x8x32xbf16>
    %151 = vector.extract_strided_slice %137 {offsets = [0, 0, 32], sizes = [2, 8, 32], strides = [1, 1, 1]} : vector<2x8x128xbf16> to vector<2x8x32xbf16>
    %152 = vector.extract_strided_slice %137 {offsets = [0, 0, 64], sizes = [2, 8, 32], strides = [1, 1, 1]} : vector<2x8x128xbf16> to vector<2x8x32xbf16>
    %153 = vector.extract_strided_slice %137 {offsets = [0, 0, 96], sizes = [2, 8, 32], strides = [1, 1, 1]} : vector<2x8x128xbf16> to vector<2x8x32xbf16>
    %154 = tpu.concatenate %150, %151, %152, %153 in 0 : vector<2x8x32xbf16>, vector<2x8x32xbf16>, vector<2x8x32xbf16>, vector<2x8x32xbf16> -> vector<8x8x32xbf16>
    %155 = vector.extract_strided_slice %148 {offsets = [0, 0, 0], sizes = [2, 8, 32], strides = [1, 1, 1]} : vector<2x8x128xbf16> to vector<2x8x32xbf16>
    %156 = vector.extract_strided_slice %148 {offsets = [0, 0, 32], sizes = [2, 8, 32], strides = [1, 1, 1]} : vector<2x8x128xbf16> to vector<2x8x32xbf16>
    %157 = vector.extract_strided_slice %148 {offsets = [0, 0, 64], sizes = [2, 8, 32], strides = [1, 1, 1]} : vector<2x8x128xbf16> to vector<2x8x32xbf16>
    %158 = vector.extract_strided_slice %148 {offsets = [0, 0, 96], sizes = [2, 8, 32], strides = [1, 1, 1]} : vector<2x8x128xbf16> to vector<2x8x32xbf16>
    %159 = tpu.concatenate %155, %156, %157, %158 in 0 : vector<2x8x32xbf16>, vector<2x8x32xbf16>, vector<2x8x32xbf16>, vector<2x8x32xbf16> -> vector<8x8x32xbf16>
    %160 = vector.extract_strided_slice %149 {offsets = [0, 0, 0], sizes = [2, 8, 32], strides = [1, 1, 1]} : vector<2x8x128xbf16> to vector<2x8x32xbf16>
    %161 = vector.extract_strided_slice %149 {offsets = [0, 0, 32], sizes = [2, 8, 32], strides = [1, 1, 1]} : vector<2x8x128xbf16> to vector<2x8x32xbf16>
    %162 = vector.extract_strided_slice %149 {offsets = [0, 0, 64], sizes = [2, 8, 32], strides = [1, 1, 1]} : vector<2x8x128xbf16> to vector<2x8x32xbf16>
    %163 = vector.extract_strided_slice %149 {offsets = [0, 0, 96], sizes = [2, 8, 32], strides = [1, 1, 1]} : vector<2x8x128xbf16> to vector<2x8x32xbf16>
    %164 = tpu.concatenate %160, %161, %162, %163 in 0 : vector<2x8x32xbf16>, vector<2x8x32xbf16>, vector<2x8x32xbf16>, vector<2x8x32xbf16> -> vector<8x8x32xbf16>
    "tpu.trace_start"() <{level = 10 : i32, message = "gqd,gkd->gqk"}> : () -> ()
    %cst_67 = arith.constant dense<0.000000e+00> : vector<8x8x8xf32>
    %165 = tpu.matmul %154, %159, %cst_67 {dimension_numbers = #tpu.dot_dimension_numbers<[2], [2], [1], [1], [0, 0, 0, 1, 1, 1], [0], [0]>} : vector<8x8x32xbf16>, vector<8x8x32xbf16>, vector<8x8x8xf32> -> vector<8x8x8xf32>
    "tpu.trace_stop"() : () -> ()
    %166 = vector.broadcast %6 : vector<8x1x8xf32> to vector<8x8x8xf32>
    %167 = arith.addf %165, %166 : vector<8x8x8xf32>
    %cst_68 = arith.constant dense<0xFF800000> : vector<8x8xf32>
    %168 = vector.multi_reduction <maximumf>, %167, %cst_68 [2] : vector<8x8x8xf32> to vector<8x8xf32>
    %169 = vector.shape_cast %168 : vector<8x8xf32> to vector<8x8x1xf32>
    %170 = vector.broadcast %169 : vector<8x8x1xf32> to vector<8x8x8xf32>
    %171 = arith.subf %167, %170 : vector<8x8x8xf32>
    %172 = math.exp %171 : vector<8x8x8xf32>
    %cst_69 = arith.constant dense<0.000000e+00> : vector<8x8xf32>
    %173 = vector.multi_reduction <add>, %172, %cst_69 [2] : vector<8x8x8xf32> to vector<8x8xf32>
    %174 = vector.shape_cast %173 : vector<8x8xf32> to vector<8x8x1xf32>
    %175 = tpu.reciprocal %174 {approx = true} : vector<8x8x1xf32> -> vector<8x8x1xf32>
    %176 = vector.broadcast %175 : vector<8x8x1xf32> to vector<8x8x8xf32>
    %177 = arith.mulf %172, %176 : vector<8x8x8xf32>
    %178 = arith.truncf %177 : vector<8x8x8xf32> to vector<8x8x8xbf16>
    "tpu.trace_start"() <{level = 10 : i32, message = "gqk,gkd->gqd"}> : () -> ()
    %cst_70 = arith.constant dense<0.000000e+00> : vector<8x8x32xf32>
    %179 = tpu.matmul %178, %164, %cst_70 {dimension_numbers = #tpu.dot_dimension_numbers<[2], [1], [1], [2], [0, 0, 0, 1, 1, 2], [0], [0]>} : vector<8x8x8xbf16>, vector<8x8x32xbf16>, vector<8x8x32xf32> -> vector<8x8x32xf32>
    "tpu.trace_stop"() : () -> ()
    %180 = arith.truncf %179 : vector<8x8x32xf32> to vector<8x8x32xbf16>
    %181 = vector.extract_strided_slice %180 {offsets = [0, 0, 0], sizes = [2, 8, 32], strides = [1, 1, 1]} : vector<8x8x32xbf16> to vector<2x8x32xbf16>
    %182 = vector.extract_strided_slice %180 {offsets = [2, 0, 0], sizes = [2, 8, 32], strides = [1, 1, 1]} : vector<8x8x32xbf16> to vector<2x8x32xbf16>
    %183 = vector.extract_strided_slice %180 {offsets = [4, 0, 0], sizes = [2, 8, 32], strides = [1, 1, 1]} : vector<8x8x32xbf16> to vector<2x8x32xbf16>
    %184 = vector.extract_strided_slice %180 {offsets = [6, 0, 0], sizes = [2, 8, 32], strides = [1, 1, 1]} : vector<8x8x32xbf16> to vector<2x8x32xbf16>
    %185 = tpu.concatenate %181, %182, %183, %184 in 2 : vector<2x8x32xbf16>, vector<2x8x32xbf16>, vector<2x8x32xbf16>, vector<2x8x32xbf16> -> vector<2x8x128xbf16>
    %c0_71 = arith.constant 0 : index
    %c0_72 = arith.constant 0 : index
    %c0_73 = arith.constant 0 : index
    %186 = vector.load %arg19[%c0_71, %c0_72, %c0_73] : memref<1x128x128xbf16, #tpu.memory_space<vmem>>, vector<1x128x128xbf16>
    %187 = vector.shape_cast %186 : vector<1x128x128xbf16> to vector<128x128xbf16>
    %c0_74 = arith.constant 0 : index
    %c0_75 = arith.constant 0 : index
    %c0_76 = arith.constant 0 : index
    %188 = vector.load %arg20[%c0_74, %c0_75, %c0_76] : memref<1x1x128xf32, #tpu.memory_space<vmem>>, vector<1x1x128xf32>
    %189 = vector.shape_cast %188 : vector<1x1x128xf32> to vector<1x128xf32>
    %190 = vector.shape_cast %185 : vector<2x8x128xbf16> to vector<16x128xbf16>
    %cst_77 = arith.constant dense<0.000000e+00> : vector<16x128xf32>
    %191 = tpu.matmul %190, %187, %cst_77 {dimension_numbers = #tpu.dot_dimension_numbers<[1], [0], [0], [1], [0, 0, 1, 1], [], []>} : vector<16x128xbf16>, vector<128x128xbf16>, vector<16x128xf32> -> vector<16x128xf32>
    %192 = vector.broadcast %189 : vector<1x128xf32> to vector<16x128xf32>
    %193 = arith.addf %191, %192 : vector<16x128xf32>
    %194 = vector.shape_cast %193 : vector<16x128xf32> to vector<2x8x128xf32>
    %195 = arith.addf %194, %98 : vector<2x8x128xf32>
    %c0_78 = arith.constant 0 : index
    %c0_79 = arith.constant 0 : index
    %c0_80 = arith.constant 0 : index
    %196 = vector.load %arg9[%c0_78, %c0_79, %c0_80] : memref<1x1x128xf32, #tpu.memory_space<vmem>>, vector<1x1x128xf32>
    %197 = vector.shape_cast %196 : vector<1x1x128xf32> to vector<1x128xf32>
    %c0_81 = arith.constant 0 : index
    %c0_82 = arith.constant 0 : index
    %c0_83 = arith.constant 0 : index
    %198 = vector.load %arg10[%c0_81, %c0_82, %c0_83] : memref<1x1x128xf32, #tpu.memory_space<vmem>>, vector<1x1x128xf32>
    %199 = vector.shape_cast %198 : vector<1x1x128xf32> to vector<1x128xf32>
    %cst_84 = arith.constant dense<0.000000e+00> : vector<2x8xf32>
    %200 = vector.multi_reduction <add>, %195, %cst_84 [2] : vector<2x8x128xf32> to vector<2x8xf32>
    %201 = vector.shape_cast %200 : vector<2x8xf32> to vector<2x8x1xf32>
    %cst_85 = arith.constant 1.280000e+02 : f32
    %202 = vector.broadcast %cst_85 : f32 to vector<2x8x1xf32>
    %203 = arith.divf %201, %202 : vector<2x8x1xf32>
    %204 = vector.broadcast %203 : vector<2x8x1xf32> to vector<2x8x128xf32>
    %205 = arith.subf %195, %204 : vector<2x8x128xf32>
    %206 = arith.mulf %205, %205 : vector<2x8x128xf32>
    %cst_86 = arith.constant dense<0.000000e+00> : vector<2x8xf32>
    %207 = vector.multi_reduction <add>, %206, %cst_86 [2] : vector<2x8x128xf32> to vector<2x8xf32>
    %208 = vector.shape_cast %207 : vector<2x8xf32> to vector<2x8x1xf32>
    %cst_87 = arith.constant 1.280000e+02 : f32
    %209 = vector.broadcast %cst_87 : f32 to vector<2x8x1xf32>
    %210 = arith.divf %208, %209 : vector<2x8x1xf32>
    %211 = vector.broadcast %203 : vector<2x8x1xf32> to vector<2x8x128xf32>
    %212 = arith.subf %195, %211 : vector<2x8x128xf32>
    %cst_88 = arith.constant 9.99999997E-7 : f32
    %213 = vector.broadcast %cst_88 : f32 to vector<2x8x1xf32>
    %214 = arith.addf %210, %213 : vector<2x8x1xf32>
    %215 = math.rsqrt %214 : vector<2x8x1xf32>
    %216 = vector.broadcast %215 : vector<2x8x1xf32> to vector<2x8x128xf32>
    %217 = arith.mulf %212, %216 : vector<2x8x128xf32>
    %218 = vector.shape_cast %197 : vector<1x128xf32> to vector<1x1x128xf32>
    %219 = vector.broadcast %218 : vector<1x1x128xf32> to vector<2x8x128xf32>
    %220 = arith.mulf %217, %219 : vector<2x8x128xf32>
    %221 = vector.shape_cast %199 : vector<1x128xf32> to vector<1x1x128xf32>
    %222 = vector.broadcast %221 : vector<1x1x128xf32> to vector<2x8x128xf32>
    %223 = arith.addf %220, %222 : vector<2x8x128xf32>
    %c0_89 = arith.constant 0 : index
    %c0_90 = arith.constant 0 : index
    %c0_91 = arith.constant 0 : index
    %224 = vector.load %arg21[%c0_89, %c0_90, %c0_91] : memref<1x128x256xbf16, #tpu.memory_space<vmem>>, vector<1x128x256xbf16>
    %225 = vector.shape_cast %224 : vector<1x128x256xbf16> to vector<128x256xbf16>
    %c0_92 = arith.constant 0 : index
    %c0_93 = arith.constant 0 : index
    %c0_94 = arith.constant 0 : index
    %226 = vector.load %arg22[%c0_92, %c0_93, %c0_94] : memref<1x1x256xf32, #tpu.memory_space<vmem>>, vector<1x1x256xf32>
    %227 = vector.shape_cast %226 : vector<1x1x256xf32> to vector<1x256xf32>
    %228 = vector.shape_cast %223 : vector<2x8x128xf32> to vector<16x128xf32>
    %229 = arith.truncf %228 : vector<16x128xf32> to vector<16x128xbf16>
    %cst_95 = arith.constant dense<0.000000e+00> : vector<16x256xf32>
    %230 = tpu.matmul %229, %225, %cst_95 {dimension_numbers = #tpu.dot_dimension_numbers<[1], [0], [0], [1], [0, 0, 1, 1], [], []>} : vector<16x128xbf16>, vector<128x256xbf16>, vector<16x256xf32> -> vector<16x256xf32>
    %231 = vector.broadcast %227 : vector<1x256xf32> to vector<16x256xf32>
    %232 = arith.addf %230, %231 : vector<16x256xf32>
    %233 = arith.truncf %232 : vector<16x256xf32> to vector<16x256xbf16>
    %234 = vector.shape_cast %233 : vector<16x256xbf16> to vector<2x8x256xbf16>
    %cst_96 = arith.constant 0.000000e+00 : bf16
    %235 = vector.broadcast %cst_96 : bf16 to vector<2x8x256xbf16>
    %236 = arith.maximumf %234, %235 : vector<2x8x256xbf16>
    %c0_97 = arith.constant 0 : index
    %c0_98 = arith.constant 0 : index
    %c0_99 = arith.constant 0 : index
    %237 = vector.load %arg23[%c0_97, %c0_98, %c0_99] : memref<1x256x128xbf16, #tpu.memory_space<vmem>>, vector<1x256x128xbf16>
    %238 = vector.shape_cast %237 : vector<1x256x128xbf16> to vector<256x128xbf16>
    %c0_100 = arith.constant 0 : index
    %c0_101 = arith.constant 0 : index
    %c0_102 = arith.constant 0 : index
    %239 = vector.load %arg24[%c0_100, %c0_101, %c0_102] : memref<1x1x128xf32, #tpu.memory_space<vmem>>, vector<1x1x128xf32>
    %240 = vector.shape_cast %239 : vector<1x1x128xf32> to vector<1x128xf32>
    %241 = vector.shape_cast %236 : vector<2x8x256xbf16> to vector<16x256xbf16>
    %cst_103 = arith.constant dense<0.000000e+00> : vector<16x128xf32>
    %242 = tpu.matmul %241, %238, %cst_103 {dimension_numbers = #tpu.dot_dimension_numbers<[1], [0], [0], [1], [0, 0, 1, 1], [], []>} : vector<16x256xbf16>, vector<256x128xbf16>, vector<16x128xf32> -> vector<16x128xf32>
    %243 = vector.broadcast %240 : vector<1x128xf32> to vector<16x128xf32>
    %244 = arith.addf %242, %243 : vector<16x128xf32>
    %245 = vector.shape_cast %244 : vector<16x128xf32> to vector<2x8x128xf32>
    %246 = arith.addf %245, %195 : vector<2x8x128xf32>
    %c0_104 = arith.constant 0 : index
    %c0_105 = arith.constant 0 : index
    %c0_106 = arith.constant 0 : index
    %247 = vector.load %arg27[%c0_104, %c0_105, %c0_106] : memref<2x8x128xf32, #tpu.memory_space<vmem>>, vector<2x8x128xf32>
    tpu.vector_store %arg27[%c0_104, %c0_105, %c0_106], %246 {strides = array<i32>} : memref<2x8x128xf32, #tpu.memory_space<vmem>>, vector<2x8x128xf32>,
    %c1_i32 = arith.constant 1 : i32
    %248 = arith.cmpi eq, %arg0, %c1_i32 : i32
    %249 = arith.extui %248 : i1 to i32
    %c0_i32_107 = arith.constant 0 : i32
    %250 = arith.cmpi ne, %249, %c0_i32_107 : i32
    scf.if %250 {
      %c0_108 = arith.constant 0 : index
      %c0_109 = arith.constant 0 : index
      %251 = vector.load %arg25[%c0_108, %c0_109] : memref<1x128xf32, #tpu.memory_space<vmem>>, vector<1x128xf32>
      %c0_110 = arith.constant 0 : index
      %c0_111 = arith.constant 0 : index
      %252 = vector.load %arg26[%c0_110, %c0_111] : memref<1x128xf32, #tpu.memory_space<vmem>>, vector<1x128xf32>
      %cst_112 = arith.constant dense<0.000000e+00> : vector<2x8xf32>
      %253 = vector.multi_reduction <add>, %246, %cst_112 [2] : vector<2x8x128xf32> to vector<2x8xf32>
      %254 = vector.shape_cast %253 : vector<2x8xf32> to vector<2x8x1xf32>
      %cst_113 = arith.constant 1.280000e+02 : f32
      %255 = vector.broadcast %cst_113 : f32 to vector<2x8x1xf32>
      %256 = arith.divf %254, %255 : vector<2x8x1xf32>
      %257 = vector.broadcast %256 : vector<2x8x1xf32> to vector<2x8x128xf32>
      %258 = arith.subf %246, %257 : vector<2x8x128xf32>
      %259 = arith.mulf %258, %258 : vector<2x8x128xf32>
      %cst_114 = arith.constant dense<0.000000e+00> : vector<2x8xf32>
      %260 = vector.multi_reduction <add>, %259, %cst_114 [2] : vector<2x8x128xf32> to vector<2x8xf32>
      %261 = vector.shape_cast %260 : vector<2x8xf32> to vector<2x8x1xf32>
      %cst_115 = arith.constant 1.280000e+02 : f32
      %262 = vector.broadcast %cst_115 : f32 to vector<2x8x1xf32>
      %263 = arith.divf %261, %262 : vector<2x8x1xf32>
      %264 = vector.broadcast %256 : vector<2x8x1xf32> to vector<2x8x128xf32>
      %265 = arith.subf %246, %264 : vector<2x8x128xf32>
      %cst_116 = arith.constant 9.99999997E-7 : f32
      %266 = vector.broadcast %cst_116 : f32 to vector<2x8x1xf32>
      %267 = arith.addf %263, %266 : vector<2x8x1xf32>
      %268 = math.rsqrt %267 : vector<2x8x1xf32>
      %269 = vector.broadcast %268 : vector<2x8x1xf32> to vector<2x8x128xf32>
      %270 = arith.mulf %265, %269 : vector<2x8x128xf32>
      %271 = vector.shape_cast %251 : vector<1x128xf32> to vector<1x1x128xf32>
      %272 = vector.broadcast %271 : vector<1x1x128xf32> to vector<2x8x128xf32>
      %273 = arith.mulf %270, %272 : vector<2x8x128xf32>
      %274 = vector.shape_cast %252 : vector<1x128xf32> to vector<1x1x128xf32>
      %275 = vector.broadcast %274 : vector<1x1x128xf32> to vector<2x8x128xf32>
      %276 = arith.addf %273, %275 : vector<2x8x128xf32>
      %c0_117 = arith.constant 0 : index
      %c0_118 = arith.constant 0 : index
      %c0_119 = arith.constant 0 : index
      %277 = vector.load %arg27[%c0_117, %c0_118, %c0_119] : memref<2x8x128xf32, #tpu.memory_space<vmem>>, vector<2x8x128xf32>
      tpu.vector_store %arg27[%c0_117, %c0_118, %c0_119], %276 {strides = array<i32>} : memref<2x8x128xf32, #tpu.memory_space<vmem>>, vector<2x8x128xf32>,
      %278 = vector.shape_cast %276 : vector<2x8x128xf32> to vector<16x128xf32>
      %279 = arith.truncf %278 : vector<16x128xf32> to vector<16x128xbf16>
      %c0_120 = arith.constant 0 : index
      %c0_121 = arith.constant 0 : index
      %280 = vector.load %arg28[%c0_120, %c0_121] : memref<16x128xbf16, #tpu.memory_space<vmem>>, vector<16x128xbf16>
      tpu.vector_store %arg28[%c0_120, %c0_121], %279 {strides = array<i32>} : memref<16x128xbf16, #tpu.memory_space<vmem>>, vector<16x128xbf16>,
    } else {
    }
    return
  }
  func.func @transform_0(%arg0: i32) -> (i32, i32, i32) {
    %c0_i32 = arith.constant 0 : i32
    %c0_i32_0 = arith.constant 0 : i32
    %c0_i32_1 = arith.constant 0 : i32
    %c0_i32_2 = arith.constant 0 : i32
    return %c0_i32, %c0_i32_0, %c0_i32_1 : i32, i32, i32
  }
  func.func @transform_1(%arg0: i32) -> (i32, i32, i32) {
    %c0_i32 = arith.constant 0 : i32
    %c0_i32_0 = arith.constant 0 : i32
    %c0_i32_1 = arith.constant 0 : i32
    %c0_i32_2 = arith.constant 0 : i32
    return %c0_i32, %c0_i32_0, %c0_i32_1 : i32, i32, i32
  }
  func.func @transform_2(%arg0: i32) -> (i32, i32, i32) {
    %c0_i32 = arith.constant 0 : i32
    %c0_i32_0 = arith.constant 0 : i32
    %c0_i32_1 = arith.constant 0 : i32
    %c0_i32_2 = arith.constant 0 : i32
    return %c0_i32, %c0_i32_0, %c0_i32_1 : i32, i32, i32
  }
  func.func @transform_3(%arg0: i32) -> (i32, i32, i32) {
    %c0_i32 = arith.constant 0 : i32
    %c0_i32_0 = arith.constant 0 : i32
    %c0_i32_1 = arith.constant 0 : i32
    %c0_i32_2 = arith.constant 0 : i32
    return %c0_i32, %c0_i32_0, %c0_i32_1 : i32, i32, i32
  }
  func.func @transform_4(%arg0: i32) -> (i32, i32, i32) {
    %c0_i32 = arith.constant 0 : i32
    %c0_i32_0 = arith.constant 0 : i32
    %c0_i32_1 = arith.constant 0 : i32
    return %arg0, %c0_i32, %c0_i32_0 : i32, i32, i32
  }
  func.func @transform_5(%arg0: i32) -> (i32, i32, i32) {
    %c0_i32 = arith.constant 0 : i32
    %c0_i32_0 = arith.constant 0 : i32
    %c0_i32_1 = arith.constant 0 : i32
    return %arg0, %c0_i32, %c0_i32_0 : i32, i32, i32
  }
  func.func @transform_6(%arg0: i32) -> (i32, i32, i32) {
    %c0_i32 = arith.constant 0 : i32
    %c0_i32_0 = arith.constant 0 : i32
    %c0_i32_1 = arith.constant 0 : i32
    return %arg0, %c0_i32, %c0_i32_0 : i32, i32, i32
  }
  func.func @transform_7(%arg0: i32) -> (i32, i32, i32) {
    %c0_i32 = arith.constant 0 : i32
    %c0_i32_0 = arith.constant 0 : i32
    %c0_i32_1 = arith.constant 0 : i32
    return %arg0, %c0_i32, %c0_i32_0 : i32, i32, i32
  }
  func.func @transform_8(%arg0: i32) -> (i32, i32, i32) {
    %c0_i32 = arith.constant 0 : i32
    %c0_i32_0 = arith.constant 0 : i32
    %c0_i32_1 = arith.constant 0 : i32
    return %arg0, %c0_i32, %c0_i32_0 : i32, i32, i32
  }
  func.func @transform_9(%arg0: i32) -> (i32, i32, i32) {
    %c0_i32 = arith.constant 0 : i32
    %c0_i32_0 = arith.constant 0 : i32
    %c0_i32_1 = arith.constant 0 : i32
    return %arg0, %c0_i32, %c0_i32_0 : i32, i32, i32
  }
  func.func @transform_10(%arg0: i32) -> (i32, i32, i32) {
    %c0_i32 = arith.constant 0 : i32
    %c0_i32_0 = arith.constant 0 : i32
    %c0_i32_1 = arith.constant 0 : i32
    return %arg0, %c0_i32, %c0_i32_0 : i32, i32, i32
  }
  func.func @transform_11(%arg0: i32) -> (i32, i32, i32) {
    %c0_i32 = arith.constant 0 : i32
    %c0_i32_0 = arith.constant 0 : i32
    %c0_i32_1 = arith.constant 0 : i32
    return %arg0, %c0_i32, %c0_i32_0 : i32, i32, i32
  }
  func.func @transform_12(%arg0: i32) -> (i32, i32, i32) {
    %c0_i32 = arith.constant 0 : i32
    %c0_i32_0 = arith.constant 0 : i32
    %c0_i32_1 = arith.constant 0 : i32
    return %arg0, %c0_i32, %c0_i32_0 : i32, i32, i32
  }
  func.func @transform_13(%arg0: i32) -> (i32, i32, i32) {
    %c0_i32 = arith.constant 0 : i32
    %c0_i32_0 = arith.constant 0 : i32
    %c0_i32_1 = arith.constant 0 : i32
    return %arg0, %c0_i32, %c0_i32_0 : i32, i32, i32
  }
  func.func @transform_14(%arg0: i32) -> (i32, i32, i32) {
    %c0_i32 = arith.constant 0 : i32
    %c0_i32_0 = arith.constant 0 : i32
    %c0_i32_1 = arith.constant 0 : i32
    return %arg0, %c0_i32, %c0_i32_0 : i32, i32, i32
  }
  func.func @transform_15(%arg0: i32) -> (i32, i32, i32) {
    %c0_i32 = arith.constant 0 : i32
    %c0_i32_0 = arith.constant 0 : i32
    %c0_i32_1 = arith.constant 0 : i32
    return %arg0, %c0_i32, %c0_i32_0 : i32, i32, i32
  }
  func.func @transform_16(%arg0: i32) -> (i32, i32, i32) {
    %c0_i32 = arith.constant 0 : i32
    %c0_i32_0 = arith.constant 0 : i32
    %c0_i32_1 = arith.constant 0 : i32
    return %arg0, %c0_i32, %c0_i32_0 : i32, i32, i32
  }
  func.func @transform_17(%arg0: i32) -> (i32, i32, i32) {
    %c0_i32 = arith.constant 0 : i32
    %c0_i32_0 = arith.constant 0 : i32
    %c0_i32_1 = arith.constant 0 : i32
    return %arg0, %c0_i32, %c0_i32_0 : i32, i32, i32
  }
  func.func @transform_18(%arg0: i32) -> (i32, i32, i32) {
    %c0_i32 = arith.constant 0 : i32
    %c0_i32_0 = arith.constant 0 : i32
    %c0_i32_1 = arith.constant 0 : i32
    return %arg0, %c0_i32, %c0_i32_0 : i32, i32, i32
  }
  func.func @transform_19(%arg0: i32) -> (i32, i32, i32) {
    %c0_i32 = arith.constant 0 : i32
    %c0_i32_0 = arith.constant 0 : i32
    %c0_i32_1 = arith.constant 0 : i32
    return %arg0, %c0_i32, %c0_i32_0 : i32, i32, i32
  }
  func.func @transform_20(%arg0: i32) -> (i32, i32, i32) {
    %c0_i32 = arith.constant 0 : i32
    %c0_i32_0 = arith.constant 0 : i32
    %c0_i32_1 = arith.constant 0 : i32
    return %arg0, %c0_i32, %c0_i32_0 : i32, i32, i32
  }
  func.func @transform_21(%arg0: i32) -> (i32, i32, i32) {
    %c0_i32 = arith.constant 0 : i32
    %c0_i32_0 = arith.constant 0 : i32
    %c0_i32_1 = arith.constant 0 : i32
    return %arg0, %c0_i32, %c0_i32_0 : i32, i32, i32
  }
  func.func @transform_22(%arg0: i32) -> (i32, i32, i32) {
    %c0_i32 = arith.constant 0 : i32
    %c0_i32_0 = arith.constant 0 : i32
    %c0_i32_1 = arith.constant 0 : i32
    return %arg0, %c0_i32, %c0_i32_0 : i32, i32, i32
  }
  func.func @transform_23(%arg0: i32) -> (i32, i32, i32) {
    %c0_i32 = arith.constant 0 : i32
    %c0_i32_0 = arith.constant 0 : i32
    %c0_i32_1 = arith.constant 0 : i32
    return %arg0, %c0_i32, %c0_i32_0 : i32, i32, i32
  }
  func.func @transform_24(%arg0: i32) -> (i32, i32) {
    %c0_i32 = arith.constant 0 : i32
    %c0_i32_0 = arith.constant 0 : i32
    %c0_i32_1 = arith.constant 0 : i32
    return %c0_i32, %c0_i32_0 : i32, i32
  }
  func.func @transform_25(%arg0: i32) -> (i32, i32) {
    %c0_i32 = arith.constant 0 : i32
    %c0_i32_0 = arith.constant 0 : i32
    %c0_i32_1 = arith.constant 0 : i32
    return %c0_i32, %c0_i32_0 : i32, i32
  }
  func.func @transform_26(%arg0: i32) -> (i32, i32, i32) {
    %c0_i32 = arith.constant 0 : i32
    %c0_i32_0 = arith.constant 0 : i32
    %c0_i32_1 = arith.constant 0 : i32
    %c0_i32_2 = arith.constant 0 : i32
    return %c0_i32, %c0_i32_0, %c0_i32_1 : i32, i32, i32
  }
  func.func @transform_27(%arg0: i32) -> (i32, i32) {
    %c0_i32 = arith.constant 0 : i32
    %c0_i32_0 = arith.constant 0 : i32
    %c0_i32_1 = arith.constant 0 : i32
    return %c0_i32, %c0_i32_0 : i32, i32
  }
}

</mosaic_0001>

<bundles_post_ra>
// kernel: tpu_custom_call.1
= control target key start
LH: loop header
LB: loop body
LE: loop exit
PB: predicated region body
PF: predicated region fallthrough
CT: control target
= control target key end

     0   :  { %s6691_s0 = inlined_call_operand.hbm [shape: f32[2,8,128], index: 0, kind: input, shape index: {}]   ;;  %s6692_s1 = inlined_call_operand.hbm [shape: bf16[2,8,128], index: 1, kind: input, shape index: {}]   ;;  %s6693_s2 = inlined_call_operand.hbm [shape: f32[8,1,8], index: 2, kind: input, shape index: {}]   ;;  %s6694_s3 = inlined_call_operand.hbm [shape: f32[8,1,8], index: 3, kind: input, shape index: {}]   ;;  %s6695_s4 = inlined_call_operand.hbm [shape: f32[2,1,128], index: 4, kind: input, shape index: {}]   ;;  %s6696_s5 = inlined_call_operand.hbm [shape: f32[2,1,128], index: 5, kind: input, shape index: {}]   ;;  %s6697_s6 = inlined_call_operand.hbm [shape: f32[2,1,128], index: 6, kind: input, shape index: {}]   ;;  %s6698_s7 = inlined_call_operand.hbm [shape: f32[2,1,128], index: 7, kind: input, shape index: {}]   ;;  %s6699_s8 = inlined_call_operand.hbm [shape: f32[2,1,128], index: 8, kind: input, shape index: {}]   ;;  %s6700_s9 = inlined_call_operand.hbm [shape: f32[2,1,128], index: 9, kind: input, shape index: {}]   ;;  %s6701_s10 = inlined_call_operand.hbm [shape: bf16[2,128,384], index: 10, kind: input, shape index: {}]   ;;  %s6702_s11 = inlined_call_operand.vmem [shape: f32[2,1,384], index: 11, kind: input, shape index: {}]   ;;  %s6703_s12 = inlined_call_operand.hbm [shape: bf16[2,128,128], index: 12, kind: input, shape index: {}]   ;;  %s6704_s13 = inlined_call_operand.hbm [shape: f32[2,1,128], index: 13, kind: input, shape index: {}]   ;;  %s6705_s14 = inlined_call_operand.hbm [shape: bf16[2,128,128], index: 14, kind: input, shape index: {}]   ;;  %s6706_s15 = inlined_call_operand.hbm [shape: f32[2,1,128], index: 15, kind: input, shape index: {}]   ;;  %s6707_s16 = inlined_call_operand.hbm [shape: bf16[2,128,256], index: 16, kind: input, shape index: {}]   ;;  %s6708_s17 = inlined_call_operand.vmem [shape: f32[2,1,256], index: 17, kind: input, shape index: {}]   ;;  %s6709_s18 = inlined_call_operand.hbm [shape: bf16[2,128,128], index: 18, kind: input, shape index: {}]   ;;  %s6710_s19 = inlined_call_operand.vmem [shape: f32[2,1,128], index: 19, kind: input, shape index: {}]   ;;  %s6711_s20 = inlined_call_operand.hbm [shape: bf16[2,128,256], index: 20, kind: input, shape index: {}]   ;;  %s6712_s21 = inlined_call_operand.vmem [shape: f32[2,1,256], index: 21, kind: input, shape index: {}]   ;;  %s6713_s22 = inlined_call_operand.hbm [shape: bf16[2,256,128], index: 22, kind: input, shape index: {}]   ;;  %s6714_s23 = inlined_call_operand.vmem [shape: f32[2,1,128], index: 23, kind: input, shape index: {}]   ;;  %s6715_s24 = inlined_call_operand.vmem [shape: f32[1,128], index: 24, kind: input, shape index: {}]   ;;  %s6716_s25 = inlined_call_operand.vmem [shape: f32[1,128], index: 25, kind: input, shape index: {}]   ;;  %s6717_s26 = inlined_call_operand.hbm [shape: f32[2,8,128], index: 26, kind: output, shape index: {0}]   ;;  %s6718_s27 = inlined_call_operand.hbm [shape: bf16[16,128], index: 27, kind: output, shape index: {1}]  }
   0x1   :  { %6745 = sst [smem:[#allocation40_spill]] %s6691_s0 }
   0x2   :  { %6746 = sst [smem:[#allocation41_spill]] %s6692_s1 }
   0x3   :  { %6747 = sst [smem:[#allocation42_spill]] %s6693_s2 }
   0x4   :  { %6748 = sst [smem:[#allocation43_spill]] %s6694_s3 }
   0x5   :  { %6749 = sst [smem:[#allocation44_spill]] %s6695_s4 }
   0x6   :  { %6750 = sst [smem:[#allocation45_spill]] %s6696_s5 }
   0x7   :  { %6751 = sst [smem:[#allocation46_spill]] %s6697_s6 }
   0x8   :  { %6752 = sst [smem:[#allocation47_spill]] %s6698_s7 }
   0x9   :  { %6753 = sst [smem:[#allocation48_spill]] %s6699_s8 }
   0xa   :  { %6754 = sst [smem:[#allocation49_spill]] %s6700_s9 }
   0xb   :  { %6755 = sst [smem:[#allocation50_spill]] %s6701_s10 }
   0xc   :  { %6756 = sst [smem:[#allocation51_spill]] %s6702_s11 }
   0xd   :  { %6757 = sst [smem:[#allocation52_spill]] %s6703_s12 }
   0xe   :  { %6758 = sst [smem:[#allocation53_spill]] %s6704_s13 }
   0xf   :  { %6759 = sst [smem:[#allocation54_spill]] %s6705_s14 }
  0x10   :  { %6760 = sst [smem:[#allocation55_spill]] %s6706_s15 }
  0x11   :  { %6761 = sst [smem:[#allocation56_spill]] %s6707_s16 }
  0x12   :  { %6762 = sst [smem:[#allocation57_spill]] %s6708_s17 }
  0x13   :  { %6763 = sst [smem:[#allocation58_spill]] %s6709_s18 }
  0x14   :  { %6764 = sst [smem:[#allocation59_spill]] %s6710_s19 }
  0x15   :  { %6765 = sst [smem:[#allocation60_spill]] %s6711_s20 }
  0x16   :  { %6766 = sst [smem:[#allocation61_spill]] %s6712_s21 }
  0x17   :  { %6767 = sst [smem:[#allocation62_spill]] %s6713_s22 }
  0x18   :  { %6768 = sst [smem:[#allocation63_spill]] %s6714_s23 }
  0x19   :  { %6769 = sst [smem:[#allocation64_spill]] %s6715_s24 }
  0x1a   :  { %6770 = sst [smem:[#allocation65_spill]] %s6716_s25 }
  0x1b   :  { %6771 = sst [smem:[#allocation66_spill]] %s6717_s26 }
  0x1c   :  { %6772 = sst [smem:[#allocation67_spill]] %s6718_s27 }
  0x1d   :  { %33 = vsyncpa [#allocation4], 0 }
  0x1e   :  { %34 = vsyncpa [#allocation7], 0 }
  0x1f   :  { %35 = vsyncpa [#allocation10], 0 }
  0x20   :  { %36 = vsyncpa [#allocation5], 0 }
  0x21   :  { %37 = vsyncpa [#allocation28], 0  ;;  %s5767_s7 = smov 0   ;;  %s5769_s4 = smov 0  }
  0x22   :  { %s5771_s8 = smov 0   ;;  %s5773_s30 = smov 0  }
  0x23 LB: > { %6773 = sst [smem:[#allocation35_spill]] %s5591_s4  ;;  %s5786_s9 = sadd.s32 4294967295, %s5599_s30   ;;  %s5599_s30 = sphi %s5773_s30, %s6821_s30   ;;  %s5595_s8 = sphi %s5771_s8, %s6825_s8   ;;  %s5591_s4 = sphi %s5769_s4, %s6824_s4   ;;  %s5587_s7 = sphi %s5767_s7, %s6822_s7  }
  0x24   : > { %6774 = sst [smem:[#allocation36_spill]] %s5786_s9  ;;  %s5789_s5 = sadd.s32 1, %s5599_s30  }
  0x25   : > { %6775 = sst [smem:[#allocation37_spill]] %s5789_s5  ;;  %s131_s28 = ssub.s32 %s5599_s30, %s5789_s5 }
  0x26   : > { %s134_s0 = sadd.s32 1, %s5595_s8  ;;  %p132_p0 = scmp.eq.s32.totalorder %s131_s28, 0 }
  0x27   : > { %p141_p1 = scmp.ne.s32.totalorder %s5595_s8, %s5591_s4  ;;  %p142_p2 = scmp.eq.s32.totalorder %s5599_s30, 0 }
  0x28   : > { %p147_p3 = scmp.ne.s32.totalorder %s5591_s4, %s5587_s7  ;;  %p148_p5 = scmp.eq.s32.totalorder %s5786_s9, 0 }
  0x29   : > { %s5799_s10 = scalar_select %p132_p0, %s5595_s8, %s134_s0  }
  0x2a   : > { %p5801_p4 = por %p142_p2, %p141_p1  ;;  %p4122_p6 = scmp.ge.s32.totalorder %s5599_s30, 1 }
  0x2b   : > { %6776 = sst [smem:[#allocation38_spill]] %s5799_s10  ;;  %p736_p7 = scmp.lt.s32.totalorder %s5599_s30, 3 }
  0x2c   : > { %p5810_p8 = por %p148_p5, %p147_p3  ;;  %p4123_p9 = scmp.ne.s32.totalorder %s5786_s9, 0 }
  0x2d   : > { %p5815_p10 = pnand %p4122_p6, %p736_p7  ;;  %s6781_s3 = sld [smem:[#allocation41_spill]] }
  0x2e   : > { %s6778_s1 = scalar_select %p5810_p8, 1, 0 }
  0x2f   : > { %p4754_p11 = pneg %p5815_p10  ;;  %s5601_s28 = smov [#allocation6]  }
  0x30   : > { %6779 = sst [smem:[#allocation39_spill]] %s6778_s1  ;;  %s763_s0 = sshll.u32 %s5601_s28, 4  ;;  %s764_s0 = int_to_ptr.vmem [resolvable:$true] %s763_s0 }
  0x31   : > { %p5826_p12 = pnand %p4754_p11, %p148_p5  ;;  %s6783_s26 = sld [smem:[#allocation40_spill]] }
  0x32   : > { %s5602_s11 = smov 64   ;;  %s5603_s2 = smov 4  }
  0x33   : > { %s761_s7 = sshll.u32 %s6781_s3, 4  ;;  %s5604_s3 = smov [#allocation3]   ;;  %s762_s7 = int_to_ptr.hbm [resolvable:$true] %s761_s7 }
  0x34   : > { %4760 = dma.hbm_to_vmem [thread:$0]  (!%p5826_p12), %s762_s7, 128, %s764_s0, [#allocation7], %s5602_s11, %s5602_s11, %s5603_s2  }
  0x35   : > { %s749_s28 = sshll.u32 %s5604_s3, 4  ;;  %s5605_s24 = smov 128   ;;  %s750_s28 = int_to_ptr.vmem [resolvable:$true] %s749_s28 }
  0x36   : > { %s5606_s23 = smov 8   ;;  %s6784_s27 = sld [smem:[#allocation42_spill]] }
  0x37   : > { %s747_s25 = sshll.u32 %s6783_s26, 4  ;;  %s5607_s26 = smov [#allocation8]   ;;  %s748_s25 = int_to_ptr.hbm [resolvable:$true] %s747_s25 }
  0x38   : > { %4757 = dma.hbm_to_vmem [thread:$0]  (!%p5826_p12), %s748_s25, 256, %s750_s28, [#allocation4], %s5605_s24, %s5605_s24, %s5606_s23  }
  0x39   : > { %s777_s17 = sshll.u32 %s5607_s26, 4  ;;  %s6785_s9 = sld [smem:[#allocation43_spill]]  ;;  %s778_s17 = int_to_ptr.vmem [resolvable:$true] %s777_s17 }
  0x3a   : > { %s5608_s0 = smov 16   ;;  %s5609_s11 = smov 1  }
  0x3b   : > { %s5610_s2 = smov [#allocation9]   ;;  %p4127_p13 = scmp.ge.s32.totalorder %s5599_s30, 2 }
  0x3c   : > { %s775_s5 = sshll.u32 %s6784_s27, 4  ;;  %s791_s3 = sshll.u32 %s5610_s2, 4  ;;  %s776_s5 = int_to_ptr.hbm [resolvable:$true] %s775_s5  ;;  %s792_s3 = int_to_ptr.vmem [resolvable:$true] %s791_s3 }
  0x3d   : > { %4763 = dma.hbm_to_vmem [thread:$0]  (!%p5826_p12), %s776_s5, 128, %s778_s17, [#allocation7], %s5608_s0, %s5608_s0, %s5609_s11  }
  0x3e   : > { %807 = sbr.rel (%p4127_p13) target bundleno = 366 (0x16e), region = 40  ;;  %s811_s19 = sand.u32 (!%p4127_p13), 1, %s5599_s30  }
  0x3f   : > { %s789_s7 = sshll.u32 %s6785_s9, 4  ;;  %s5850_s21 = sand.u32 (!%p4127_p13), 1, %s5595_s8   ;;  %s790_s7 = int_to_ptr.hbm [resolvable:$true] %s789_s7 }
  0x40   : > { %4766 = dma.hbm_to_vmem [thread:$0]  (!%p5826_p12), %s790_s7, 128, %s792_s3, [#allocation10], %s5608_s0, %s5608_s0, %s5609_s11  }
  0x41   : > { %s6786_s25 = sld [smem:[#allocation44_spill]] (!%p4127_p13)  ;;  %s814_s4 = scalar_lea.vmem (!%p4127_p13), [#allocation11], %s5850_s21 }
  0x42   : > { %s821_s9 = sshll.u32 (!%p4127_p13), %s814_s4, 4  ;;  %s5857_s10 = scalar_lea.sflag (!%p4127_p13), [#allocation4], %s811_s19  ;;  %s822_s9 = int_to_ptr.vmem [resolvable:$true] %s821_s9 }
  0x47   : > { %s817_s17 = scalar_lea.hbm %s6786_s25, %s5599_s30  ;;  %s5075_s7 = scalar_lea.hbm %s6786_s25, 2 }
  0x48   : > { %s819_s1 = sshll.u32 %s817_s17, 4  ;;  %s820_s1 = int_to_ptr.hbm [resolvable:$true] %s819_s1 }
  0x49   : > { %s5069_s28 = sshra.s32 %s820_s1, 4  ;;  %s5070_s28 = int_to_ptr.hbm [resolvable:$true] %s5069_s28 }
  0x4a   : > { %s5071_s27 = scalar_lea.hbm %s5070_s28, 1  ;;  %p5076_p3 = scmp.lt.s32.totalorder %s5070_s28, %s6786_s25 }
  0x4b   : > { %p5072_p0 = scmp.ne.s32.totalorder %s5070_s28, %s5071_s27  ;;  %p5077_p6 = scmp.lt.s32.totalorder %s5075_s7, %s5071_s27 }
  0x4d   : > { %p5073_p1 = pnand %p5072_p0, %p5801_p4  ;;  %p5078_p7 = por %p5077_p6, %p5076_p3 }
  0x4f   : > { %p5074_p2 = pneg %p5073_p1 }
  0x51   : > { %p5079_p11 = pnand %p5078_p7, %p5074_p2 }
  0x53   : > { %5082 = shalt.err (!%p5079_p11)
}
  0x54   : > { %4708 = dma.hbm_to_vmem [thread:$0]  (%p5801_p4), %s820_s1, 16, %s822_s9, %s5857_s10  }
  0x55   : > { %s6787_s19 = sld [smem:[#allocation45_spill]]  ;;  %s831_s24 = scalar_lea.vmem [#allocation12], %s5850_s21 }
  0x56   : > { %s838_s17 = sshll.u32 %s831_s24, 4  ;;  %s839_s17 = int_to_ptr.vmem [resolvable:$true] %s838_s17 }
  0x5b   : > { %s834_s23 = scalar_lea.hbm %s6787_s19, %s5599_s30  ;;  %s5103_s9 = scalar_lea.hbm %s6787_s19, 2 }
  0x5c   : > { %s836_s4 = sshll.u32 %s834_s23, 4  ;;  %s837_s4 = int_to_ptr.hbm [resolvable:$true] %s836_s4 }
  0x5d   : > { %s5097_s28 = sshra.s32 %s837_s4, 4  ;;  %s5098_s28 = int_to_ptr.hbm [resolvable:$true] %s5097_s28 }
  0x5e   : > { %s5099_s27 = scalar_lea.hbm %s5098_s28, 1  ;;  %p5104_p1 = scmp.lt.s32.totalorder %s5098_s28, %s6787_s19 }
  0x5f   : > { %p5100_p12 = scmp.ne.s32.totalorder %s5098_s28, %s5099_s27  ;;  %p5105_p2 = scmp.lt.s32.totalorder %s5103_s9, %s5099_s27 }
  0x61   : > { %p5101_p13 = pnand %p5100_p12, %p5801_p4  ;;  %p5106_p3 = por %p5105_p2, %p5104_p1 }
  0x63   : > { %p5102_p0 = pneg %p5101_p13 }
  0x65   : > { %p5107_p6 = pnand %p5106_p3, %p5102_p0 }
  0x67   : > { %5110 = shalt.err (!%p5107_p6)
}
  0x68   : > { %4709 = dma.hbm_to_vmem [thread:$0]  (%p5801_p4), %s837_s4, 16, %s839_s17, %s5857_s10  }
  0x69   : > { %s6788_s2 = sld [smem:[#allocation46_spill]]  ;;  %s848_s23 = scalar_lea.vmem [#allocation13], %s5850_s21 }
  0x6a   : > { %s855_s24 = sshll.u32 %s848_s23, 4  ;;  %s856_s24 = int_to_ptr.vmem [resolvable:$true] %s855_s24 }
  0x6f   : > { %s851_s3 = scalar_lea.hbm %s6788_s2, %s5599_s30  ;;  %s5131_s17 = scalar_lea.hbm %s6788_s2, 2 }
  0x70   : > { %s853_s5 = sshll.u32 %s851_s3, 4  ;;  %s854_s5 = int_to_ptr.hbm [resolvable:$true] %s853_s5 }
  0x71   : > { %s5125_s28 = sshra.s32 %s854_s5, 4  ;;  %s5126_s28 = int_to_ptr.hbm [resolvable:$true] %s5125_s28 }
  0x72   : > { %s5127_s27 = scalar_lea.hbm %s5126_s28, 1  ;;  %p5132_p13 = scmp.lt.s32.totalorder %s5126_s28, %s6788_s2 }
  0x73   : > { %p5128_p7 = scmp.ne.s32.totalorder %s5126_s28, %s5127_s27  ;;  %p5133_p0 = scmp.lt.s32.totalorder %s5131_s17, %s5127_s27 }
  0x75   : > { %p5129_p11 = pnand %p5128_p7, %p5801_p4  ;;  %p5134_p1 = por %p5133_p0, %p5132_p13 }
  0x77   : > { %p5130_p12 = pneg %p5129_p11 }
  0x79   : > { %p5135_p2 = pnand %p5134_p1, %p5130_p12 }
  0x7b   : > { %5138 = shalt.err (!%p5135_p2)
}
  0x7c   : > { %4710 = dma.hbm_to_vmem [thread:$0]  (%p5801_p4), %s854_s5, 16, %s856_s24, %s5857_s10  }
  0x7d   : > { %s6789_s11 = sld [smem:[#allocation47_spill]]  ;;  %s865_s23 = scalar_lea.vmem [#allocation14], %s5850_s21 }
  0x7e   : > { %s872_s26 = sshll.u32 %s865_s23, 4  ;;  %s873_s26 = int_to_ptr.vmem [resolvable:$true] %s872_s26 }
  0x83   : > { %s868_s3 = scalar_lea.hbm %s6789_s11, %s5599_s30  ;;  %s5159_s24 = scalar_lea.hbm %s6789_s11, 2 }
  0x84   : > { %s870_s9 = sshll.u32 %s868_s3, 4  ;;  %s871_s9 = int_to_ptr.hbm [resolvable:$true] %s870_s9 }
  0x85   : > { %s5153_s28 = sshra.s32 %s871_s9, 4  ;;  %s5154_s28 = int_to_ptr.hbm [resolvable:$true] %s5153_s28 }
  0x86   : > { %s5155_s27 = scalar_lea.hbm %s5154_s28, 1  ;;  %p5160_p11 = scmp.lt.s32.totalorder %s5154_s28, %s6789_s11 }
  0x87   : > { %p5156_p3 = scmp.ne.s32.totalorder %s5154_s28, %s5155_s27  ;;  %p5161_p12 = scmp.lt.s32.totalorder %s5159_s24, %s5155_s27 }
  0x89   : > { %p5157_p6 = pnand %p5156_p3, %p5801_p4  ;;  %p5162_p13 = por %p5161_p12, %p5160_p11 }
  0x8b   : > { %p5158_p7 = pneg %p5157_p6 }
  0x8d   : > { %p5163_p0 = pnand %p5162_p13, %p5158_p7 }
  0x8f   : > { %5166 = shalt.err (!%p5163_p0)
}
  0x90   : > { %4711 = dma.hbm_to_vmem [thread:$0]  (%p5801_p4), %s871_s9, 16, %s873_s26, %s5857_s10  }
  0x91   : > { %s6790_s3 = sld [smem:[#allocation48_spill]]  ;;  %s882_s17 = scalar_lea.vmem [#allocation15], %s5850_s21 }
  0x92   : > { %s889_s4 = sshll.u32 %s882_s17, 4  ;;  %s890_s4 = int_to_ptr.vmem [resolvable:$true] %s889_s4 }
  0x97   : > { %s885_s23 = scalar_lea.hbm %s6790_s3, %s5599_s30  ;;  %s5187_s26 = scalar_lea.hbm %s6790_s3, 2 }
  0x98   : > { %s887_s2 = sshll.u32 %s885_s23, 4  ;;  %s888_s2 = int_to_ptr.hbm [resolvable:$true] %s887_s2 }
  0x99   : > { %s5181_s28 = sshra.s32 %s888_s2, 4  ;;  %s5182_s28 = int_to_ptr.hbm [resolvable:$true] %s5181_s28 }
  0x9a   : > { %s5183_s27 = scalar_lea.hbm %s5182_s28, 1  ;;  %p5188_p6 = scmp.lt.s32.totalorder %s5182_s28, %s6790_s3 }
  0x9b   : > { %p5184_p1 = scmp.ne.s32.totalorder %s5182_s28, %s5183_s27  ;;  %p5189_p7 = scmp.lt.s32.totalorder %s5187_s26, %s5183_s27 }
  0x9d   : > { %p5185_p2 = pnand %p5184_p1, %p5801_p4  ;;  %p5190_p11 = por %p5189_p7, %p5188_p6 }
  0x9f   : > { %p5186_p3 = pneg %p5185_p2 }
  0xa1   : > { %p5191_p12 = pnand %p5190_p11, %p5186_p3 }
  0xa3   : > { %5194 = shalt.err (!%p5191_p12)
}
  0xa4   : > { %4712 = dma.hbm_to_vmem [thread:$0]  (%p5801_p4), %s888_s2, 16, %s890_s4, %s5857_s10  }
  0xa5   : > { %s6791_s23 = sld [smem:[#allocation49_spill]]  ;;  %s899_s24 = scalar_lea.vmem [#allocation16], %s5850_s21 }
  0xa6   : > { %s906_s5 = sshll.u32 %s899_s24, 4  ;;  %s4696_s28 = smul.u32 192, %s5850_s21  ;;  %s907_s5 = int_to_ptr.vmem [resolvable:$true] %s906_s5 }
  0xab   : > { %s902_s17 = scalar_lea.hbm %s6791_s23, %s5599_s30  ;;  %s5215_s2 = scalar_lea.hbm %s6791_s23, 2 }
  0xac   : > { %s904_s9 = sshll.u32 %s902_s17, 4  ;;  %s905_s9 = int_to_ptr.hbm [resolvable:$true] %s904_s9 }
  0xad   : > { %s5209_s27 = sshra.s32 %s905_s9, 4  ;;  %s5210_s27 = int_to_ptr.hbm [resolvable:$true] %s5209_s27 }
  0xae   : > { %s5211_s26 = scalar_lea.hbm %s5210_s27, 1  ;;  %p5216_p2 = scmp.lt.s32.totalorder %s5210_s27, %s6791_s23 }
  0xaf   : > { %p5212_p13 = scmp.ne.s32.totalorder %s5210_s27, %s5211_s26  ;;  %p5217_p3 = scmp.lt.s32.totalorder %s5215_s2, %s5211_s26 }
  0xb1   : > { %p5213_p0 = pnand %p5212_p13, %p5801_p4  ;;  %p5218_p6 = por %p5217_p3, %p5216_p2 }
  0xb3   : > { %p5214_p1 = pneg %p5213_p0 }
  0xb5   : > { %p5219_p7 = pnand %p5218_p6, %p5214_p1 }
  0xb7   : > { %5222 = shalt.err (!%p5219_p7)
}
  0xb8   : > { %4713 = dma.hbm_to_vmem [thread:$0]  (%p5801_p4), %s905_s9, 16, %s907_s5, %s5857_s10  }
  0xb9   : > { %s4697_s0 = smul.u32 192, %s5599_s30  ;;  %s917_s17 = scalar_lea.vmem [#allocation17], %s4696_s28 }
  0xba   : > { %s925_s24 = sshll.u32 %s917_s17, 4  ;;  %s6792_s11 = sld [smem:[#allocation50_spill]]  ;;  %s926_s24 = int_to_ptr.vmem [resolvable:$true] %s925_s24 }
  0xbb   : > { %s5956_s26 = sshll.u32 %s5850_s21, 6 }
  0xc0   : > { %s922_s19 = scalar_lea.hbm %s6792_s11, %s4697_s0  ;;  %s5243_s28 = scalar_lea.hbm %s6792_s11, 384 }
  0xc1   : > { %s923_s27 = sshll.u32 %s922_s19, 4  ;;  %s924_s27 = int_to_ptr.hbm [resolvable:$true] %s923_s27 }
  0xc2   : > { %s5237_s2 = sshra.s32 %s924_s27, 4  ;;  %s5238_s2 = int_to_ptr.hbm [resolvable:$true] %s5237_s2 }
  0xc3   : > { %s5239_s4 = scalar_lea.hbm %s5238_s2, 192  ;;  %p5244_p0 = scmp.lt.s32.totalorder %s5238_s2, %s6792_s11 }
  0xc4   : > { %p5240_p11 = scmp.ne.s32.totalorder %s5238_s2, %s5239_s4  ;;  %p5245_p1 = scmp.lt.s32.totalorder %s5243_s28, %s5239_s4 }
  0xc6   : > { %p5241_p12 = pnand %p5240_p11, %p5801_p4  ;;  %p5246_p2 = por %p5245_p1, %p5244_p0 }
  0xc8   : > { %p5242_p13 = pneg %p5241_p12 }
  0xca   : > { %p5247_p3 = pnand %p5246_p2, %p5242_p13 }
  0xcc   : > { %5250 = shalt.err (!%p5247_p3)
}
  0xcd   : > { %s5611_s19 = smov 192   ;;  %s5612_s0 = smov 12  }
  0xce   : > { %4714 = dma.hbm_to_vmem [thread:$0]  (%p5801_p4), %s924_s27, 3072, %s926_s24, %s5857_s10, %s5611_s19, %s5611_s19, %s5612_s0  }
  0xcf   : > { %s5970_s3 = sshll.u32 %s5599_s30, 6  ;;  %s6793_s12 = sld [smem:[#allocation52_spill]] }
  0xd0   : > { %s946_s4 = scalar_lea.vmem [#allocation18], %s5956_s26 }
  0xd1   : > { %s954_s9 = sshll.u32 %s946_s4, 4  ;;  %s955_s9 = int_to_ptr.vmem [resolvable:$true] %s954_s9 }
  0xd5   : > { %s951_s2 = scalar_lea.hbm %s6793_s12, %s5970_s3  ;;  %s5271_s19 = scalar_lea.hbm %s6793_s12, 128 }
  0xd6   : > { %s952_s28 = sshll.u32 %s951_s2, 4  ;;  %s953_s28 = int_to_ptr.hbm [resolvable:$true] %s952_s28 }
  0xd7   : > { %s5265_s7 = sshra.s32 %s953_s28, 4  ;;  %s5266_s7 = int_to_ptr.hbm [resolvable:$true] %s5265_s7 }
  0xd8   : > { %s5267_s17 = scalar_lea.hbm %s5266_s7, 64  ;;  %p5272_p12 = scmp.lt.s32.totalorder %s5266_s7, %s6793_s12 }
  0xd9   : > { %p5268_p6 = scmp.ne.s32.totalorder %s5266_s7, %s5267_s17  ;;  %p5273_p13 = scmp.lt.s32.totalorder %s5271_s19, %s5267_s17 }
  0xdb   : > { %p5269_p7 = pnand %p5268_p6, %p5801_p4  ;;  %p5274_p0 = por %p5273_p13, %p5272_p12 }
  0xdd   : > { %p5270_p11 = pneg %p5269_p7 }
  0xdf   : > { %p5275_p1 = pnand %p5274_p0, %p5270_p11 }
  0xe1   : > { %5278 = shalt.err (!%p5275_p1)
}
  0xe2   : > { %s6739_s1 = smov 64   ;;  %s6741_s5 = smov 4  }
  0xe3   : > { %4715 = dma.hbm_to_vmem [thread:$0]  (%p5801_p4), %s953_s28, 1024, %s955_s9, %s5857_s10, %s6739_s1, %s6739_s1, %s6741_s5  }
  0xe4   : > { %s6794_s13 = sld [smem:[#allocation53_spill]]  ;;  %s967_s7 = scalar_lea.vmem [#allocation19], %s5850_s21 }
  0xe5   : > { %s974_s17 = sshll.u32 %s967_s7, 4  ;;  %s975_s17 = int_to_ptr.vmem [resolvable:$true] %s974_s17 }
  0xea   : > { %s970_s11 = scalar_lea.hbm %s6794_s13, %s5599_s30  ;;  %s5299_s9 = scalar_lea.hbm %s6794_s13, 2 }
  0xeb   : > { %s972_s24 = sshll.u32 %s970_s11, 4  ;;  %s973_s24 = int_to_ptr.hbm [resolvable:$true] %s972_s24 }
  0xec   : > { %s5293_s27 = sshra.s32 %s973_s24, 4  ;;  %s5294_s27 = int_to_ptr.hbm [resolvable:$true] %s5293_s27 }
  0xed   : > { %s5295_s19 = scalar_lea.hbm %s5294_s27, 1  ;;  %p5300_p7 = scmp.lt.s32.totalorder %s5294_s27, %s6794_s13 }
  0xee   : > { %p5296_p2 = scmp.ne.s32.totalorder %s5294_s27, %s5295_s19  ;;  %p5301_p11 = scmp.lt.s32.totalorder %s5299_s9, %s5295_s19 }
  0xf0   : > { %p5297_p3 = pnand %p5296_p2, %p5801_p4  ;;  %p5302_p12 = por %p5301_p11, %p5300_p7 }
  0xf2   : > { %p5298_p6 = pneg %p5297_p3 }
  0xf4   : > { %p5303_p13 = pnand %p5302_p12, %p5298_p6 }
  0xf6   : > { %5306 = shalt.err (!%p5303_p13)
}
  0xf7   : > { %4716 = dma.hbm_to_vmem [thread:$0]  (%p5801_p4), %s973_s24, 16, %s975_s17, %s5857_s10  }
  0xf8   : > { %s6795_s14 = sld [smem:[#allocation54_spill]]  ;;  %s985_s11 = scalar_lea.vmem [#allocation20], %s5956_s26 }
  0xf9   : > { %s993_s7 = sshll.u32 %s985_s11, 4  ;;  %s994_s7 = int_to_ptr.vmem [resolvable:$true] %s993_s7 }
  0xfe   : > { %s990_s12 = scalar_lea.hbm %s6795_s14, %s5970_s3  ;;  %s5327_s17 = scalar_lea.hbm %s6795_s14, 128 }
  0xff   : > { %s991_s0 = sshll.u32 %s990_s12, 4  ;;  %s992_s0 = int_to_ptr.hbm [resolvable:$true] %s991_s0 }
 0x100   : > { %s5321_s1 = sshra.s32 %s992_s0, 4  ;;  %s5322_s1 = int_to_ptr.hbm [resolvable:$true] %s5321_s1 }
 0x101   : > { %s5323_s27 = scalar_lea.hbm %s5322_s1, 64  ;;  %p5328_p3 = scmp.lt.s32.totalorder %s5322_s1, %s6795_s14 }
 0x102   : > { %p5324_p0 = scmp.ne.s32.totalorder %s5322_s1, %s5323_s27  ;;  %p5329_p6 = scmp.lt.s32.totalorder %s5327_s17, %s5323_s27 }
 0x104   : > { %p5325_p1 = pnand %p5324_p0, %p5801_p4  ;;  %p5330_p7 = por %p5329_p6, %p5328_p3 }
 0x106   : > { %p5326_p2 = pneg %p5325_p1 }
 0x108   : > { %p5331_p11 = pnand %p5330_p7, %p5326_p2 }
 0x10a   : > { %5334 = shalt.err (!%p5331_p11)
}
 0x10b   : > { %s6796_s2 = smov 64   ;;  %s6797_s15 = sld [smem:[#allocation55_spill]] }
 0x10c   : > { %4717 = dma.hbm_to_vmem [thread:$0]  (%p5801_p4), %s992_s0, 1024, %s994_s7, %s5857_s10, %s6796_s2, %s6796_s2, %s6741_s5  }
 0x10d   : > { %s1006_s1 = scalar_lea.vmem [#allocation21], %s5850_s21  ;;  %s6032_s9 = sshll.u32 %s5850_s21, 7 }
 0x10e   : > { %s1013_s27 = sshll.u32 %s1006_s1, 4  ;;  %s1014_s27 = int_to_ptr.vmem [resolvable:$true] %s1013_s27 }
 0x111   : > { %s1009_s11 = scalar_lea.hbm %s6797_s15, %s5599_s30  ;;  %s5355_s0 = scalar_lea.hbm %s6797_s15, 2 }
 0x112   : > { %s1011_s19 = sshll.u32 %s1009_s11, 4  ;;  %s1012_s19 = int_to_ptr.hbm [resolvable:$true] %s1011_s19 }
 0x113   : > { %s5349_s17 = sshra.s32 %s1012_s19, 4  ;;  %s5350_s17 = int_to_ptr.hbm [resolvable:$true] %s5349_s17 }
 0x114   : > { %s5351_s24 = scalar_lea.hbm %s5350_s17, 1  ;;  %p5356_p1 = scmp.lt.s32.totalorder %s5350_s17, %s6797_s15 }
 0x115   : > { %p5352_p12 = scmp.ne.s32.totalorder %s5350_s17, %s5351_s24  ;;  %p5357_p2 = scmp.lt.s32.totalorder %s5355_s0, %s5351_s24 }
 0x117   : > { %p5353_p13 = pnand %p5352_p12, %p5801_p4  ;;  %p5358_p3 = por %p5357_p2, %p5356_p1 }
 0x119   : > { %p5354_p0 = pneg %p5353_p13 }
 0x11b   : > { %p5359_p6 = pnand %p5358_p3, %p5354_p0 }
 0x11d   : > { %5362 = shalt.err (!%p5359_p6)
}
 0x11e   : > { %4718 = dma.hbm_to_vmem [thread:$0]  (%p5801_p4), %s1012_s19, 16, %s1014_s27, %s5857_s10  }
 0x11f   : > { %s6046_s21 = sshll.u32 %s5599_s30, 7  ;;  %s6798_s16 = sld [smem:[#allocation56_spill]] }
 0x120   : > { %s1024_s7 = scalar_lea.vmem [#allocation22], %s6032_s9 }
 0x121   : > { %s1032_s17 = sshll.u32 %s1024_s7, 4  ;;  %s1033_s17 = int_to_ptr.vmem [resolvable:$true] %s1032_s17 }
 0x125   : > { %s1029_s28 = scalar_lea.hbm %s6798_s16, %s6046_s21  ;;  %s5383_s19 = scalar_lea.hbm %s6798_s16, 256 }
 0x126   : > { %s1030_s24 = sshll.u32 %s1029_s28, 4  ;;  %s1031_s24 = int_to_ptr.hbm [resolvable:$true] %s1030_s24 }
 0x127   : > { %s5377_s0 = sshra.s32 %s1031_s24, 4  ;;  %s5378_s0 = int_to_ptr.hbm [resolvable:$true] %s5377_s0 }
 0x128   : > { %s5379_s4 = scalar_lea.hbm %s5378_s0, 128  ;;  %p5384_p13 = scmp.lt.s32.totalorder %s5378_s0, %s6798_s16 }
 0x129   : > { %p5380_p7 = scmp.ne.s32.totalorder %s5378_s0, %s5379_s4  ;;  %p5385_p0 = scmp.lt.s32.totalorder %s5383_s19, %s5379_s4 }
 0x12b   : > { %p5381_p11 = pnand %p5380_p7, %p5801_p4  ;;  %p5386_p1 = por %p5385_p0, %p5384_p13 }
 0x12d   : > { %p5382_p12 = pneg %p5381_p11 }
 0x12f   : > { %p5387_p2 = pnand %p5386_p1, %p5382_p12 }
 0x131   : > { %5390 = shalt.err (!%p5387_p2)
}
 0x132   : > { %s6743_s11 = smov 128   ;;  %s5616_s1 = smov 8  }
 0x133   : > { %4719 = dma.hbm_to_vmem [thread:$0]  (%p5801_p4), %s1031_s24, 2048, %s1033_s17, %s5857_s10, %s6743_s11, %s6743_s11, %s5616_s1  }
 0x134   : > { %s6799_s18 = sld [smem:[#allocation58_spill]]  ;;  %s1053_s0 = scalar_lea.vmem [#allocation23], %s5956_s26 }
 0x135   : > { %s1061_s4 = sshll.u32 %s1053_s0, 4  ;;  %s1062_s4 = int_to_ptr.vmem [resolvable:$true] %s1061_s4 }
 0x13a   : > { %s1058_s5 = scalar_lea.hbm %s6799_s18, %s5970_s3  ;;  %s5411_s17 = scalar_lea.hbm %s6799_s18, 128 }
 0x13b   : > { %s1059_s27 = sshll.u32 %s1058_s5, 4  ;;  %s1060_s27 = int_to_ptr.hbm [resolvable:$true] %s1059_s27 }
 0x13c   : > { %s5405_s30 = sshra.s32 %s1060_s27, 4  ;;  %s5406_s30 = int_to_ptr.hbm [resolvable:$true] %s5405_s30 }
 0x13d   : > { %s5407_s19 = scalar_lea.hbm %s5406_s30, 64  ;;  %p5412_p11 = scmp.lt.s32.totalorder %s5406_s30, %s6799_s18 }
 0x13e   : > { %p5408_p3 = scmp.ne.s32.totalorder %s5406_s30, %s5407_s19  ;;  %p5413_p12 = scmp.lt.s32.totalorder %s5411_s17, %s5407_s19 }
 0x140   : > { %p5409_p6 = pnand %p5408_p3, %p5801_p4  ;;  %p5414_p13 = por %p5413_p12, %p5412_p11 }
 0x142   : > { %p5410_p7 = pneg %p5409_p6 }
 0x144   : > { %p5415_p0 = pnand %p5414_p13, %p5410_p7 }
 0x146   : > { %5418 = shalt.err (!%p5415_p0)
}
 0x147   : > { %s6800_s26 = smov 4   ;;  %s6801_s20 = sld [smem:[#allocation60_spill]] }
 0x148   : > { %4720 = dma.hbm_to_vmem [thread:$0]  (%p5801_p4), %s1060_s27, 1024, %s1062_s4, %s5857_s10, %s6796_s2, %s6796_s2, %s6800_s26  }
 0x149   : > { %s1081_s11 = scalar_lea.vmem [#allocation24], %s6032_s9 }
 0x14a   : > { %s1089_s7 = sshll.u32 %s1081_s11, 4  ;;  %s1090_s7 = int_to_ptr.vmem [resolvable:$true] %s1089_s7 }
 0x14d   : > { %s1086_s28 = scalar_lea.hbm %s6801_s20, %s6046_s21  ;;  %s5439_s4 = scalar_lea.hbm %s6801_s20, 256 }
 0x14e   : > { %s1087_s5 = sshll.u32 %s1086_s28, 4  ;;  %s1088_s5 = int_to_ptr.hbm [resolvable:$true] %s1087_s5 }
 0x14f   : > { %s5433_s0 = sshra.s32 %s1088_s5, 4  ;;  %s5434_s0 = int_to_ptr.hbm [resolvable:$true] %s5433_s0 }
 0x150   : > { %s5435_s30 = scalar_lea.hbm %s5434_s0, 128  ;;  %p5440_p6 = scmp.lt.s32.totalorder %s5434_s0, %s6801_s20 }
 0x151   : > { %p5436_p1 = scmp.ne.s32.totalorder %s5434_s0, %s5435_s30  ;;  %p5441_p7 = scmp.lt.s32.totalorder %s5439_s4, %s5435_s30 }
 0x153   : > { %p5437_p2 = pnand %p5436_p1, %p5801_p4  ;;  %p5442_p11 = por %p5441_p7, %p5440_p6 }
 0x155   : > { %p5438_p3 = pneg %p5437_p2 }
 0x157   : > { %p5443_p12 = pnand %p5442_p11, %p5438_p3 }
 0x159   : > { %5446 = shalt.err (!%p5443_p12)
}
 0x15a   : > { %s6802_s24 = smov 128   ;;  %s6803_s22 = sld [smem:[#allocation62_spill]] }
 0x15b   : > { %4721 = dma.hbm_to_vmem [thread:$0]  (%p5801_p4), %s1088_s5, 2048, %s1090_s7, %s5857_s10, %s6802_s24, %s6802_s24, %s5616_s1  }
 0x15c   : > { %s1110_s11 = scalar_lea.vmem [#allocation25], %s6032_s9 }
 0x15d   : > { %s1118_s0 = sshll.u32 %s1110_s11, 4  ;;  %s1119_s0 = int_to_ptr.vmem [resolvable:$true] %s1118_s0 }
 0x160   : > { %s1115_s28 = scalar_lea.hbm %s6803_s22, %s6046_s21  ;;  %s5467_s1 = scalar_lea.hbm %s6803_s22, 256 }
 0x161   : > { %s1116_s30 = sshll.u32 %s1115_s28, 4  ;;  %s1117_s30 = int_to_ptr.hbm [resolvable:$true] %s1116_s30 }
 0x162   : > { %s5461_s19 = sshra.s32 %s1117_s30, 4  ;;  %s5462_s19 = int_to_ptr.hbm [resolvable:$true] %s5461_s19 }
 0x163   : > { %s5463_s12 = scalar_lea.hbm %s5462_s19, 128  ;;  %p5468_p2 = scmp.lt.s32.totalorder %s5462_s19, %s6803_s22 }
 0x164   : > { %p5464_p13 = scmp.ne.s32.totalorder %s5462_s19, %s5463_s12  ;;  %p5469_p3 = scmp.lt.s32.totalorder %s5467_s1, %s5463_s12 }
 0x166   : > { %p5465_p0 = pnand %p5464_p13, %p5801_p4  ;;  %p5470_p6 = por %p5469_p3, %p5468_p2 }
 0x168   : > { %p5466_p1 = pneg %p5465_p0 }
 0x16a   : > { %p5471_p7 = pnand %p5470_p6, %p5466_p1 }
 0x16c   : > { %5474 = shalt.err (!%p5471_p7)
}
 0x16d   : > { %4722 = dma.hbm_to_vmem [thread:$0]  (%p5801_p4), %s1117_s30, 2048, %s1119_s0, %s5857_s10, %s6796_s2, %s6796_s2, %s6800_s26  }
 0x16e PF: > { %1136 = sbr.rel (%p5815_p10) target bundleno = 3945 (0xf69), region = 124  ;;  %s6804_s9 = sld [smem:[#allocation36_spill]] (!%p5815_p10) }
 0x173   : > { %5562 = dma.done.wait (%p148_p5), [#allocation4], 256  }
 0x174   : > { %5564 = vsyncadd (%p148_p5), [#allocation4], 4294967040 }
 0x175   : > { %5566 = dma.done.wait (%p148_p5), [#allocation7], 256  }
 0x176   : > { %5568 = vsyncadd (%p148_p5), [#allocation7], 4294967040 }
 0x177   : > { %5570 = dma.done.wait (%p148_p5), [#allocation10], 128  }
 0x178   : > { %5572 = vsyncadd (%p148_p5), [#allocation10], 4294967168  ;;  %s6805_s29 = sld [smem:[#allocation35_spill]]  ;;  %s1158_s10 = sand.u32 1, %s6804_s9  }
 0x179   : > { %s1159_s21 = scalar_lea.sflag [#allocation4], %s1158_s10 }
 0x17e   : > { %s6140_s2 = sand.u32 1, %s6805_s29  }
 0x17f   : > { %5574 = dma.done.wait (%p5810_p8), %s1159_s21, 12416  }
 0x180   : > { %5576 = vsyncadd (%p5810_p8), %s1159_s21, 4294954880  ;;  %s4698_s17 = smul.u32 192, %s6140_s2  ;;  %s4152_s24 = sshll.u32 %s6140_s2, 6 }
 0x181   : > { %s4154_s13 = sshll.u32 %s6140_s2, 7  ;;  %p1441_p4 = scmp.lt.s32.totalorder %s6804_s9, 1 }
 0x182   : > { %s6807_s19 = sld [smem:[#allocation57_spill]]  ;;  %s1170_s30 = scalar_lea.vmem [#allocation12], %s6140_s2 }
 0x183   : > { %s6152_s3 = scalar_select %p1441_p4, %s6804_s9, 1 }
 0x184   : > { %s6808_s1 = sld [smem:[#allocation59_spill]]  ;;  %s1188_s22 = scalar_lea.vmem [#allocation14], %s6140_s2 }
 0x185   : > { %s4699_s28 = smul.u32 3, %s6152_s3  ;;  %s4158_s11 = sshll.u32 %s6152_s3, 1 }
 0x186   : > { %s6809_s6 = sld [smem:[#allocation51_spill]]  ;;  %s1197_s23 = scalar_lea.vmem [#allocation15], %s6140_s2 }
 0x187   : > { %s6810_s14 = sld [smem:[#allocation61_spill]]  ;;  %s1206_s4 = scalar_lea.vmem [#allocation16], %s6140_s2 }
 0x188   : > { %s6159_s12 = scalar_lea.vmem %s6807_s19, %s4158_s11  ;;  %s6811_s20 = sld [smem:[#allocation63_spill]] }
 0x189   : > { %s1179_s19 = scalar_lea.vmem [#allocation13], %s6140_s2  ;;  %s6184_s27 = scalar_lea.vmem [#allocation17], %s4698_s17 }
 0x18a   : > { %s1451_s7 = scalar_lea.vmem %s6808_s1, %s6152_s3  ;;  %s6186_s1 = scalar_lea.vmem [#allocation18], %s4152_s24 }
 0x18b   : > { %s6189_s5 = scalar_lea.vmem [#allocation20], %s4152_s24  ;;  %s1254_s29 = scalar_lea.vmem [#allocation21], %s6140_s2 }
 0x18c   : > { %s6168_s10 = scalar_lea.vmem %s6809_s6, %s4699_s28  ;;  %s1235_s28 = scalar_lea.vmem [#allocation19], %s6140_s2 }
 0x18d   : > { %s6173_s15 = scalar_lea.vmem %s6810_s14, %s4158_s11  ;;  %s6192_s26 = scalar_lea.vmem [#allocation22], %s4154_s13 }
 0x18e   : > { %s1458_s0 = scalar_lea.vmem %s6811_s20, %s6152_s3  ;;  %s6194_s14 = scalar_lea.vmem [#allocation23], %s4152_s24 }
 0x18f   : > { %s6196_s11 = scalar_lea.vmem [#allocation24], %s4154_s13  ;;  %s6198_s16 = scalar_lea.vmem [#allocation25], %s4154_s13 }
 0x190   : > { %1463 = sbr.rel (%p4123_p9) target bundleno = 412 (0x19c), region = 204 }
 0x195   : > { %v1464_v0 = vld [vmem:[#allocation3] sm:$0xff]  ;;  %v1465_v1 = vld [vmem:[#allocation3 + $0x8] sm:$0xff]  ;;  %v1468_v2 = vlaneseq  ;;  %vm1474_vm0 = vcmask 64512   ;;  %v5617_v5 = vmov -1e+30  }
 0x196   : > { %1466 = vst [vmem:[#allocation26] sm:$0xff] %v1464_v0 }
 0x197   : > { %1467 = vst [vmem:[#allocation26 + $0x8] sm:$0xff] %v1465_v1  ;;  %v1469_v3 = vshrl.u32 %v1468_v2, 7  ;;  %v1471_v4 = vand.u32 127, %v1468_v2 }
 0x199   : > { %vm1472_vm1 = vcmp.ge.s32.totalorder %v1469_v3, %v1471_v4 }
 0x19a   : > { %v1473_v6 = vsel %vm1472_vm1, 0.0, %v5617_v5 }
 0x19b   : > { %1475 = vst.msk [vmem:[#allocation2] sm:$0xff] %vm1474_vm0, %v1473_v6 }
 0x19c PF: > { %v5618_v9 = vmov 128.0   ;;  %v4247_v24 = vld [vmem:[%s6184_s27 + $0xa8] sm:$0xf]  ;;  %v4617_v25 = vld [vmem:[%s6184_s27 + $0xb0] sm:$0xf0]  ;;  %s6812_s18 = scalar_lea.vmem [#allocation11], %s6140_s2 }
 0x19d   : > { %v1476_v7 = vld [vmem:[#allocation26] sm:$0xff]  ;;  %4863 = vrcp.f32 %v5618_v9  ;;  %v4616_v26 = vld [vmem:[%s6184_s27 + $0xac] sm:$0xf]  ;;  %v4248_v27 = vor.u32 %v4617_v25, %v4247_v24  ;;  %v4249_v28 = vld [vmem:[%s6184_s27 + $0xb4] sm:$0xf0]  ;;  %vm1807_vm9 = vcmask 261120  }
 0x19e   : > { %1499 = vadd.xlane.f32.xlu0 %v1476_v7  ;;  %v1477_v8 = vld [vmem:[#allocation26 + $0x8] sm:$0xff]  ;;  %v4618_v30 = vld [vmem:[%s6184_s27 + $0xb8] sm:$0xf0]  ;;  %v4252_v31 = vor.u32 %v4616_v26, %v4249_v28  ;;  %v4613_v35 = vld [vmem:[%s6184_s27 + $0x94] sm:$0xf]  ;;  %s5619_s20 = smov 64  }
 0x19f   : > { %v4255_v29 = vld [vmem:[%s6184_s27 + $0xb0] sm:$0xf]  ;;  %1725 = vmatpush.bf16.msra.mxu0 %v4248_v27  ;;  %v4614_v34 = vld [vmem:[%s6184_s27 + $0x98] sm:$0xf0]  ;;  %v4237_v37 = vld [vmem:[%s6184_s27 + $0x9c] sm:$0xf0] }
 0x1a0   : > { %v4256_v32 = vor.u32 %v4618_v30, %v4255_v29  ;;  %1739 = vmatpush.bf16.msra.mxu1 %v4252_v31  ;;  %v4235_v33 = vld [vmem:[%s6184_s27 + $0x90] sm:$0xf]  ;;  %v4243_v38 = vld [vmem:[%s6184_s27 + $0x98] sm:$0xf]  ;;  %v4615_v39 = vld [vmem:[%s6184_s27 + $0xa0] sm:$0xf0]  ;;  %v4240_v40 = vor.u32 %v4613_v35, %v4237_v37 }
 0x1a1   : > { %v4236_v36 = vor.u32 %v4614_v34, %v4235_v33  ;;  %v4244_v41 = vor.u32 %v4615_v39, %v4243_v38  ;;  %v4223_v42 = vld [vmem:[%s6184_s27 + $0x78] sm:$0xf]  ;;  %v4611_v43 = vld [vmem:[%s6184_s27 + $0x80] sm:$0xf0]  ;;  %v4610_v44 = vld [vmem:[%s6184_s27 + $0x7c] sm:$0xf] }
 0x1a2   : > { %1753 = vmatpush.bf16.msra.mxu2 %v4256_v32  ;;  %v4224_v45 = vor.u32 %v4611_v43, %v4223_v42  ;;  %v4225_v46 = vld [vmem:[%s6184_s27 + $0x84] sm:$0xf0]  ;;  %v4231_v47 = vld [vmem:[%s6184_s27 + $0x80] sm:$0xf]  ;;  %v4612_v48 = vld [vmem:[%s6184_s27 + $0x88] sm:$0xf0] }
 0x1a3   : > { %v4864_v10 = vpop.eup %4863  ;;  %1726 = vmatpush.bf16.msra.mxu0 %v4236_v36  ;;  %v4228_v49 = vor.u32 %v4610_v44, %v4225_v46  ;;  %v4232_v50 = vor.u32 %v4612_v48, %v4231_v47  ;;  %v4211_v51 = vld [vmem:[%s6184_s27 + $0x60] sm:$0xf]  ;;  %v4608_v52 = vld [vmem:[%s6184_s27 + $0x68] sm:$0xf0]  ;;  %v4607_v53 = vld [vmem:[%s6184_s27 + $0x64] sm:$0xf] }
 0x1a4   : > { %v1504_v11 = vmul.f32 128.0, %v4864_v10  ;;  %vm1508_vm2 = vweird.f32 %v4864_v10  ;;  %1740 = vmatpush.bf16.msra.mxu1 %v4240_v40  ;;  %v4212_v54 = vor.u32 %v4608_v52, %v4211_v51  ;;  %v4213_v55 = vld [vmem:[%s6184_s27 + $0x6c] sm:$0xf0]  ;;  %v4219_v56 = vld [vmem:[%s6184_s27 + $0x68] sm:$0xf]  ;;  %vm2092_vm10 = vcmask 1043456  }
 0x1a5   : > { %v4609_v57 = vld [vmem:[%s6184_s27 + $0x70] sm:$0xf0]  ;;  %v4216_v58 = vor.u32 %v4607_v53, %v4213_v55  ;;  %v4199_v60 = vld [vmem:[%s6184_s27 + $0x48] sm:$0xf]  ;;  %v4604_v62 = vld [vmem:[%s6184_s27 + $0x4c] sm:$0xf] }
 0x1a6   : > { %1501 = vadd.xlane.f32.xlu0 %v1477_v8  ;;  %v1505_v12 = vsub.f32 1.0, %v1504_v11  ;;  %1754 = vmatpush.bf16.msra.mxu2 %v4244_v41  ;;  %v4220_v59 = vor.u32 %v4609_v57, %v4219_v56  ;;  %v4605_v61 = vld [vmem:[%s6184_s27 + $0x50] sm:$0xf0]  ;;  %v4201_v0 = vld [vmem:[%s6184_s27 + $0x54] sm:$0xf0]  ;;  %s5620_s9 = smov 96  }
 0x1a7   : > { %1727 = vmatpush.bf16.msra.mxu0 %v4224_v45  ;;  %v4200_v63 = vor.u32 %v4605_v61, %v4199_v60  ;;  %v4207_v1 = vld [vmem:[%s6184_s27 + $0x50] sm:$0xf]  ;;  %v4606_v2 = vld [vmem:[%s6184_s27 + $0x58] sm:$0xf0]  ;;  %v4204_v3 = vor.u32 %v4604_v62, %v4201_v0  ;;  %v4189_v9 = vld [vmem:[%s6184_s27 + $0x3c] sm:$0xf0] }
 0x1a8   : > { %v1506_v13 = vmul.f32 %v4864_v10, %v1505_v12  ;;  %1741 = vmatpush.bf16.msra.mxu1 %v4228_v49  ;;  %v4208_v4 = vor.u32 %v4606_v2, %v4207_v1  ;;  %v4187_v5 = vld [vmem:[%s6184_s27 + $0x30] sm:$0xf]  ;;  %v4602_v6 = vld [vmem:[%s6184_s27 + $0x38] sm:$0xf0]  ;;  %v4603_v11 = vld [vmem:[%s6184_s27 + $0x40] sm:$0xf0] }
 0x1a9   : > { %v4163_v26 = vld [vmem:[%s6184_s27] sm:$0xf]  ;;  %v4596_v27 = vld [vmem:[%s6184_s27 + $0x8] sm:$0xf0]  ;;  %v4595_v28 = vld [vmem:[%s6184_s27 + $0x4] sm:$0xf] }
 0x1aa   : > { %v1507_v14 = vadd.f32 %v4864_v10, %v1506_v13  ;;  %1755 = vmatpush.bf16.msra.mxu2 %v4232_v50  ;;  %v4164_v30 = vor.u32 %v4596_v27, %v4163_v26  ;;  %v4165_v31 = vld [vmem:[%s6184_s27 + $0xc] sm:$0xf0]  ;;  %v4171_v32 = vld [vmem:[%s6184_s27 + $0x8] sm:$0xf]  ;;  %v4597_v33 = vld [vmem:[%s6184_s27 + $0x10] sm:$0xf0] }
 0x1ab   : > { %1728 = vmatpush.bf16.msra.mxu0 %v4212_v54  ;;  %v4168_v35 = vor.u32 %v4595_v28, %v4165_v31  ;;  %v4172_v36 = vor.u32 %v4597_v33, %v4171_v32  ;;  %v4837_v54 = vld [vmem:[%s6812_s18] ss:$0 sm:$0xff]  ;;  %s5621_s17 = smov 32   ;;  %vm1960_vm11 = vcmask 64512   ;;  %vm2286_vm12 = vcmask 523264  }
 0x1ac   : > { %v6202_v15 = vsel %vm1508_vm2, %v4864_v10, %v1507_v14  ;;  %1742 = vmatpush.bf16.msra.mxu1 %v4216_v58  ;;  %v4195_v10 = vld [vmem:[%s6184_s27 + $0x38] sm:$0xf]  ;;  %vm2291_vm13 = vcmask 785408  }
 0x1ad   : > { %v4196_v13 = vor.u32 %v4603_v11, %v4195_v10  ;;  %v4175_v14 = vld [vmem:[%s6184_s27 + $0x18] sm:$0xf] }
 0x1ae   : > { %1756 = vmatpush.bf16.msra.mxu2 %v4220_v59  ;;  %v4838_v59 = vld [vmem:[%s1170_s30] ss:$0 sm:$0xff] }
 0x1af   : > { %1729 = vmatpush.bf16.msra.mxu0 %v4200_v63 }
 0x1b0   : > { %1743 = vmatpush.bf16.msra.mxu1 %v4204_v3 }
 0x1b2   : > { %1757 = vmatpush.bf16.msra.mxu2 %v4208_v4 }
 0x1b6   : > { %1758 = vmatpush.bf16.msra.mxu2 %v4196_v13 }
 0x211   : > { %v1500_v16 = vpop.xlane.xlu0 %1499 }
 0x212   : > { %v1510_v17 = vmul.f32 %v6202_v15, %v1500_v16  ;;  %v4599_v16 = vld [vmem:[%s6184_s27 + $0x20] sm:$0xf0] }
 0x214   : > { %v6205_v18 = vsub.f32 %v1476_v7, %v1510_v17  ;;  %v4601_v7 = vld [vmem:[%s6184_s27 + $0x34] sm:$0xf]  ;;  %v4598_v17 = vld [vmem:[%s6184_s27 + $0x1c] sm:$0xf] }
 0x215   : > { %v4192_v12 = vor.u32 %v4601_v7, %v4189_v9 }
 0x216   : > { %v1514_v19 = vmul.f32 %v6205_v18, %v6205_v18 }
 0x217   : > { %1744 = vmatpush.bf16.msra.mxu1 %v4192_v12 }
 0x218   : > { %1516 = vadd.xlane.f32.xlu1 %v1514_v19  ;;  %v4176_v19 = vor.u32 %v4599_v16, %v4175_v14 }
 0x219   : > { %v1502_v20 = vpop.xlane.xlu0 %1501 }
 0x21a   : > { %v1511_v21 = vmul.f32 %v6202_v15, %v1502_v20  ;;  %v4177_v20 = vld [vmem:[%s6184_s27 + $0x24] sm:$0xf0] }
 0x21b   : > { %v4180_v24 = vor.u32 %v4598_v17, %v4177_v20 }
 0x21c   : > { %v6210_v22 = vsub.f32 %v1477_v8, %v1511_v21  ;;  %v4188_v8 = vor.u32 %v4602_v6, %v4187_v5  ;;  %v4183_v21 = vld [vmem:[%s6184_s27 + $0x20] sm:$0xf] }
 0x21d   : > { %1745 = vmatpush.bf16.msra.mxu1 %v4180_v24 }
 0x21e   : > { %v1515_v23 = vmul.f32 %v6210_v22, %v6210_v22  ;;  %1730 = vmatpush.bf16.msra.mxu0 %v4188_v8 }
 0x220   : > { %1518 = vadd.xlane.f32.xlu1 %v1515_v23  ;;  %v4600_v23 = vld [vmem:[%s6184_s27 + $0x28] sm:$0xf0] }
 0x221   : > { %v4184_v25 = vor.u32 %v4600_v23, %v4183_v21  ;;  %1746 = vmatpush.bf16.msra.mxu1 %v4168_v35 }
 0x222   : > { %1731 = vmatpush.bf16.msra.mxu0 %v4176_v19 }
 0x223   : > { %1759 = vmatpush.bf16.msra.mxu2 %v4184_v25 }
 0x226   : > { %1732 = vmatpush.bf16.msra.mxu0 %v4164_v30 }
 0x227   : > { %1760 = vmatpush.bf16.msra.mxu2 %v4172_v36 }
 0x28b   : > { %v1517_v29 = vpop.xlane.xlu1 %1516 }
 0x28c   : > { %v1520_v34 = vmul.f32 %v1517_v29, %v6202_v15 }
 0x28e   : > { %v1522_v37 = vadd.f32 1e-06, %v1520_v34 }
 0x290   : > { %4865 = vrsqrt.f32 %v1522_v37  ;;  %vm1530_vm4 = vweird.f32 %v1522_v37 }
 0x293   : > { %v1519_v38 = vpop.xlane.xlu1 %1518 }
 0x294   : > { %v1521_v39 = vmul.f32 %v1519_v38, %v6202_v15 }
 0x296   : > { %v4866_v40 = vpop.eup %4865  ;;  %v1523_v41 = vadd.f32 1e-06, %v1521_v39 }
 0x297   : > { %v1525_v42 = vmul.f32 %v4866_v40, %v1522_v37  ;;  %vm1531_vm3 = vweird.f32 %v4866_v40 }
 0x298   : > { %4867 = vrsqrt.f32 %v1523_v41  ;;  %vm1532_vm5 = vmor %vm1530_vm4, %vm1531_vm3  ;;  %vm1540_vm7 = vweird.f32 %v1523_v41 }
 0x299   : > { %v1526_v43 = vmul.f32 %v4866_v40, %v1525_v42 }
 0x29b   : > { %v1527_v44 = vmul.f32 0.5, %v1526_v43 }
 0x29d   : > { %v1528_v45 = vsub.f32 1.5, %v1527_v44 }
 0x29e   : > { %v4868_v46 = vpop.eup %4867 }
 0x29f   : > { %v1529_v47 = vmul.f32 %v4866_v40, %v1528_v45  ;;  %v1535_v48 = vmul.f32 %v4868_v46, %v1523_v41  ;;  %vm1541_vm6 = vweird.f32 %v4868_v46  ;;  %v1496_v45 = vld [vmem:[#allocation2] sm:$0xff] }
 0x2a0   : > { %vm1542_vm8 = vmor %vm1540_vm7, %vm1541_vm6 }
 0x2a1   : > { %v1536_v49 = vmul.f32 %v4868_v46, %v1535_v48  ;;  %v1533_v50 = vsel %vm1532_vm5, %v4866_v40, %v1529_v47 }
 0x2a2   : > { %v1544_v53 = vmul.f32 %v1533_v50, %v6205_v18  ;;  %v1588_v18 = vld [vmem:[%s6168_s10] sm:$0x7] }
 0x2a3   : > { %v1537_v51 = vmul.f32 0.5, %v1536_v49  ;;  %v1591_v0 = vperm.slane %v1588_v18, 0  ;;  %v1592_v1 = vperm.slane %v1588_v18, 1  ;;  %v1593_v7 = vperm.slane %v1588_v18, 2 }
 0x2a4   : > { %v1549_v58 = vmul.f32 %v4837_v54, %v1544_v53 }
 0x2a5   : > { %v1538_v52 = vsub.f32 1.5, %v1537_v51 }
 0x2a6   : > { %v1554_v61 = vadd.f32 %v4838_v59, %v1549_v58 }
 0x2a7   : > { %v1539_v55 = vmul.f32 %v4868_v46, %v1538_v52 }
 0x2a9   : > { %v1543_v56 = vsel %vm1542_vm8, %v4868_v46, %v1539_v55 }
 0x2aa   : > { %v1545_v57 = vmul.f32 %v1543_v56, %v6210_v22 }
 0x2ac   : > { %v1550_v60 = vmul.f32 %v4837_v54, %v1545_v57 }
 0x2ae   : > { %v1555_v62 = vadd.f32 %v4838_v59, %v1550_v60 }
 0x2b0   : > { %v1589_v63 = vpack.c.bf16 %v1555_v62, %v1554_v61 }
 0x2b2   : > { %1733 = vmatmul.bf16.vlgmr.msra.gmra.mxu0 %v1589_v63  ;;  %1747 = vmatmul.bf16.vlgmr.msra.gmra.mxu1 %v1589_v63 }
 0x2b3   : > { %1761 = vmatmul.bf16.vlgmr.msra.gmra.mxu2 %v1589_v63 }
 0x32f   : > { %v1734_v2 = vpop.f32.mrf.mxu0  ;;  %v1748_v3 = vpop.f32.mrf.mxu1 }
 0x330   : > { %v1735_v4 = vadd.f32 %v1734_v2, %v1591_v0  ;;  %v1749_v5 = vadd.f32 %v1748_v3, %v1592_v1 }
 0x332   : > { %v1767_v6 = vpack.c.bf16 %v1749_v5, %v1735_v4 }
 0x334   : > { %1777 = vrot.lane.b32.xlu2 %v1767_v6, %s5619_s20  ;;  %v1785_v22 = vrot.slane %v1767_v6, 4 }
 0x336   : > { %v1762_v8 = vpop.f32.mrf.mxu2  ;;  %v1812_v9 = vsel %vm1807_vm9, %v1785_v22, 0 }
 0x337   : > { %v1763_v10 = vadd.f32 %v1762_v8, %v1593_v7  ;;  %v1736_v11 = vpop.f32.mrf.mxu0  ;;  %v1750_v12 = vpop.f32.mrf.mxu1  ;;  %1821 = vmatpush.bf16.xpose.msra.mxu3 %v1812_v9 }
 0x338   : > { %v1737_v13 = vadd.f32 %v1736_v11, %v1591_v0  ;;  %v1751_v14 = vadd.f32 %v1750_v12, %v1592_v1 }
 0x339   : > { %v6273_v16 = vpack.c.bf16 %v1763_v10, %v1763_v10 }
 0x33a   : > { %v1769_v17 = vpack.c.bf16 %v1751_v14, %v1737_v13 }
 0x33b   : > { %v2094_v19 = vsel %vm2092_vm10, %v6273_v16, 0 }
 0x33c   : > { %2103 = vmatpush.bf16.msrb.mxu1 %v2094_v19  ;;  %1779 = vrot.lane.b32.xlu1 %v1769_v17, %s5619_s20  ;;  %v1786_v20 = vrot.slane %v1769_v17, 4 }
 0x33d   : > { %1775 = vrot.lane.b32.xlu0 %v1769_v17, %s5620_s9  ;;  %1773 = vrot.lane.b32.xlu2 %v1767_v6, %s5620_s9 }
 0x33e   : > { %4257 = vmatmul.msk.bf16.vlgmr.msra.gmra.mxu3 %vm1807_vm9, %v1767_v6  ;;  %v1831_v21 = vsel %vm1807_vm9, %v1786_v20, 0  ;;  %v1764_v32 = vpop.f32.mrf.mxu2 }
 0x33f   : > { %1840 = vmatpush.bf16.xpose.msrb.mxu3 %v1831_v21  ;;  %v1765_v33 = vadd.f32 %v1764_v32, %v1593_v7 }
 0x341   : > { %v6290_v35 = vpack.c.bf16 %v1765_v33, %v1765_v33 }
 0x343   : > { %v2113_v43 = vsel %vm2092_vm10, %v6290_v35, 0 }
 0x345   : > { %1781 = vrot.lane.b32.xlu2 %v1767_v6, %s5621_s17 }
 0x34d   : > { %1783 = vrot.lane.b32.xlu2 %v1769_v17, %s5621_s17 }
 0x34e   : > { %4258 = vmatmul.msk.bf16.vlgmr.msrb.gmra.mxu3 %vm1807_vm9, %v1769_v17 }
 0x38e   : > { %v1778_v23 = vpop.permute.xlu2 %1777 }
 0x38f   : > { %v1789_v24 = vrot.slane %v1778_v23, 4 }
 0x391   : > { %v1888_v25 = vsel %vm1807_vm9, %v1789_v24, 0 }
 0x392   : > { %1897 = vmatpush.bf16.xpose.msrb.mxu2 %v1888_v25 }
 0x397   : > { %v1774_v26 = vpop.permute.xlu2 %1773 }
 0x398   : > { %v1787_v27 = vrot.slane %v1774_v26, 4 }
 0x399   : > { %4261 = vmatmul.msk.bf16.vlgmr.msrb.gmra.mxu2 %vm1807_vm9, %v1778_v23 }
 0x39a   : > { %v1850_v28 = vsel %vm1807_vm9, %v1787_v27, 0 }
 0x39b   : > { %1859 = vmatpush.bf16.xpose.msra.mxu3 %v1850_v28 }
 0x39f   : > { %v1782_v29 = vpop.permute.xlu2 %1781 }
 0x3a0   : > { %v1791_v30 = vrot.slane %v1782_v29, 4 }
 0x3a2   : > { %4259 = vmatmul.msk.bf16.vlgmr.msra.gmra.mxu3 %vm1807_vm9, %v1774_v26  ;;  %v1926_v31 = vsel %vm1807_vm9, %v1791_v30, 0 }
 0x3a3   : > { %1935 = vmatpush.bf16.xpose.msrb.mxu3 %v1926_v31 }
 0x3a7   : > { %v1784_v34 = vpop.permute.xlu2 %1783 }
 0x3a8   : > { %v1792_v37 = vrot.slane %v1784_v34, 4 }
 0x3aa   : > { %v1945_v44 = vsel %vm1807_vm9, %v1792_v37, 0 }
 0x3ae   : > { %v1780_v36 = vpop.permute.xlu1 %1779 }
 0x3af   : > { %v1790_v38 = vrot.slane %v1780_v36, 4  ;;  %v1776_v39 = vpop.permute.xlu0 %1775 }
 0x3b0   : > { %v1788_v40 = vrot.slane %v1776_v39, 4 }
 0x3b1   : > { %v1907_v41 = vsel %vm1807_vm9, %v1790_v38, 0 }
 0x3b2   : > { %4263 = vmatmul.msk.bf16.vlgmr.msrb.gmra.mxu3 %vm1807_vm9, %v1782_v29  ;;  %v1869_v42 = vsel %vm1807_vm9, %v1788_v40, 0  ;;  %1916 = vmatpush.bf16.xpose.msra.mxu2 %v1907_v41 }
 0x3b3   : > { %1878 = vmatpush.bf16.xpose.msrb.mxu0 %v1869_v42 }
 0x3b9   : > { %4262 = vmatmul.msk.bf16.vlgmr.msra.gmra.mxu2 %vm1807_vm9, %v1780_v36 }
 0x3ba   : > { %2122 = vmatpush.bf16.msrb.mxu2 %v2113_v43  ;;  %4260 = vmatmul.msk.bf16.vlgmr.msrb.gmra.mxu0 %vm1807_vm9, %v1776_v39  ;;  %v4839_v43 = vld [vmem:[#allocation8] ss:$0 sm:$0xff] }
 0x3bb   : > { %1954 = vmatpush.bf16.xpose.msra.mxu0 %v1945_v44 }
 0x3c1   : > { %v1823_v46 = vpop.f32.mrf.mxu3 }
 0x3c2   : > { %v1824_v47 = vadd.f32 %v1823_v46, %v1496_v45 }
 0x3c4   : > { %v1961_v48 = vsel %vm1960_vm11, %v1824_v47, -inf }
 0x3c5   : > { %1962 = vmax.xlane.f32.xlu1 %v1961_v48 }
 0x3c9   : > { %v1825_v49 = vpop.f32.mrf.mxu3 }
 0x3ca   : > { %4264 = vmatmul.msk.bf16.vlgmr.msra.gmra.mxu0 %vm1807_vm9, %v1784_v34 }
 0x3d1   : > { %v1842_v50 = vpop.f32.mrf.mxu3 }
 0x3d2   : > { %v1843_v51 = vadd.f32 %v1842_v50, %v1496_v45 }
 0x3d4   : > { %v1964_v52 = vsel %vm1960_vm11, %v1843_v51, -inf }
 0x3d5   : > { %1965 = vmax.xlane.f32.xlu2 %v1964_v52 }
 0x3d9   : > { %v1844_v53 = vpop.f32.mrf.mxu3 }
 0x41c   : > { %v1899_v54 = vpop.f32.mrf.mxu2 }
 0x41d   : > { %v1900_v55 = vadd.f32 %v1899_v54, %v1496_v45 }
 0x41f   : > { %v1973_v56 = vsel %vm1960_vm11, %v1900_v55, -inf }
 0x420   : > { %1974 = vmax.xlane.f32.xlu1 %v1973_v56 }
 0x424   : > { %v1901_v57 = vpop.f32.mrf.mxu2 }
 0x425   : > { %v1861_v58 = vpop.f32.mrf.mxu3  ;;  %v4840_v57 = vld [vmem:[#allocation8 + $0x1] ss:$0 sm:$0xff] }
 0x426   : > { %v1862_v59 = vadd.f32 %v1861_v58, %v1496_v45 }
 0x428   : > { %v1967_v60 = vsel %vm1960_vm11, %v1862_v59, -inf }
 0x429   : > { %1968 = vmax.xlane.f32.xlu0 %v1967_v60 }
 0x42d   : > { %v1863_v61 = vpop.f32.mrf.mxu3 }
 0x435   : > { %v1937_v62 = vpop.f32.mrf.mxu3 }
 0x436   : > { %v1938_v6 = vadd.f32 %v1937_v62, %v1496_v45 }
 0x437   : > { %v1880_v63 = vpop.f32.mrf.mxu0 }
 0x438   : > { %v1881_v18 = vadd.f32 %v1880_v63, %v1496_v45  ;;  %v1963_v0 = vpop.xlane.xlu1 %1962  ;;  %v1979_v22 = vsel %vm1960_vm11, %v1938_v6, -inf }
 0x439   : > { %v1985_v1 = vsub.f32 %v1824_v47, %v1963_v0 }
 0x43a   : > { %v1970_v2 = vsel %vm1960_vm11, %v1881_v18, -inf }
 0x43b   : > { %v1993_v3 = vmul.f32 1.442695, %v1985_v1  ;;  %1971 = vmax.xlane.f32.xlu2 %v1970_v2 }
 0x43c   : > { %v1918_v4 = vpop.f32.mrf.mxu2 }
 0x43d   : > { %4869 = vpow2.f32 %v1993_v3  ;;  %v1939_v5 = vpop.f32.mrf.mxu3  ;;  %v1919_v12 = vadd.f32 %v1918_v4, %v1496_v45 }
 0x43f   : > { %v1882_v7 = vpop.f32.mrf.mxu0  ;;  %v1976_v19 = vsel %vm1960_vm11, %v1919_v12, -inf }
 0x443   : > { %v4870_v8 = vpop.eup %4869  ;;  %1980 = vmax.xlane.f32.xlu2 %v1979_v22 }
 0x444   : > { %v1920_v9 = vpop.f32.mrf.mxu2  ;;  %v2009_v10 = vsel %vm1960_vm11, %v4870_v8, 0.0 }
 0x445   : > { %2010 = vadd.xlane.f32.xlu0 %v2009_v10 }
 0x447   : > { %v1956_v11 = vpop.f32.mrf.mxu0 }
 0x448   : > { %v1966_v13 = vpop.xlane.xlu2 %1965  ;;  %v6309_v21 = vadd.f32 %v1956_v11, %v1496_v45  ;;  %v4843_v11 = vld [vmem:[#allocation8 + $0x3] ss:$0 sm:$0xff] }
 0x449   : > { %v1986_v14 = vsub.f32 %v1843_v51, %v1966_v13 }
 0x44a   : > { %v1982_v25 = vsel %vm1960_vm11, %v6309_v21, -inf }
 0x44b   : > { %v1995_v17 = vmul.f32 1.442695, %v1986_v14 }
 0x44d   : > { %4871 = vpow2.f32 %v1995_v17  ;;  %1977 = vmax.xlane.f32.xlu0 %v1976_v19 }
 0x44f   : > { %v1958_v20 = vpop.f32.mrf.mxu0 }
 0x453   : > { %v4872_v23 = vpop.eup %4871 }
 0x454   : > { %v2012_v24 = vsel %vm1960_vm11, %v4872_v23, 0.0 }
 0x455   : > { %2013 = vadd.xlane.f32.xlu2 %v2012_v24  ;;  %1983 = vmax.xlane.f32.xlu0 %v1982_v25  ;;  %v4841_v24 = vld [vmem:[#allocation8 + $0x4] ss:$0 sm:$0xff] }
 0x46d   : > { %1797 = vrot.lane.b32.xlu2 %v6290_v35, %s5620_s9 }
 0x493   : > { %v1975_v26 = vpop.xlane.xlu1 %1974 }
 0x494   : > { %v1989_v27 = vsub.f32 %v1900_v55, %v1975_v26 }
 0x496   : > { %v2001_v28 = vmul.f32 1.442695, %v1989_v27 }
 0x498   : > { %4873 = vpow2.f32 %v2001_v28 }
 0x49c   : > { %v1969_v29 = vpop.xlane.xlu0 %1968 }
 0x49d   : > { %v1987_v30 = vsub.f32 %v1862_v59, %v1969_v29 }
 0x49e   : > { %v6316_v31 = vpop.eup %4873 }
 0x49f   : > { %v1997_v32 = vmul.f32 1.442695, %v1987_v30  ;;  %v2021_v33 = vsel %vm1960_vm11, %v6316_v31, 0.0 }
 0x4a0   : > { %2022 = vadd.xlane.f32.xlu0 %v2021_v33 }
 0x4a1   : > { %4875 = vpow2.f32 %v1997_v32 }
 0x4a7   : > { %v4876_v34 = vpop.eup %4875 }
 0x4a8   : > { %v2015_v36 = vsel %vm1960_vm11, %v4876_v34, 0.0 }
 0x4a9   : > { %2016 = vadd.xlane.f32.xlu1 %v2015_v36 }
 0x4ae   : > { %v1972_v37 = vpop.xlane.xlu2 %1971 }
 0x4af   : > { %v1988_v38 = vsub.f32 %v1881_v18, %v1972_v37 }
 0x4b1   : > { %v1999_v39 = vmul.f32 1.442695, %v1988_v38  ;;  %v4845_v38 = vld [vmem:[#allocation8 + $0x6] ss:$0 sm:$0xff] }
 0x4b3   : > { %4877 = vpow2.f32 %v1999_v39 }
 0x4b6   : > { %v1981_v45 = vpop.xlane.xlu2 %1980 }
 0x4b7   : > { %v1991_v50 = vsub.f32 %v1938_v6, %v1981_v45 }
 0x4b8   : > { %v2011_v40 = vpop.xlane.xlu0 %2010 }
 0x4b9   : > { %v4878_v41 = vpop.eup %4877  ;;  %4879 = vrcp.f32 %v2011_v40  ;;  %v2005_v53 = vmul.f32 1.442695, %v1991_v50 }
 0x4ba   : > { %v2018_v42 = vsel %vm1960_vm11, %v4878_v41, 0.0 }
 0x4bb   : > { %2019 = vadd.xlane.f32.xlu2 %v2018_v42 }
 0x4bf   : > { %v4880_v44 = vpop.eup %4879 }
 0x4c0   : > { %v2041_v46 = vmul.f32 %v4880_v44, %v4870_v8  ;;  %v1978_v47 = vpop.xlane.xlu0 %1977  ;;  %v4844_v44 = vld [vmem:[#allocation8 + $0x5] ss:$0 sm:$0xff] }
 0x4c1   : > { %v1990_v48 = vsub.f32 %v1919_v12, %v1978_v47 }
 0x4c2   : > { %1795 = vrot.lane.b32.xlu1 %v6273_v16, %s5620_s9  ;;  %v2073_v49 = vmul.f32 %v4839_v43, %v2041_v46 }
 0x4c3   : > { %v2003_v51 = vmul.f32 1.442695, %v1990_v48 }
 0x4c4   : > { %v2081_v52 = vpack.c.bf16 %v2073_v49, %v2073_v49 }
 0x4c5   : > { %4881 = vpow2.f32 %v2003_v51 }
 0x4c6   : > { %4265 = vmatmul.msk.bf16.vlgmr.msrb.gmra.mxu1 %vm1960_vm11, %v2081_v52 }
 0x4c8   : > { %v2014_v54 = vpop.xlane.xlu2 %2013  ;;  %v1984_v1 = vpop.xlane.xlu0 %1983 }
 0x4c9   : > { %4883 = vrcp.f32 %v2014_v54  ;;  %v1992_v2 = vsub.f32 %v6309_v21, %v1984_v1 }
 0x4ca   : > { %4885 = vpow2.f32 %v2005_v53  ;;  %v4846_v53 = vld [vmem:[#allocation8 + $0x7] ss:$0 sm:$0xff] }
 0x4cb   : > { %v6325_v55 = vpop.eup %4881  ;;  %v2007_v3 = vmul.f32 1.442695, %v1992_v2 }
 0x4cc   : > { %v2024_v56 = vsel %vm1960_vm11, %v6325_v55, 0.0 }
 0x4cd   : > { %2025 = vadd.xlane.f32.xlu0 %v2024_v56  ;;  %4887 = vpow2.f32 %v2007_v3 }
 0x4cf   : > { %v4884_v58 = vpop.eup %4883 }
 0x4d0   : > { %v2042_v59 = vmul.f32 %v4884_v58, %v4872_v23  ;;  %v1798_v60 = vpop.permute.xlu2 %1797  ;;  %v6329_v61 = vpop.eup %4885 }
 0x4d1   : > { %v2151_v62 = vsel %vm2092_vm10, %v1798_v60, 0  ;;  %v2027_v0 = vsel %vm1960_vm11, %v6329_v61, 0.0 }
 0x4d2   : > { %v2074_v63 = vmul.f32 %v4840_v57, %v2042_v59  ;;  %2160 = vmatpush.bf16.msrb.mxu0 %v2151_v62 }
 0x4d3   : > { %1803 = vrot.lane.b32.xlu2 %v6273_v16, %s5621_s17  ;;  %v6342_v4 = vpop.eup %4887 }
 0x4d4   : > { %v2082_v18 = vpack.c.bf16 %v2074_v63, %v2074_v63  ;;  %v2030_v5 = vsel %vm1960_vm11, %v6342_v4, 0.0 }
 0x4d5   : > { %2028 = vadd.xlane.f32.xlu0 %v2027_v0 }
 0x4d6   : > { %4266 = vmatmul.msk.bf16.vlgmr.msrb.gmra.mxu2 %vm1960_vm11, %v2082_v18 }
 0x4db   : > { %1799 = vrot.lane.b32.xlu2 %v6273_v16, %s5619_s20  ;;  %v4842_v16 = vld [vmem:[#allocation8 + $0x2] ss:$0 sm:$0xff] }
 0x4e3   : > { %1805 = vrot.lane.b32.xlu2 %v6290_v35, %s5621_s17 }
 0x4e9   : > { %1801 = vrot.lane.b32.xlu0 %v6290_v35, %s5619_s20 }
 0x4ec   : > { %2031 = vadd.xlane.f32.xlu1 %v2030_v5 }
 0x513   : > { %v2023_v22 = vpop.xlane.xlu0 %2022 }
 0x51c   : > { %v2017_v6 = vpop.xlane.xlu1 %2016 }
 0x51d   : > { %4889 = vrcp.f32 %v2017_v6 }
 0x523   : > { %v4890_v7 = vpop.eup %4889 }
 0x524   : > { %v2043_v9 = vmul.f32 %v4890_v7, %v4876_v34 }
 0x526   : > { %v2075_v10 = vmul.f32 %v4842_v16, %v2043_v9 }
 0x528   : > { %v2083_v20 = vpack.c.bf16 %v2075_v10, %v2075_v10 }
 0x52e   : > { %v2020_v8 = vpop.xlane.xlu2 %2019 }
 0x52f   : > { %4891 = vrcp.f32 %v2020_v8 }
 0x530   : > { %4893 = vrcp.f32 %v2023_v22 }
 0x534   : > { %v1796_v12 = vpop.permute.xlu1 %1795 }
 0x535   : > { %v4892_v13 = vpop.eup %4891  ;;  %v2132_v14 = vsel %vm2092_vm10, %v1796_v12, 0 }
 0x536   : > { %v4894_v35 = vpop.eup %4893  ;;  %v2044_v17 = vmul.f32 %v4892_v13, %v4878_v41  ;;  %v1804_v19 = vpop.permute.xlu2 %1803  ;;  %2141 = vmatpush.bf16.msra.mxu3 %v2132_v14 }
 0x537   : > { %v2208_v21 = vsel %vm2092_vm10, %v1804_v19, 0  ;;  %v2045_v25 = vmul.f32 %v4894_v35, %v6316_v31 }
 0x538   : > { %v2076_v23 = vmul.f32 %v4843_v11, %v2044_v17 }
 0x539   : > { %4267 = vmatmul.msk.bf16.vlgmr.msra.gmra.mxu3 %vm1960_vm11, %v2083_v20  ;;  %v2077_v27 = vmul.f32 %v4841_v24, %v2045_v25  ;;  %v4626_v24 = vld [vmem:[%s6186_s1 + $0x38] sm:$0xff]  ;;  %v4625_v25 = vld [vmem:[%s6186_s1 + $0x30] sm:$0xff] }
 0x53a   : > { %2217 = vmatpush.bf16.msrb.mxu3 %v2208_v21  ;;  %v2084_v26 = vpack.c.bf16 %v2076_v23, %v2076_v23 }
 0x53b   : > { %v2085_v32 = vpack.c.bf16 %v2077_v27, %v2077_v27  ;;  %v4623_v27 = vld [vmem:[%s6186_s1 + $0x20] sm:$0xff] }
 0x53c   : > { %4268 = vmatmul.msk.bf16.vlgmr.msrb.gmra.mxu0 %vm1960_vm11, %v2084_v26  ;;  %v4624_v26 = vld [vmem:[%s6186_s1 + $0x28] sm:$0xff] }
 0x53e   : > { %v1800_v28 = vpop.permute.xlu2 %1799 }
 0x53f   : > { %v2170_v29 = vsel %vm2092_vm10, %v1800_v28, 0  ;;  %v4622_v28 = vld [vmem:[%s6186_s1 + $0x18] sm:$0xff] }
 0x540   : > { %2179 = vmatpush.bf16.msra.mxu1 %v2170_v29  ;;  %v2026_v30 = vpop.xlane.xlu0 %2025  ;;  %v4621_v29 = vld [vmem:[%s6186_s1 + $0x10] sm:$0xff] }
 0x543   : > { %4269 = vmatmul.msk.bf16.vlgmr.msra.gmra.mxu1 %vm1960_vm11, %v2085_v32  ;;  %v6355_v33 = vpop.f32.mrf.mxu1  ;;  %v4619_v32 = vld [vmem:[%s6186_s1] sm:$0xff] }
 0x544   : > { %2370 = vmatpush.bf16.msrb.mxu1 %v4626_v24  ;;  %v4641_v24 = vld [vmem:[%s6192_s26 + $0x34] sm:$0xf] }
 0x546   : > { %v1806_v34 = vpop.permute.xlu2 %1805 }
 0x547   : > { %v2227_v36 = vsel %vm2092_vm10, %v1806_v34, 0 }
 0x548   : > { %2236 = vmatpush.bf16.msra.mxu0 %v2227_v36  ;;  %v2029_v31 = vpop.xlane.xlu0 %2028  ;;  %2371 = vmatpush.bf16.msrb.mxu1 %v4625_v25  ;;  %v4369_v25 = vld [vmem:[%s6192_s26 + $0x38] sm:$0xf0] }
 0x549   : > { %4895 = vrcp.f32 %v2029_v31 }
 0x54a   : > { %4897 = vrcp.f32 %v2026_v30  ;;  %v4620_v30 = vld [vmem:[%s6186_s1 + $0x8] sm:$0xff] }
 0x54b   : > { %v2107_v37 = vpop.f32.mrf.mxu1 }
 0x54c   : > { %2372 = vmatpush.bf16.msrb.mxu1 %v4624_v26  ;;  %v2242_v37 = vpack.c.bf16 %v6355_v33, %v6355_v33 }
 0x54f   : > { %v4896_v39 = vpop.eup %4895 }
 0x550   : > { %v2047_v40 = vmul.f32 %v4896_v39, %v6329_v61  ;;  %v4898_v42 = vpop.eup %4897  ;;  %2373 = vmatpush.bf16.msrb.mxu1 %v4623_v27  ;;  %v4372_v27 = vor.u32 %v4641_v24, %v4369_v25 }
 0x551   : > { %v2046_v45 = vmul.f32 %v4898_v42, %v6325_v55 }
 0x552   : > { %v2079_v41 = vmul.f32 %v4845_v38, %v2047_v40 }
 0x553   : > { %v2078_v47 = vmul.f32 %v4844_v44, %v2046_v45 }
 0x554   : > { %v2087_v43 = vpack.c.bf16 %v2079_v41, %v2079_v41  ;;  %2374 = vmatpush.bf16.msrb.mxu1 %v4622_v28  ;;  %v4351_v28 = vld [vmem:[%s6192_s26 + $0x10] sm:$0xf] }
 0x555   : > { %v2086_v50 = vpack.c.bf16 %v2078_v47, %v2078_v47 }
 0x556   : > { %4271 = vmatmul.msk.bf16.vlgmr.msrb.gmra.mxu3 %vm1960_vm11, %v2087_v43 }
 0x558   : > { %2375 = vmatpush.bf16.msrb.mxu1 %v4621_v29  ;;  %v4638_v29 = vld [vmem:[%s6192_s26 + $0x14] sm:$0xf0] }
 0x559   : > { %v6361_v46 = vpop.f32.mrf.mxu2 }
 0x55a   : > { %v2243_v40 = vpack.c.bf16 %v6361_v46, %v6361_v46  ;;  %v4847_v46 = vld [vmem:[%s1235_s28] ss:$0 sm:$0xff] }
 0x55b   : > { %v1802_v48 = vpop.permute.xlu0 %1801 }
 0x55c   : > { %v2189_v49 = vsel %vm2092_vm10, %v1802_v48, 0  ;;  %2376 = vmatpush.bf16.msrb.mxu1 %v4620_v30  ;;  %v4639_v30 = vld [vmem:[%s6192_s26 + $0x24] sm:$0xf] }
 0x55d   : > { %2198 = vmatpush.bf16.msra.mxu2 %v2189_v49 }
 0x55f   : > { %v2032_v51 = vpop.xlane.xlu1 %2031 }
 0x560   : > { %4899 = vrcp.f32 %v2032_v51  ;;  %4270 = vmatmul.msk.bf16.vlgmr.msra.gmra.mxu2 %vm1960_vm11, %v2086_v50  ;;  %2377 = vmatpush.bf16.msrb.mxu1 %v4619_v32  ;;  %v4361_v32 = vld [vmem:[%s6192_s26 + $0x28] sm:$0xf0] }
 0x561   : > { %v2126_v52 = vpop.f32.mrf.mxu2 }
 0x566   : > { %v4900_v54 = vpop.eup %4899 }
 0x567   : > { %v2048_v56 = vmul.f32 %v4900_v54, %v6342_v4 }
 0x569   : > { %v2080_v55 = vmul.f32 %v4846_v53, %v2048_v56  ;;  %v4941_v53 = vld [vmem:[#allocation26] sm:$0xff] }
 0x56b   : > { %v2088_v57 = vpack.c.bf16 %v2080_v55, %v2080_v55 }
 0x56d   : > { %4272 = vmatmul.msk.bf16.vlgmr.msra.gmra.mxu0 %vm1960_vm11, %v2088_v57  ;;  %v4942_v57 = vld [vmem:[#allocation26 + $0x8] sm:$0xff] }
 0x5b9   : > { %v2162_v58 = vpop.f32.mrf.mxu0 }
 0x5ba   : > { %v2245_v59 = vpack.c.bf16 %v2162_v58, %v2162_v58 }
 0x5bc   : > { %v2253_v60 = vunpack.c.l.b16 %v2245_v59  ;;  %v2143_v61 = vpop.f32.mrf.mxu3  ;;  %v4399_v59 = vld [vmem:[%s6192_s26 + $0x70] sm:$0xf] }
 0x5bd   : > { %v2244_v3 = vpack.c.bf16 %v2143_v61, %v2143_v61 }
 0x5be   : > { %v2255_v62 = vpack.c.b16 %v2253_v60, %v2253_v60  ;;  %v4650_v60 = vld [vmem:[%s6192_s26 + $0x74] sm:$0xf0] }
 0x5bf   : > { %v2252_v6 = vunpack.c.l.b16 %v2244_v3  ;;  %v4400_v61 = vor.u32 %v4650_v60, %v4399_v59  ;;  %v4630_v59 = vld [vmem:[%s6189_s5 + $0x18] sm:$0xff]  ;;  %v4629_v60 = vld [vmem:[%s6189_s5 + $0x10] sm:$0xff] }
 0x5c0   : > { %2258 = vrot.lane.b32.xlu2 %v2255_v62, %s5621_s17  ;;  %v2181_v63 = vpop.f32.mrf.mxu1  ;;  %v4391_v62 = vld [vmem:[%s6192_s26 + $0x60] sm:$0xf] }
 0x5c1   : > { %v2246_v18 = vpack.c.bf16 %v2181_v63, %v2181_v63  ;;  %v2164_v0 = vpop.f32.mrf.mxu0  ;;  %v2254_v7 = vpack.c.b16 %v2252_v6, %v2252_v6  ;;  %2631 = vmatpush.bf16.msra.mxu3 %v4400_v61  ;;  %v4648_v63 = vld [vmem:[%s6192_s26 + $0x64] sm:$0xf0]  ;;  %v4393_v6 = vld [vmem:[%s6192_s26 + $0x68] sm:$0xf0] }
 0x5c2   : > { %v4649_v0 = vld [vmem:[%s6192_s26 + $0x74] sm:$0xf]  ;;  %v4628_v61 = vld [vmem:[%s6189_s5 + $0x8] sm:$0xff] }
 0x5c3   : > { %v2262_v1 = vunpack.c.l.b16 %v2246_v18  ;;  %v4392_v18 = vor.u32 %v4648_v63, %v4391_v62  ;;  %v4627_v63 = vld [vmem:[%s6189_s5] sm:$0xff] }
 0x5c4   : > { %v2145_v2 = vpop.f32.mrf.mxu3 }
 0x5c5   : > { %v2264_v5 = vpack.c.b16 %v2262_v1, %v2262_v1  ;;  %v4401_v1 = vld [vmem:[%s6192_s26 + $0x78] sm:$0xf0]  ;;  %v4383_v2 = vld [vmem:[%s6192_s26 + $0x50] sm:$0xf]  ;;  %2632 = vmatpush.bf16.msra.mxu3 %v4392_v18 }
 0x5c6   : > { %v4404_v3 = vor.u32 %v4649_v0, %v4401_v1 }
 0x5c7   : > { %2266 = vrot.lane.b32.xlu0 %v2264_v5, %s5619_s20  ;;  %v4646_v5 = vld [vmem:[%s6192_s26 + $0x54] sm:$0xf0] }
 0x5c8   : > { %v2183_v4 = vpop.f32.mrf.mxu1  ;;  %2645 = vmatpush.bf16.msrb.mxu0 %v4404_v3 }
 0x5c9   : > { %v4647_v4 = vld [vmem:[%s6192_s26 + $0x64] sm:$0xf] }
 0x5cf   : > { %2256 = vrot.lane.b32.xlu0 %v2254_v7, %s5621_s17  ;;  %v4384_v7 = vor.u32 %v4646_v5, %v4383_v2 }
 0x5d1   : > { %2633 = vmatpush.bf16.msra.mxu3 %v4384_v7 }
 0x5d9   : > { %v2219_v22 = vpop.f32.mrf.mxu3 }
 0x5da   : > { %v2248_v8 = vpack.c.bf16 %v2219_v22, %v2219_v22  ;;  %v4396_v22 = vor.u32 %v4647_v4, %v4393_v6 }
 0x5dc   : > { %v2272_v16 = vunpack.c.l.b16 %v2248_v8  ;;  %v4375_v8 = vld [vmem:[%s6192_s26 + $0x40] sm:$0xf]  ;;  %2646 = vmatpush.bf16.msrb.mxu0 %v4396_v22 }
 0x5dd   : > { %v2539_v22 = vld [vmem:[%s6159_s12] sm:$0x3]  ;;  %s6815_s12 = sld [smem:[#allocation36_spill]] }
 0x5de   : > { %v2274_v9 = vpack.c.b16 %v2272_v16, %v2272_v16  ;;  %v4644_v16 = vld [vmem:[%s6192_s26 + $0x44] sm:$0xf0] }
 0x5e0   : > { %2276 = vrot.lane.b32.xlu0 %v2274_v9, %s5620_s9  ;;  %v4645_v9 = vld [vmem:[%s6192_s26 + $0x54] sm:$0xf] }
 0x5e1   : > { %v2221_v10 = vpop.f32.mrf.mxu3 }
 0x5e2   : > { %v4385_v10 = vld [vmem:[%s6192_s26 + $0x58] sm:$0xf0] }
 0x5e3   : > { %v2200_v11 = vpop.f32.mrf.mxu2  ;;  %p4581_p5 = scmp.ne.s32.totalorder %s6815_s12, 1 }
 0x5e4   : > { %v2247_v12 = vpack.c.bf16 %v2200_v11, %v2200_v11  ;;  %v4376_v11 = vor.u32 %v4644_v16, %v4375_v8  ;;  %s6816_s6 = sld [smem:[#allocation64_spill]] (!%p4581_p5) }
 0x5e6   : > { %v2263_v13 = vunpack.c.l.b16 %v2247_v12  ;;  %v4388_v12 = vor.u32 %v4645_v9, %v4385_v10  ;;  %2634 = vmatpush.bf16.msra.mxu3 %v4376_v11  ;;  %v2542_v9 = vperm.slane %v2539_v22, 1 }
 0x5e8   : > { %v2265_v14 = vpack.c.b16 %v2263_v13, %v2263_v13  ;;  %v4367_v13 = vld [vmem:[%s6192_s26 + $0x30] sm:$0xf]  ;;  %2647 = vmatpush.bf16.msrb.mxu0 %v4388_v12  ;;  %v2541_v12 = vperm.slane %v2539_v22, 0 }
 0x5ea   : > { %v2238_v35 = vpop.f32.mrf.mxu0  ;;  %2268 = vrot.lane.b32.xlu2 %v2265_v14, %s5619_s20  ;;  %v4642_v14 = vld [vmem:[%s6192_s26 + $0x34] sm:$0xf0] }
 0x5eb   : > { %v2249_v17 = vpack.c.bf16 %v2238_v35, %v2238_v35  ;;  %v2202_v19 = vpop.f32.mrf.mxu2  ;;  %v4643_v35 = vld [vmem:[%s6192_s26 + $0x44] sm:$0xf] }
 0x5ec   : > { %v4368_v19 = vor.u32 %v4642_v14, %v4367_v13 }
 0x5ed   : > { %v2273_v20 = vunpack.c.l.b16 %v2249_v17  ;;  %v4377_v17 = vld [vmem:[%s6192_s26 + $0x48] sm:$0xf0] }
 0x5ee   : > { %2635 = vmatpush.bf16.msra.mxu3 %v4368_v19 }
 0x5ef   : > { %v2275_v21 = vpack.c.b16 %v2273_v20, %v2273_v20  ;;  %v4380_v20 = vor.u32 %v4643_v35, %v4377_v17 }
 0x5f1   : > { %2278 = vrot.lane.b32.xlu1 %v2275_v21, %s5620_s9  ;;  %v4359_v21 = vld [vmem:[%s6192_s26 + $0x20] sm:$0xf]  ;;  %2648 = vmatpush.bf16.msrb.mxu0 %v4380_v20 }
 0x5f2   : > { %v2240_v23 = vpop.f32.mrf.mxu0 }
 0x5f3   : > { %v4640_v23 = vld [vmem:[%s6192_s26 + $0x24] sm:$0xf0] }
 0x5f4   : > { %v4360_v26 = vor.u32 %v4640_v23, %v4359_v21 }
 0x5f5   : > { %2649 = vmatpush.bf16.msrb.mxu0 %v4372_v27  ;;  %v4848_v27 = vld [vmem:[%s1179_s19] ss:$0 sm:$0xff] }
 0x5f6   : > { %2636 = vmatpush.bf16.msra.mxu3 %v4360_v26 }
 0x61a   : > { %v2259_v31 = vpop.permute.xlu2 %2258 }
 0x61b   : > { %v2285_v43 = vsel %vm1807_vm9, %v2243_v40, %v2259_v31  ;;  %v4352_v31 = vor.u32 %v4638_v29, %v4351_v28 }
 0x61d   : > { %2637 = vmatpush.bf16.msra.mxu3 %v4352_v31 }
 0x639   : > { %v2267_v34 = vpop.permute.xlu0 %2266 }
 0x641   : > { %v2257_v36 = vpop.permute.xlu0 %2256 }
 0x642   : > { %v2282_v38 = vsel %vm1807_vm9, %v2242_v37, %v2257_v36  ;;  %v4364_v37 = vor.u32 %v4639_v30, %v4361_v32 }
 0x643   : > { %v2288_v42 = vsel %vm2286_vm12, %v2282_v38, %v2267_v34  ;;  %v4343_v38 = vld [vmem:[%s6192_s26] sm:$0xf] }
 0x644   : > { %v2269_v41 = vpop.permute.xlu2 %2268  ;;  %2650 = vmatpush.bf16.msrb.mxu0 %v4364_v37 }
 0x645   : > { %v2290_v45 = vsel %vm2286_vm12, %v2285_v43, %v2269_v41  ;;  %v4637_v41 = vld [vmem:[%s6192_s26 + $0x14] sm:$0xf] }
 0x652   : > { %v2277_v39 = vpop.permute.xlu0 %2276 }
 0x653   : > { %v2293_v44 = vsel %vm2291_vm13, %v2288_v42, %v2277_v39  ;;  %v4636_v39 = vld [vmem:[%s6192_s26 + $0x4] sm:$0xf0]  ;;  %v4353_v42 = vld [vmem:[%s6192_s26 + $0x18] sm:$0xf0] }
 0x654   : > { %v2318_v48 = vunpack.c.l.b16 %v2293_v44  ;;  %v4344_v44 = vor.u32 %v4636_v39, %v4343_v38  ;;  %v4849_v38 = vld [vmem:[%s1188_s22] ss:$0 sm:$0xff] }
 0x656   : > { %2638 = vmatpush.bf16.msra.mxu3 %v4344_v44 }
 0x663   : > { %v2279_v47 = vpop.permute.xlu1 %2278 }
 0x664   : > { %v2295_v33 = vsel %vm2291_vm13, %v2290_v45, %v2279_v47  ;;  %v4356_v45 = vor.u32 %v4637_v41, %v4353_v42  ;;  %v4635_v47 = vld [vmem:[%s6192_s26 + $0x4] sm:$0xf] }
 0x665   : > { %v2319_v49 = vunpack.c.l.b16 %v2295_v33  ;;  %v4345_v33 = vld [vmem:[%s6192_s26 + $0x8] sm:$0xf0] }
 0x666   : > { %2651 = vmatpush.bf16.msrb.mxu0 %v4356_v45 }
 0x667   : > { %v2320_v50 = vpack.c.b16 %v2319_v49, %v2318_v48  ;;  %v4594_v49 = vld [vmem:[#allocation6] sm:$0xff] }
 0x668   : > { %2639 = vmatmul.bf16.vlgmr.msra.gmra.mxu3 %v4594_v49 }
 0x669   : > { %2378 = vmatmul.bf16.vlgmr.msrb.gmra.mxu1 %v2320_v50 }
 0x6e6   : > { %v2379_v51 = vpop.f32.mrf.mxu1 }
 0x6e7   : > { %v2380_v52 = vadd.f32 %v4847_v46, %v2379_v51 }
 0x6e9   : > { %v6393_v54 = vadd.f32 %v4941_v53, %v2380_v52  ;;  %v4634_v53 = vld [vmem:[%s6189_s5 + $0x38] sm:$0xff] }
 0x6ea   : > { %2507 = vmatpush.bf16.msrb.mxu2 %v4634_v53 }
 0x6eb   : > { %2388 = vadd.xlane.f32.xlu2 %v6393_v54  ;;  %v2640_v14 = vpop.f32.mrf.mxu3 }
 0x6ec   : > { %v2641_v19 = vadd.f32 %v2640_v14, %v2541_v12 }
 0x6ee   : > { %v2381_v56 = vpop.f32.mrf.mxu1 }
 0x6ef   : > { %v2382_v55 = vadd.f32 %v4847_v46, %v2381_v56  ;;  %v4348_v46 = vor.u32 %v4635_v47, %v4345_v33  ;;  %v4633_v56 = vld [vmem:[%s6189_s5 + $0x30] sm:$0xff]  ;;  %v4850_v33 = vld [vmem:[%s1254_s29] ss:$0 sm:$0xff] }
 0x6f0   : > { %2508 = vmatpush.bf16.msrb.mxu2 %v4633_v56 }
 0x6f1   : > { %v6396_v58 = vadd.f32 %v4942_v57, %v2382_v55  ;;  %2652 = vmatpush.bf16.msrb.mxu0 %v4348_v46  ;;  %v4632_v55 = vld [vmem:[%s6189_s5 + $0x28] sm:$0xff]  ;;  %v4631_v57 = vld [vmem:[%s6189_s5 + $0x20] sm:$0xff] }
 0x6f3   : > { %2390 = vadd.xlane.f32.xlu0 %v6396_v58  ;;  %v2642_v30 = vpop.f32.mrf.mxu3 }
 0x6f4   : > { %2653 = vmatmul.bf16.vlgmr.msrb.gmra.mxu0 %v4594_v49  ;;  %2509 = vmatpush.bf16.msrb.mxu2 %v4632_v55 }
 0x6f8   : > { %2510 = vmatpush.bf16.msrb.mxu2 %v4631_v57 }
 0x6fc   : > { %2511 = vmatpush.bf16.msrb.mxu2 %v4630_v59 }
 0x700   : > { %2512 = vmatpush.bf16.msrb.mxu2 %v4629_v60 }
 0x704   : > { %2513 = vmatpush.bf16.msrb.mxu2 %v4628_v61 }
 0x708   : > { %2514 = vmatpush.bf16.msrb.mxu2 %v4627_v63 }
 0x75e   : > { %v2389_v34 = vpop.xlane.xlu2 %2388 }
 0x75f   : > { %v2392_v36 = vmul.f32 %v2389_v34, %v6202_v15 }
 0x761   : > { %v6429_v40 = vsub.f32 %v6393_v54, %v2392_v36  ;;  %v2643_v36 = vadd.f32 %v2642_v30, %v2541_v12 }
 0x763   : > { %v2396_v43 = vmul.f32 %v6429_v40, %v6429_v40 }
 0x765   : > { %2398 = vadd.xlane.f32.xlu1 %v2396_v43 }
 0x766   : > { %v2391_v48 = vpop.xlane.xlu0 %2390 }
 0x767   : > { %v2393_v50 = vmul.f32 %v2391_v48, %v6202_v15 }
 0x769   : > { %v6439_v51 = vsub.f32 %v6396_v58, %v2393_v50 }
 0x76b   : > { %v2397_v52 = vmul.f32 %v6439_v51, %v6439_v51 }
 0x76d   : > { %2400 = vadd.xlane.f32.xlu2 %v2397_v52 }
 0x771   : > { %v2654_v13 = vpop.f32.mrf.mxu0 }
 0x772   : > { %v2655_v35 = vadd.f32 %v2654_v13, %v2542_v9 }
 0x774   : > { %v6454_v23 = vpack.c.bf16 %v2655_v35, %v2641_v19 }
 0x776   : > { %2677 = vrot.lane.b32.xlu0 %v6454_v23, %s5620_s9  ;;  %v2725_v25 = vsel %vm1807_vm9, %v6454_v23, 0  ;;  %v2689_v14 = vrot.slane %v6454_v23, 4 }
 0x777   : > { %2734 = vmatpush.bf16.xpose.msra.mxu1 %v2725_v25  ;;  %v4852_v25 = vld [vmem:[#allocation9 + $0x1] ss:$0 sm:$0xff] }
 0x779   : > { %v2656_v29 = vpop.f32.mrf.mxu0 }
 0x77a   : > { %v2657_v32 = vadd.f32 %v2656_v29, %v2542_v9 }
 0x77c   : > { %v2660_v39 = vpack.c.bf16 %v2657_v32, %v2643_v36  ;;  %v4853_v36 = vld [vmem:[#allocation9 + $0x2] ss:$0 sm:$0xff] }
 0x77e   : > { %2683 = vrot.lane.b32.xlu1 %v2660_v39, %s5619_s20  ;;  %2679 = vrot.lane.b32.xlu0 %v2660_v39, %s5620_s9  ;;  %v2690_v57 = vrot.slane %v2660_v39, 4 }
 0x780   : > { %v2992_v60 = vsel %vm2092_vm10, %v2690_v57, 0 }
 0x786   : > { %2685 = vrot.lane.b32.xlu0 %v6454_v23, %s5621_s17  ;;  %2687 = vrot.lane.b32.xlu1 %v2660_v39, %s5621_s17 }
 0x7d8   : > { %v2399_v62 = vpop.xlane.xlu1 %2398 }
 0x7d9   : > { %v2402_v18 = vmul.f32 %v2399_v62, %v6202_v15 }
 0x7db   : > { %v2404_v0 = vadd.f32 1e-06, %v2402_v18 }
 0x7dd   : > { %4901 = vrsqrt.f32 %v2404_v0  ;;  %vm2412_vm15 = vweird.f32 %v2404_v0 }
 0x7e0   : > { %v2401_v1 = vpop.xlane.xlu2 %2400 }
 0x7e1   : > { %v2403_v2 = vmul.f32 %v2401_v1, %v6202_v15 }
 0x7e3   : > { %v4902_v3 = vpop.eup %4901  ;;  %v2405_v5 = vadd.f32 1e-06, %v2403_v2 }
 0x7e4   : > { %v2407_v4 = vmul.f32 %v4902_v3, %v2404_v0  ;;  %vm2413_vm14 = vweird.f32 %v4902_v3 }
 0x7e5   : > { %4903 = vrsqrt.f32 %v2405_v5  ;;  %vm2414_vm0 = vmor %vm2412_vm15, %vm2413_vm14  ;;  %vm2422_vm2 = vweird.f32 %v2405_v5 }
 0x7e6   : > { %v2408_v6 = vmul.f32 %v4902_v3, %v2407_v4 }
 0x7e8   : > { %v2409_v7 = vmul.f32 0.5, %v2408_v6  ;;  %v2678_v48 = vpop.permute.xlu0 %2677 }
 0x7e9   : > { %v2763_v49 = vsel %vm1807_vm9, %v2678_v48, 0  ;;  %v2691_v0 = vrot.slane %v2678_v48, 4 }
 0x7ea   : > { %v2410_v8 = vsub.f32 1.5, %v2409_v7  ;;  %2772 = vmatpush.bf16.xpose.msrb.mxu3 %v2763_v49 }
 0x7eb   : > { %v4904_v16 = vpop.eup %4903  ;;  %v3011_v1 = vsel %vm2092_vm10, %v2691_v0, 0 }
 0x7ec   : > { %v2411_v10 = vmul.f32 %v4902_v3, %v2410_v8  ;;  %v2417_v11 = vmul.f32 %v4904_v16, %v2405_v5  ;;  %vm2423_vm1 = vweird.f32 %v4904_v16 }
 0x7ed   : > { %vm2424_vm3 = vmor %vm2422_vm2, %vm2423_vm1 }
 0x7ee   : > { %v2418_v17 = vmul.f32 %v4904_v16, %v2417_v11  ;;  %v2415_v20 = vsel %vm2414_vm0, %v4902_v3, %v2411_v10 }
 0x7ef   : > { %v2426_v26 = vmul.f32 %v2415_v20, %v6429_v40  ;;  %v2744_v40 = vsel %vm1807_vm9, %v2660_v39, 0  ;;  %v2973_v20 = vsel %vm2092_vm10, %v2689_v14, 0  ;;  %v4854_v39 = vld [vmem:[#allocation9 + $0x3] ss:$0 sm:$0xff] }
 0x7f0   : > { %v2419_v21 = vmul.f32 0.5, %v2418_v17  ;;  %2753 = vmatpush.bf16.xpose.msra.mxu2 %v2744_v40  ;;  %v2684_v45 = vpop.permute.xlu1 %2683  ;;  %v2680_v52 = vpop.permute.xlu0 %2679 }
 0x7f1   : > { %v2431_v37 = vmul.f32 %v4848_v27, %v2426_v26  ;;  %v2820_v47 = vsel %vm1807_vm9, %v2684_v45, 0  ;;  %v2782_v53 = vsel %vm1807_vm9, %v2680_v52, 0  ;;  %v2692_v3 = vrot.slane %v2680_v52, 4 }
 0x7f2   : > { %v2420_v24 = vsub.f32 1.5, %v2419_v21  ;;  %2791 = vmatpush.bf16.xpose.msra.mxu0 %v2782_v53  ;;  %v2694_v8 = vrot.slane %v2684_v45, 4  ;;  %v4855_v45 = vld [vmem:[#allocation9 + $0x6] ss:$0 sm:$0xff] }
 0x7f3   : > { %v2436_v42 = vadd.f32 %v4849_v38, %v2431_v37  ;;  %v3030_v5 = vsel %vm2092_vm10, %v2692_v3, 0 }
 0x7f4   : > { %v2421_v28 = vmul.f32 %v4904_v16, %v2420_v24  ;;  %v3068_v10 = vsel %vm2092_vm10, %v2694_v8, 0 }
 0x7f6   : > { %v2425_v34 = vsel %vm2424_vm3, %v4904_v16, %v2421_v28  ;;  %v4851_v16 = vld [vmem:[#allocation9] ss:$0 sm:$0xff] }
 0x7f7   : > { %v2427_v31 = vmul.f32 %v2425_v34, %v6439_v51 }
 0x7f8   : > { %v2686_v61 = vpop.permute.xlu0 %2685  ;;  %v2688_v63 = vpop.permute.xlu1 %2687 }
 0x7f9   : > { %v2432_v41 = vmul.f32 %v4848_v27, %v2427_v31  ;;  %v2839_v62 = vsel %vm1807_vm9, %v2686_v61, 0  ;;  %v2858_v18 = vsel %vm1807_vm9, %v2688_v63, 0  ;;  %v2695_v6 = vrot.slane %v2686_v61, 4  ;;  %v4858_v61 = vld [vmem:[#allocation9 + $0x7] ss:$0 sm:$0xff] }
 0x7fa   : > { %2848 = vmatpush.bf16.xpose.msra.mxu3 %v2839_v62  ;;  %2867 = vmatpush.bf16.xpose.msrb.mxu0 %v2858_v18  ;;  %v2696_v21 = vrot.slane %v2688_v63, 4 }
 0x7fb   : > { %v2437_v43 = vadd.f32 %v4849_v38, %v2432_v41  ;;  %v3087_v22 = vsel %vm2092_vm10, %v2695_v6, 0 }
 0x7fd   : > { %v2455_v44 = vpack.c.bf16 %v2437_v43, %v2436_v42 }
 0x7ff   : > { %2515 = vmatmul.bf16.vlgmr.msrb.gmra.mxu2 %v2455_v44 }
 0x800   : > { %2829 = vmatpush.bf16.xpose.msrb.mxu2 %v2820_v47 }
 0x882   : > { %v2516_v50 = vpop.f32.mrf.mxu2 }
 0x883   : > { %v2517_v46 = vadd.f32 %v4850_v33, %v2516_v50  ;;  %v4856_v50 = vld [vmem:[#allocation9 + $0x5] ss:$0 sm:$0xff] }
 0x885   : > { %v2521_v51 = vpack.c.bf16 %v2517_v46, %v2517_v46 }
 0x887   : > { %2663 = vrot.lane.b32.xlu2 %v2521_v51, %s5620_s9  ;;  %4405 = vmatmul.msk.bf16.vlgmr.msra.gmra.mxu1 %vm1807_vm9, %v2521_v51 }
 0x88a   : > { %v2518_v56 = vpop.f32.mrf.mxu2 }
 0x88b   : > { %v2519_v55 = vadd.f32 %v4850_v33, %v2518_v56 }
 0x88d   : > { %v2522_v59 = vpack.c.bf16 %v2519_v55, %v2519_v55 }
 0x88f   : > { %2665 = vrot.lane.b32.xlu2 %v2522_v59, %s5620_s9  ;;  %4406 = vmatmul.msk.bf16.vlgmr.msra.gmra.mxu2 %vm1807_vm9, %v2522_v59 }
 0x890   : > { %3001 = vmatpush.bf16.msra.mxu2 %v2992_v60  ;;  %2669 = vrot.lane.b32.xlu0 %v2522_v59, %s5619_s20  ;;  %v4857_v60 = vld [vmem:[#allocation9 + $0x4] ss:$0 sm:$0xff] }
 0x897   : > { %2671 = vrot.lane.b32.xlu2 %v2521_v51, %s5621_s17 }
 0x898   : > { %2681 = vrot.lane.b32.xlu0 %v6454_v23, %s5619_s20  ;;  %v3106_v23 = vsel %vm2092_vm10, %v2696_v21, 0 }
 0x89f   : > { %2667 = vrot.lane.b32.xlu2 %v2521_v51, %s5619_s20 }
 0x8a0   : > { %2673 = vrot.lane.b32.xlu0 %v2522_v59, %s5621_s17 }
 0x8e1   : > { %v2664_v2 = vpop.permute.xlu2 %2663 }
 0x8e2   : > { %4407 = vmatmul.msk.bf16.vlgmr.msrb.gmra.mxu3 %vm1807_vm9, %v2664_v2 }
 0x8e3   : > { %3020 = vmatpush.bf16.msrb.mxu3 %v3011_v1 }
 0x8e9   : > { %v2666_v4 = vpop.permute.xlu2 %2665 }
 0x8ea   : > { %4408 = vmatmul.msk.bf16.vlgmr.msra.gmra.mxu0 %vm1807_vm9, %v2666_v4 }
 0x8eb   : > { %3039 = vmatpush.bf16.msra.mxu0 %v3030_v5 }
 0x8f1   : > { %v2672_v7 = vpop.permute.xlu2 %2671 }
 0x8f2   : > { %4411 = vmatmul.msk.bf16.vlgmr.msra.gmra.mxu3 %vm1807_vm9, %v2672_v7 }
 0x8f3   : > { %3096 = vmatpush.bf16.msra.mxu3 %v3087_v22 }
 0x8f9   : > { %v2668_v26 = vpop.permute.xlu2 %2667 }
 0x902   : > { %v2670_v9 = vpop.permute.xlu0 %2669 }
 0x903   : > { %4410 = vmatmul.msk.bf16.vlgmr.msrb.gmra.mxu2 %vm1807_vm9, %v2670_v9 }
 0x904   : > { %3077 = vmatpush.bf16.msrb.mxu2 %v3068_v10  ;;  %v2736_v11 = vpop.f32.mrf.mxu1 }
 0x905   : > { %v2737_v12 = vadd.f32 %v4851_v16, %v2736_v11 }
 0x907   : > { %v2873_v13 = vsel %vm1960_vm11, %v2737_v12, -inf }
 0x908   : > { %2874 = vmax.xlane.f32.xlu0 %v2873_v13 }
 0x90a   : > { %v2682_v35 = vpop.permute.xlu0 %2681 }
 0x90b   : > { %v2801_v17 = vsel %vm1807_vm9, %v2682_v35, 0  ;;  %v2693_v24 = vrot.slane %v2682_v35, 4 }
 0x90c   : > { %2810 = vmatpush.bf16.xpose.msrb.mxu1 %v2801_v17  ;;  %v2738_v19 = vpop.f32.mrf.mxu1 }
 0x90d   : > { %v3049_v30 = vsel %vm2092_vm10, %v2693_v24, 0 }
 0x912   : > { %v2674_v27 = vpop.permute.xlu0 %2673  ;;  %v2755_v28 = vpop.f32.mrf.mxu2 }
 0x913   : > { %v2756_v29 = vadd.f32 %v4852_v25, %v2755_v28  ;;  %4409 = vmatmul.msk.bf16.vlgmr.msrb.gmra.mxu1 %vm1807_vm9, %v2668_v26  ;;  %4412 = vmatmul.msk.bf16.vlgmr.msrb.gmra.mxu0 %vm1807_vm9, %v2674_v27 }
 0x914   : > { %2982 = vmatpush.bf16.msra.mxu1 %v2973_v20  ;;  %3115 = vmatpush.bf16.msrb.mxu0 %v3106_v23 }
 0x915   : > { %v2876_v32 = vsel %vm1960_vm11, %v2756_v29, -inf }
 0x916   : > { %2877 = vmax.xlane.f32.xlu1 %v2876_v32 }
 0x918   : > { %3058 = vmatpush.bf16.msrb.mxu1 %v3049_v30 }
 0x91a   : > { %v2757_v34 = vpop.f32.mrf.mxu2 }
 0x965   : > { %v2774_v31 = vpop.f32.mrf.mxu3 }
 0x966   : > { %v2775_v37 = vadd.f32 %v4853_v36, %v2774_v31 }
 0x967   : > { %v2793_v38 = vpop.f32.mrf.mxu0 }
 0x968   : > { %v2879_v41 = vsel %vm1960_vm11, %v2775_v37, -inf  ;;  %v2794_v40 = vadd.f32 %v4854_v39, %v2793_v38 }
 0x969   : > { %2880 = vmax.xlane.f32.xlu2 %v2879_v41 }
 0x96a   : > { %v2882_v44 = vsel %vm1960_vm11, %v2794_v40, -inf }
 0x96d   : > { %v2776_v42 = vpop.f32.mrf.mxu3 }
 0x96f   : > { %v2795_v43 = vpop.f32.mrf.mxu0 }
 0x971   : > { %2883 = vmax.xlane.f32.xlu2 %v2882_v44 }
 0x975   : > { %v2850_v47 = vpop.f32.mrf.mxu3 }
 0x976   : > { %v2851_v33 = vadd.f32 %v4855_v45, %v2850_v47 }
 0x978   : > { %v2891_v48 = vsel %vm1960_vm11, %v2851_v33, -inf }
 0x979   : > { %2892 = vmax.xlane.f32.xlu0 %v2891_v48 }
 0x97b   : > { %v2875_v51 = vpop.xlane.xlu0 %2874 }
 0x97c   : > { %v2897_v55 = vsub.f32 %v2737_v12, %v2875_v51 }
 0x97d   : > { %v2852_v49 = vpop.f32.mrf.mxu3 }
 0x97e   : > { %v2905_v62 = vmul.f32 1.442695, %v2897_v55 }
 0x986   : > { %v2831_v46 = vpop.f32.mrf.mxu2 }
 0x987   : > { %v2832_v52 = vadd.f32 %v4856_v50, %v2831_v46 }
 0x989   : > { %v2878_v53 = vpop.xlane.xlu1 %2877  ;;  %v2888_v56 = vsel %vm1960_vm11, %v2832_v52, -inf }
 0x98a   : > { %v2898_v57 = vsub.f32 %v2756_v29, %v2878_v53  ;;  %2889 = vmax.xlane.f32.xlu1 %v2888_v56 }
 0x98c   : > { %v2907_v59 = vmul.f32 1.442695, %v2898_v57 }
 0x98e   : > { %4905 = vpow2.f32 %v2907_v59  ;;  %v2833_v63 = vpop.f32.mrf.mxu2 }
 0x98f   : > { %4907 = vpow2.f32 %v2905_v62 }
 0x990   : > { %v2812_v18 = vpop.f32.mrf.mxu1  ;;  %v2869_v0 = vpop.f32.mrf.mxu0 }
 0x991   : > { %v2813_v1 = vadd.f32 %v4857_v60, %v2812_v18  ;;  %v2870_v2 = vadd.f32 %v4858_v61, %v2869_v0 }
 0x993   : > { %v2894_v3 = vsel %vm1960_vm11, %v2870_v2, -inf  ;;  %v2885_v5 = vsel %vm1960_vm11, %v2813_v1, -inf }
 0x994   : > { %v4906_v4 = vpop.eup %4905  ;;  %2895 = vmax.xlane.f32.xlu1 %v2894_v3  ;;  %2886 = vmax.xlane.f32.xlu2 %v2885_v5 }
 0x995   : > { %v2924_v6 = vsel %vm1960_vm11, %v4906_v4, 0.0  ;;  %v4908_v7 = vpop.eup %4907 }
 0x996   : > { %2925 = vadd.xlane.f32.xlu0 %v2924_v6  ;;  %v2921_v16 = vsel %vm1960_vm11, %v4908_v7, 0.0 }
 0x998   : > { %v2814_v22 = vpop.f32.mrf.mxu1  ;;  %v2871_v8 = vpop.f32.mrf.mxu0 }
 0x99c   : > { %2922 = vadd.xlane.f32.xlu1 %v2921_v16 }
 0x9dc   : > { %v2881_v9 = vpop.xlane.xlu2 %2880 }
 0x9dd   : > { %v2899_v10 = vsub.f32 %v2775_v37, %v2881_v9 }
 0x9df   : > { %v2909_v11 = vmul.f32 1.442695, %v2899_v10 }
 0x9e1   : > { %4909 = vpow2.f32 %v2909_v11 }
 0x9e4   : > { %v2884_v12 = vpop.xlane.xlu2 %2883 }
 0x9e5   : > { %v2900_v13 = vsub.f32 %v2794_v40, %v2884_v12 }
 0x9e7   : > { %v4910_v14 = vpop.eup %4909  ;;  %v2911_v35 = vmul.f32 1.442695, %v2900_v13 }
 0x9e8   : > { %v2927_v17 = vsel %vm1960_vm11, %v4910_v14, 0.0 }
 0x9e9   : > { %4911 = vpow2.f32 %v2911_v35  ;;  %2928 = vadd.xlane.f32.xlu2 %v2927_v17 }
 0x9ec   : > { %v2893_v19 = vpop.xlane.xlu0 %2892 }
 0x9ed   : > { %v2903_v20 = vsub.f32 %v2851_v33, %v2893_v19 }
 0x9ef   : > { %v4912_v21 = vpop.eup %4911  ;;  %v2917_v24 = vmul.f32 1.442695, %v2903_v20 }
 0x9f0   : > { %v2930_v25 = vsel %vm1960_vm11, %v4912_v21, 0.0 }
 0x9f1   : > { %4913 = vpow2.f32 %v2917_v24  ;;  %2931 = vadd.xlane.f32.xlu0 %v2930_v25 }
 0x9f7   : > { %v4914_v26 = vpop.eup %4913 }
 0x9f8   : > { %v2939_v27 = vsel %vm1960_vm11, %v4914_v26, 0.0 }
 0x9f9   : > { %2940 = vadd.xlane.f32.xlu1 %v2939_v27 }
 0x9fd   : > { %v2890_v28 = vpop.xlane.xlu1 %2889 }
 0x9fe   : > { %v2902_v29 = vsub.f32 %v2832_v52, %v2890_v28 }
 0xa00   : > { %v2915_v23 = vmul.f32 1.442695, %v2902_v29 }
 0xa02   : > { %4915 = vpow2.f32 %v2915_v23 }
 0xa07   : > { %v2896_v30 = vpop.xlane.xlu1 %2895  ;;  %v2887_v32 = vpop.xlane.xlu2 %2886 }
 0xa08   : > { %v4916_v34 = vpop.eup %4915  ;;  %v2904_v36 = vsub.f32 %v2870_v2, %v2896_v30  ;;  %v2901_v31 = vsub.f32 %v2813_v1, %v2887_v32 }
 0xa09   : > { %v2936_v37 = vsel %vm1960_vm11, %v4916_v34, 0.0  ;;  %v2926_v38 = vpop.xlane.xlu0 %2925 }
 0xa0a   : > { %v2919_v39 = vmul.f32 1.442695, %v2904_v36  ;;  %v2913_v41 = vmul.f32 1.442695, %v2901_v31  ;;  %2937 = vadd.xlane.f32.xlu2 %v2936_v37  ;;  %4917 = vrcp.f32 %v2926_v38 }
 0xa0c   : > { %4919 = vpow2.f32 %v2919_v39 }
 0xa0d   : > { %4921 = vpow2.f32 %v2913_v41 }
 0xa0f   : > { %v2923_v40 = vpop.xlane.xlu1 %2922 }
 0xa10   : > { %v4918_v42 = vpop.eup %4917  ;;  %4923 = vrcp.f32 %v2923_v40 }
 0xa11   : > { %v2954_v43 = vmul.f32 %v4918_v42, %v4906_v4 }
 0xa12   : > { %v4920_v44 = vpop.eup %4919 }
 0xa13   : > { %v4922_v45 = vpop.eup %4921  ;;  %v2962_v47 = vpack.c.bf16 %v2954_v43, %v2954_v43  ;;  %v2942_v33 = vsel %vm1960_vm11, %v4920_v44, 0.0 }
 0xa14   : > { %2943 = vadd.xlane.f32.xlu2 %v2942_v33  ;;  %v2933_v48 = vsel %vm1960_vm11, %v4922_v45, 0.0 }
 0xa15   : > { %2934 = vadd.xlane.f32.xlu0 %v2933_v48  ;;  %4414 = vmatmul.msk.bf16.vlgmr.msra.gmra.mxu2 %vm1960_vm11, %v2962_v47 }
 0xa16   : > { %v4924_v49 = vpop.eup %4923 }
 0xa17   : > { %v2953_v50 = vmul.f32 %v4924_v49, %v4908_v7  ;;  %v4658_v49 = vld [vmem:[%s6194_s14 + $0x38] sm:$0xff] }
 0xa19   : > { %v2961_v46 = vpack.c.bf16 %v2953_v50, %v2953_v50  ;;  %v4657_v50 = vld [vmem:[%s6194_s14 + $0x30] sm:$0xff] }
 0xa1b   : > { %4413 = vmatmul.msk.bf16.vlgmr.msra.gmra.mxu1 %vm1960_vm11, %v2961_v46  ;;  %v4656_v46 = vld [vmem:[%s6194_s14 + $0x28] sm:$0xff] }
 0xa1c   : > { %3247 = vmatpush.bf16.msra.mxu1 %v4658_v49 }
 0xa20   : > { %3248 = vmatpush.bf16.msra.mxu1 %v4657_v50  ;;  %v4479_v50 = vld [vmem:[%s6196_s11 + $0x30] sm:$0xf] }
 0xa24   : > { %3249 = vmatpush.bf16.msra.mxu1 %v4656_v46  ;;  %v4666_v46 = vld [vmem:[%s6196_s11 + $0x34] sm:$0xf0] }
 0xa5c   : > { %v2929_v51 = vpop.xlane.xlu2 %2928 }
 0xa5d   : > { %4925 = vrcp.f32 %v2929_v51  ;;  %v4655_v51 = vld [vmem:[%s6194_s14 + $0x20] sm:$0xff] }
 0xa5e   : > { %3250 = vmatpush.bf16.msra.mxu1 %v4655_v51  ;;  %v4665_v51 = vld [vmem:[%s6196_s11 + $0x34] sm:$0xf] }
 0xa63   : > { %v4926_v52 = vpop.eup %4925 }
 0xa64   : > { %v2955_v53 = vmul.f32 %v4926_v52, %v4910_v14  ;;  %v2932_v56 = vpop.xlane.xlu0 %2931  ;;  %v4654_v52 = vld [vmem:[%s6194_s14 + $0x18] sm:$0xff] }
 0xa65   : > { %4927 = vrcp.f32 %v2932_v56  ;;  %3251 = vmatpush.bf16.msra.mxu1 %v4654_v52  ;;  %v4652_v56 = vld [vmem:[%s6194_s14 + $0x8] sm:$0xff]  ;;  %v4480_v52 = vor.u32 %v4666_v46, %v4479_v50  ;;  %v4687_v50 = vld [vmem:[%s6198_s16 + $0x60] sm:$0xff]  ;;  %v4686_v46 = vld [vmem:[%s6198_s16 + $0x58] sm:$0xff] }
 0xa66   : > { %v2963_v55 = vpack.c.bf16 %v2955_v53, %v2955_v53  ;;  %v4653_v53 = vld [vmem:[%s6194_s14 + $0x10] sm:$0xff] }
 0xa68   : > { %4415 = vmatmul.msk.bf16.vlgmr.msrb.gmra.mxu3 %vm1960_vm11, %v2963_v55  ;;  %v4651_v55 = vld [vmem:[%s6194_s14] sm:$0xff] }
 0xa69   : > { %3252 = vmatpush.bf16.msra.mxu1 %v4653_v53  ;;  %v4481_v53 = vld [vmem:[%s6196_s11 + $0x38] sm:$0xf0] }
 0xa6b   : > { %v4928_v57 = vpop.eup %4927 }
 0xa6c   : > { %v2956_v59 = vmul.f32 %v4928_v57, %v4912_v21  ;;  %v2941_v60 = vpop.xlane.xlu1 %2940 }
 0xa6d   : > { %4929 = vrcp.f32 %v2941_v60  ;;  %3253 = vmatpush.bf16.msra.mxu1 %v4652_v56  ;;  %v4484_v56 = vor.u32 %v4665_v51, %v4481_v53  ;;  %v4677_v51 = vld [vmem:[%s6198_s16 + $0x10] sm:$0xff]  ;;  %v4676_v53 = vld [vmem:[%s6198_s16 + $0x8] sm:$0xff] }
 0xa6e   : > { %v2964_v61 = vpack.c.bf16 %v2956_v59, %v2956_v59 }
 0xa70   : > { %4416 = vmatmul.msk.bf16.vlgmr.msra.gmra.mxu0 %vm1960_vm11, %v2964_v61 }
 0xa71   : > { %3254 = vmatpush.bf16.msra.mxu1 %v4651_v55  ;;  %v4471_v55 = vld [vmem:[%s6196_s11 + $0x20] sm:$0xf] }
 0xa73   : > { %v4930_v62 = vpop.eup %4929 }
 0xa74   : > { %v2959_v63 = vmul.f32 %v4930_v62, %v4914_v26 }
 0xa76   : > { %v2967_v18 = vpack.c.bf16 %v2959_v63, %v2959_v63 }
 0xa78   : > { %4419 = vmatmul.msk.bf16.vlgmr.msra.gmra.mxu3 %vm1960_vm11, %v2967_v18 }
 0xa7d   : > { %v2938_v0 = vpop.xlane.xlu2 %2937 }
 0xa7e   : > { %4931 = vrcp.f32 %v2938_v0 }
 0xa84   : > { %v4932_v1 = vpop.eup %4931 }
 0xa85   : > { %v2958_v2 = vmul.f32 %v4932_v1, %v4916_v34 }
 0xa87   : > { %v2966_v3 = vpack.c.bf16 %v2958_v2, %v2958_v2  ;;  %v2944_v5 = vpop.xlane.xlu2 %2943 }
 0xa88   : > { %4933 = vrcp.f32 %v2944_v5  ;;  %v2935_v4 = vpop.xlane.xlu0 %2934 }
 0xa89   : > { %4935 = vrcp.f32 %v2935_v4  ;;  %4418 = vmatmul.msk.bf16.vlgmr.msrb.gmra.mxu2 %vm1960_vm11, %v2966_v3 }
 0xa8e   : > { %v4934_v6 = vpop.eup %4933 }
 0xa8f   : > { %v4936_v7 = vpop.eup %4935  ;;  %v2960_v22 = vmul.f32 %v4934_v6, %v4920_v44 }
 0xa90   : > { %v2957_v8 = vmul.f32 %v4936_v7, %v4922_v45 }
 0xa91   : > { %v2968_v16 = vpack.c.bf16 %v2960_v22, %v2960_v22 }
 0xa92   : > { %v2965_v9 = vpack.c.bf16 %v2957_v8, %v2957_v8 }
 0xa93   : > { %4420 = vmatmul.msk.bf16.vlgmr.msrb.gmra.mxu0 %vm1960_vm11, %v2968_v16  ;;  %v4859_v16 = vld [vmem:[%s1451_s7] ss:$0 sm:$0xff] }
 0xa94   : > { %4417 = vmatmul.msk.bf16.vlgmr.msrb.gmra.mxu1 %vm1960_vm11, %v2965_v9 }
 0xa98   : > { %v6529_v10 = vpop.f32.mrf.mxu1  ;;  %v6531_v11 = vpop.f32.mrf.mxu2 }
 0xa99   : > { %v3121_v61 = vpack.c.bf16 %v6529_v10, %v6529_v10  ;;  %v3122_v63 = vpack.c.bf16 %v6531_v11, %v6531_v11 }
 0xaa0   : > { %v2986_v12 = vpop.f32.mrf.mxu1  ;;  %v3005_v13 = vpop.f32.mrf.mxu2 }
 0xaeb   : > { %v3022_v14 = vpop.f32.mrf.mxu3 }
 0xaec   : > { %v3123_v35 = vpack.c.bf16 %v3022_v14, %v3022_v14 }
 0xaed   : > { %v3041_v17 = vpop.f32.mrf.mxu0 }
 0xaee   : > { %v3131_v19 = vunpack.c.l.b16 %v3123_v35  ;;  %v3124_v20 = vpack.c.bf16 %v3041_v17, %v3041_v17 }
 0xaf0   : > { %v3133_v21 = vpack.c.b16 %v3131_v19, %v3131_v19  ;;  %v3132_v24 = vunpack.c.l.b16 %v3124_v20 }
 0xaf2   : > { %v3134_v25 = vpack.c.b16 %v3132_v24, %v3132_v24  ;;  %3135 = vrot.lane.b32.xlu1 %v3133_v21, %s5621_s17 }
 0xaf3   : > { %v3024_v26 = vpop.f32.mrf.mxu3 }
 0xaf4   : > { %3137 = vrot.lane.b32.xlu0 %v3134_v25, %s5621_s17  ;;  %v4511_v25 = vld [vmem:[%s6196_s11 + $0x70] sm:$0xf]  ;;  %v4674_v26 = vld [vmem:[%s6196_s11 + $0x74] sm:$0xf0] }
 0xaf5   : > { %v3043_v27 = vpop.f32.mrf.mxu0 }
 0xaf6   : > { %v4673_v27 = vld [vmem:[%s6196_s11 + $0x74] sm:$0xf] }
 0xafb   : > { %v3098_v28 = vpop.f32.mrf.mxu3 }
 0xafc   : > { %v3127_v29 = vpack.c.bf16 %v3098_v28, %v3098_v28  ;;  %v4512_v28 = vor.u32 %v4674_v26, %v4511_v25  ;;  %v4680_v26 = vld [vmem:[%s6198_s16 + $0x28] sm:$0xff] }
 0xafe   : > { %v3151_v23 = vunpack.c.l.b16 %v3127_v29  ;;  %v4513_v29 = vld [vmem:[%s6196_s11 + $0x78] sm:$0xf0]  ;;  %3418 = vmatpush.bf16.msra.mxu2 %v4512_v28 }
 0xb00   : > { %v3153_v30 = vpack.c.b16 %v3151_v23, %v3151_v23  ;;  %v4516_v23 = vor.u32 %v4673_v27, %v4513_v29  ;;  %v4688_v27 = vld [vmem:[%s6198_s16 + $0x68] sm:$0xff] }
 0xb02   : > { %3155 = vrot.lane.b32.xlu0 %v3153_v30, %s5620_s9  ;;  %3432 = vmatpush.bf16.msrb.mxu3 %v4516_v23  ;;  %v4503_v30 = vld [vmem:[%s6196_s11 + $0x60] sm:$0xf] }
 0xb03   : > { %v3100_v32 = vpop.f32.mrf.mxu3 }
 0xb04   : > { %v4672_v32 = vld [vmem:[%s6196_s11 + $0x64] sm:$0xf0] }
 0xb0c   : > { %v3079_v34 = vpop.f32.mrf.mxu2 }
 0xb0d   : > { %v3126_v36 = vpack.c.bf16 %v3079_v34, %v3079_v34  ;;  %v4671_v34 = vld [vmem:[%s6196_s11 + $0x64] sm:$0xf] }
 0xb0f   : > { %v3142_v31 = vunpack.c.l.b16 %v3126_v36  ;;  %v4504_v36 = vor.u32 %v4672_v32, %v4503_v30 }
 0xb10   : > { %v3117_v37 = vpop.f32.mrf.mxu0 }
 0xb11   : > { %v3144_v38 = vpack.c.b16 %v3142_v31, %v3142_v31  ;;  %v3060_v39 = vpop.f32.mrf.mxu1  ;;  %v3128_v44 = vpack.c.bf16 %v3117_v37, %v3117_v37  ;;  %v4505_v31 = vld [vmem:[%s6196_s11 + $0x68] sm:$0xf0]  ;;  %3419 = vmatpush.bf16.msra.mxu2 %v4504_v36 }
 0xb12   : > { %v3125_v41 = vpack.c.bf16 %v3060_v39, %v3060_v39  ;;  %v4508_v37 = vor.u32 %v4671_v34, %v4505_v31  ;;  %v4670_v39 = vld [vmem:[%s6196_s11 + $0x54] sm:$0xf0] }
 0xb13   : > { %3147 = vrot.lane.b32.xlu1 %v3144_v38, %s5619_s20  ;;  %v3152_v33 = vunpack.c.l.b16 %v3128_v44  ;;  %v4495_v38 = vld [vmem:[%s6196_s11 + $0x50] sm:$0xf]  ;;  %v4487_v44 = vld [vmem:[%s6196_s11 + $0x40] sm:$0xf] }
 0xb14   : > { %v3141_v40 = vunpack.c.l.b16 %v3125_v41  ;;  %v3081_v42 = vpop.f32.mrf.mxu2  ;;  %3433 = vmatpush.bf16.msrb.mxu3 %v4508_v37  ;;  %v4669_v41 = vld [vmem:[%s6196_s11 + $0x54] sm:$0xf] }
 0xb15   : > { %v3154_v48 = vpack.c.b16 %v3152_v33, %v3152_v33  ;;  %v4497_v42 = vld [vmem:[%s6196_s11 + $0x58] sm:$0xf0] }
 0xb16   : > { %v3143_v43 = vpack.c.b16 %v3141_v40, %v3141_v40  ;;  %v4496_v40 = vor.u32 %v4670_v39, %v4495_v38 }
 0xb18   : > { %3145 = vrot.lane.b32.xlu2 %v3143_v43, %s5619_s20  ;;  %v3119_v45 = vpop.f32.mrf.mxu0  ;;  %v4500_v43 = vor.u32 %v4669_v41, %v4497_v42  ;;  %3420 = vmatpush.bf16.msra.mxu2 %v4496_v40  ;;  %v4860_v41 = vld [vmem:[%s1197_s23] ss:$0 sm:$0xff] }
 0xb19   : > { %v3062_v47 = vpop.f32.mrf.mxu1  ;;  %v4668_v45 = vld [vmem:[%s6196_s11 + $0x44] sm:$0xf0] }
 0xb1a   : > { %3434 = vmatpush.bf16.msrb.mxu3 %v4500_v43  ;;  %v4667_v47 = vld [vmem:[%s6196_s11 + $0x44] sm:$0xf]  ;;  %v4488_v33 = vor.u32 %v4668_v45, %v4487_v44  ;;  %v4861_v45 = vld [vmem:[%s1206_s4] ss:$0 sm:$0xff] }
 0xb1c   : > { %3421 = vmatpush.bf16.msra.mxu2 %v4488_v33 }
 0xb20   : > { %3157 = vrot.lane.b32.xlu2 %v3154_v48, %s5620_s9  ;;  %v4489_v48 = vld [vmem:[%s6196_s11 + $0x48] sm:$0xf0]  ;;  %3422 = vmatpush.bf16.msra.mxu2 %v4480_v52  ;;  %v4685_v52 = vld [vmem:[%s6198_s16 + $0x50] sm:$0xff] }
 0xb21   : > { %v4492_v49 = vor.u32 %v4667_v47, %v4489_v48 }
 0xb23   : > { %3435 = vmatpush.bf16.msrb.mxu3 %v4492_v49  ;;  %v4679_v49 = vld [vmem:[%s6198_s16 + $0x20] sm:$0xff] }
 0xb27   : > { %3436 = vmatpush.bf16.msrb.mxu3 %v4484_v56  ;;  %v4684_v56 = vld [vmem:[%s6198_s16 + $0x48] sm:$0xff] }
 0xb64   : > { %v3136_v60 = vpop.permute.xlu1 %3135 }
 0xb65   : > { %v3161_v18 = vsel %vm1807_vm9, %v3121_v61, %v3136_v60  ;;  %v4473_v61 = vld [vmem:[%s6196_s11 + $0x28] sm:$0xf0] }
 0xb66   : > { %v3138_v57 = vpop.permute.xlu0 %3137 }
 0xb67   : > { %v3164_v1 = vsel %vm1807_vm9, %v3122_v63, %v3138_v57  ;;  %v4664_v57 = vld [vmem:[%s6196_s11 + $0x24] sm:$0xf0]  ;;  %v4463_v63 = vld [vmem:[%s6196_s11 + $0x10] sm:$0xf] }
 0xb68   : > { %v4472_v60 = vor.u32 %v4664_v57, %v4471_v55  ;;  %v4675_v55 = vld [vmem:[%s6198_s16] sm:$0xff] }
 0xb69   : > { %v4683_v57 = vld [vmem:[%s6198_s16 + $0x40] sm:$0xff] }
 0xb6a   : > { %3423 = vmatpush.bf16.msra.mxu2 %v4472_v60 }
 0xb72   : > { %v3146_v59 = vpop.permute.xlu2 %3145 }
 0xb73   : > { %v3166_v0 = vsel %vm2286_vm12, %v3161_v18, %v3146_v59  ;;  %v4663_v59 = vld [vmem:[%s6196_s11 + $0x24] sm:$0xf]  ;;  %v4662_v18 = vld [vmem:[%s6196_s11 + $0x14] sm:$0xf0] }
 0xb74   : > { %v3156_v62 = vpop.permute.xlu0 %3155 }
 0xb75   : > { %v3170_v2 = vsel %vm2291_vm13, %v3166_v0, %v3156_v62  ;;  %v4476_v62 = vor.u32 %v4663_v59, %v4473_v61  ;;  %v4661_v0 = vld [vmem:[%s6196_s11 + $0x14] sm:$0xf]  ;;  %v3331_v59 = vld [vmem:[%s6173_s15] sm:$0x3] }
 0xb76   : > { %v3195_v7 = vunpack.c.l.b16 %v3170_v2  ;;  %v4465_v2 = vld [vmem:[%s6196_s11 + $0x18] sm:$0xf0]  ;;  %v3334_v60 = vperm.slane %v3331_v59, 0  ;;  %v3335_v61 = vperm.slane %v3331_v59, 1 }
 0xb77   : > { %3437 = vmatpush.bf16.msrb.mxu3 %v4476_v62 }
 0xb7a   : > { %v3158_v5 = vpop.permute.xlu2 %3157 }
 0xb85   : > { %v3148_v3 = vpop.permute.xlu1 %3147 }
 0xb86   : > { %v3168_v4 = vsel %vm2286_vm12, %v3164_v1, %v3148_v3  ;;  %v4464_v1 = vor.u32 %v4662_v18, %v4463_v63  ;;  %v4455_v3 = vld [vmem:[%s6196_s11] sm:$0xf] }
 0xb87   : > { %v3172_v6 = vsel %vm2291_vm13, %v3168_v4, %v3158_v5  ;;  %v4660_v5 = vld [vmem:[%s6196_s11 + $0x4] sm:$0xf0] }
 0xb88   : > { %v3196_v22 = vunpack.c.l.b16 %v3172_v6  ;;  %v4468_v6 = vor.u32 %v4661_v0, %v4465_v2  ;;  %3424 = vmatpush.bf16.msra.mxu2 %v4464_v1 }
 0xb8a   : > { %v3197_v8 = vpack.c.b16 %v3196_v22, %v3195_v7  ;;  %v4659_v7 = vld [vmem:[%s6196_s11 + $0x4] sm:$0xf]  ;;  %v4457_v22 = vld [vmem:[%s6196_s11 + $0x8] sm:$0xf0]  ;;  %3438 = vmatpush.bf16.msrb.mxu3 %v4468_v6 }
 0xb8c   : > { %3255 = vmatmul.bf16.vlgmr.msra.gmra.mxu1 %v3197_v8 }
 0xc09   : > { %v3256_v9 = vpop.f32.mrf.mxu1 }
 0xc0a   : > { %v3257_v10 = vadd.f32 %v4859_v16, %v3256_v9  ;;  %v4460_v9 = vor.u32 %v4659_v7, %v4457_v22 }
 0xc0c   : > { %v6563_v11 = vadd.f32 %v3257_v10, %v6393_v54  ;;  %3439 = vmatpush.bf16.msrb.mxu3 %v4460_v9 }
 0xc0e   : > { %3265 = vadd.xlane.f32.xlu1 %v6563_v11 }
 0xc11   : > { %v3258_v12 = vpop.f32.mrf.mxu1 }
 0xc12   : > { %v3259_v13 = vadd.f32 %v4859_v16, %v3258_v12  ;;  %v4456_v16 = vor.u32 %v4660_v5, %v4455_v3  ;;  %v4682_v12 = vld [vmem:[%s6198_s16 + $0x38] sm:$0xff] }
 0xc13   : > { %3600 = vmatpush.bf16.msra.mxu0 %v4682_v12 }
 0xc14   : > { %v6567_v14 = vadd.f32 %v3259_v13, %v6396_v58  ;;  %3425 = vmatpush.bf16.msra.mxu2 %v4456_v16  ;;  %v4690_v13 = vld [vmem:[%s6198_s16 + $0x78] sm:$0xff] }
 0xc15   : > { %3614 = vmatpush.bf16.msrb.mxu1 %v4690_v13 }
 0xc16   : > { %3267 = vadd.xlane.f32.xlu0 %v6567_v14 }
 0xc81   : > { %v3266_v35 = vpop.xlane.xlu1 %3265 }
 0xc82   : > { %v3269_v17 = vmul.f32 %v3266_v35, %v6202_v15 }
 0xc84   : > { %v6572_v19 = vsub.f32 %v6563_v11, %v3269_v17 }
 0xc86   : > { %v3273_v54 = vmul.f32 %v6572_v19, %v6572_v19 }
 0xc88   : > { %3275 = vadd.xlane.f32.xlu2 %v3273_v54  ;;  %v4681_v54 = vld [vmem:[%s6198_s16 + $0x30] sm:$0xff] }
 0xc89   : > { %v3268_v20 = vpop.xlane.xlu0 %3267  ;;  %3601 = vmatpush.bf16.msra.mxu0 %v4681_v54  ;;  %v4862_v54 = vld [vmem:[%s1458_s0] ss:$0 sm:$0xff]  ;;  %s6817_s0 = sld [smem:[#allocation65_spill]] (!%p4581_p5) }
 0xc8a   : > { %v3270_v58 = vmul.f32 %v3268_v20, %v6202_v15  ;;  %v4689_v20 = vld [vmem:[%s6198_s16 + $0x70] sm:$0xff] }
 0xc8b   : > { %3615 = vmatpush.bf16.msrb.mxu1 %v4689_v20 }
 0xc8c   : > { %v6578_v21 = vsub.f32 %v6567_v14, %v3270_v58 }
 0xc8d   : > { %3602 = vmatpush.bf16.msra.mxu0 %v4680_v26 }
 0xc8e   : > { %v3274_v24 = vmul.f32 %v6578_v21, %v6578_v21 }
 0xc8f   : > { %3616 = vmatpush.bf16.msrb.mxu1 %v4688_v27 }
 0xc90   : > { %3277 = vadd.xlane.f32.xlu1 %v3274_v24 }
 0xc91   : > { %3603 = vmatpush.bf16.msra.mxu0 %v4679_v49 }
 0xc93   : > { %3617 = vmatpush.bf16.msrb.mxu1 %v4687_v50 }
 0xc97   : > { %3618 = vmatpush.bf16.msrb.mxu1 %v4686_v46 }
 0xc9b   : > { %3619 = vmatpush.bf16.msrb.mxu1 %v4685_v52 }
 0xc9f   : > { %3620 = vmatpush.bf16.msrb.mxu1 %v4684_v56 }
 0xca3   : > { %3621 = vmatpush.bf16.msrb.mxu1 %v4683_v57 }
 0xcfb   : > { %v3276_v4 = vpop.xlane.xlu2 %3275 }
 0xcfc   : > { %v3279_v8 = vmul.f32 %v3276_v4, %v6202_v15 }
 0xcfe   : > { %v3281_v10 = vadd.f32 1e-06, %v3279_v8 }
 0xd00   : > { %4937 = vrsqrt.f32 %v3281_v10  ;;  %vm3289_vm5 = vweird.f32 %v3281_v10 }
 0xd03   : > { %v3278_v35 = vpop.xlane.xlu1 %3277 }
 0xd04   : > { %v3280_v17 = vmul.f32 %v3278_v35, %v6202_v15 }
 0xd06   : > { %v4938_v58 = vpop.eup %4937  ;;  %v3282_v24 = vadd.f32 1e-06, %v3280_v17 }
 0xd07   : > { %v3284_v25 = vmul.f32 %v4938_v58, %v3281_v10  ;;  %vm3290_vm4 = vweird.f32 %v4938_v58 }
 0xd08   : > { %4939 = vrsqrt.f32 %v3282_v24  ;;  %vm3291_vm6 = vmor %vm3289_vm5, %vm3290_vm4  ;;  %vm3299_vm8 = vweird.f32 %v3282_v24 }
 0xd09   : > { %v3285_v28 = vmul.f32 %v4938_v58, %v3284_v25 }
 0xd0b   : > { %v3286_v29 = vmul.f32 0.5, %v3285_v28 }
 0xd0d   : > { %v3287_v23 = vsub.f32 1.5, %v3286_v29 }
 0xd0e   : > { %v4940_v30 = vpop.eup %4939 }
 0xd0f   : > { %v3288_v32 = vmul.f32 %v4938_v58, %v3287_v23  ;;  %v3294_v34 = vmul.f32 %v4940_v30, %v3282_v24  ;;  %vm3300_vm7 = vweird.f32 %v4940_v30 }
 0xd10   : > { %vm3301_vm9 = vmor %vm3299_vm8, %vm3300_vm7 }
 0xd11   : > { %v3295_v36 = vmul.f32 %v4940_v30, %v3294_v34  ;;  %v3292_v31 = vsel %vm3291_vm6, %v4938_v58, %v3288_v32 }
 0xd12   : > { %v3303_v39 = vmul.f32 %v3292_v31, %v6572_v19 }
 0xd13   : > { %v3296_v37 = vmul.f32 0.5, %v3295_v36 }
 0xd14   : > { %v3308_v44 = vmul.f32 %v4860_v41, %v3303_v39 }
 0xd15   : > { %v3297_v38 = vsub.f32 1.5, %v3296_v37 }
 0xd16   : > { %v3313_v33 = vadd.f32 %v4861_v45, %v3308_v44 }
 0xd17   : > { %v3298_v40 = vmul.f32 %v4940_v30, %v3297_v38 }
 0xd19   : > { %v3302_v42 = vsel %vm3301_vm9, %v4940_v30, %v3298_v40 }
 0xd1a   : > { %v3304_v43 = vmul.f32 %v3302_v42, %v6578_v21  ;;  %v4678_v21 = vld [vmem:[%s6198_s16 + $0x18] sm:$0xff] }
 0xd1b   : > { %3604 = vmatpush.bf16.msra.mxu0 %v4678_v21 }
 0xd1c   : > { %v3309_v47 = vmul.f32 %v4860_v41, %v3304_v43 }
 0xd1e   : > { %v3314_v48 = vadd.f32 %v4861_v45, %v3309_v47 }
 0xd1f   : > { %3605 = vmatpush.bf16.msra.mxu0 %v4677_v51 }
 0xd20   : > { %v3332_v19 = vpack.c.bf16 %v3314_v48, %v3313_v33 }
 0xd22   : > { %3426 = vmatmul.bf16.vlgmr.msra.gmra.mxu2 %v3332_v19  ;;  %3440 = vmatmul.bf16.vlgmr.msrb.gmra.mxu3 %v3332_v19 }
 0xd23   : > { %3606 = vmatpush.bf16.msra.mxu0 %v4676_v53 }
 0xd27   : > { %3607 = vmatpush.bf16.msra.mxu0 %v4675_v55 }
 0xda5   : > { %v3427_v62 = vpop.f32.mrf.mxu2  ;;  %v3441_v63 = vpop.f32.mrf.mxu3 }
 0xda6   : > { %v3428_v18 = vadd.f32 %v3427_v62, %v3334_v60  ;;  %v3442_v0 = vadd.f32 %v3441_v63, %v3335_v61 }
 0xda8   : > { %v3452_v1 = vmax.f32 %v3428_v18, 0.0  ;;  %v3453_v2 = vmax.f32 %v3442_v0, 0.0 }
 0xdaa   : > { %v3456_v7 = vpack.c.bf16 %v3453_v2, %v3452_v1 }
 0xdac   : > { %v3496_v9 = vunpack.c.l.b16 %v3456_v7  ;;  %v3497_v10 = vunpack.c.h.b16 %v3456_v7 }
 0xdad   : > { %v3429_v3 = vpop.f32.mrf.mxu2  ;;  %v3443_v5 = vpop.f32.mrf.mxu3 }
 0xdae   : > { %v3430_v4 = vadd.f32 %v3429_v3, %v3334_v60  ;;  %v3444_v6 = vadd.f32 %v3443_v5, %v3335_v61 }
 0xdb0   : > { %v3454_v22 = vmax.f32 %v3430_v4, 0.0  ;;  %v3455_v8 = vmax.f32 %v3444_v6, 0.0 }
 0xdb2   : > { %v3457_v16 = vpack.c.bf16 %v3455_v8, %v3454_v22 }
 0xdb4   : > { %v3498_v12 = vunpack.c.l.b16 %v3457_v16  ;;  %v3499_v13 = vunpack.c.h.b16 %v3457_v16 }
 0xdb6   : > { %v3500_v35 = vpack.c.b16 %v3498_v12, %v3496_v9  ;;  %v3501_v17 = vpack.c.b16 %v3499_v13, %v3497_v10 }
 0xdb8   : > { %3608 = vmatmul.bf16.vlgmr.msra.gmra.mxu0 %v3500_v35  ;;  %3622 = vmatmul.bf16.vlgmr.msrb.gmra.mxu1 %v3501_v17 }
 0xe35   : > { %v3609_v20 = vpop.f32.mrf.mxu0  ;;  %v3623_v58 = vpop.f32.mrf.mxu1 }
 0xe36   : > { %v3610_v24 = vadd.f32 %v4862_v54, %v3609_v20 }
 0xe38   : > { %v3624_v25 = vadd.f32 %v3623_v58, %v3610_v24 }
 0xe3a   : > { %v3628_v26 = vadd.f32 %v3624_v25, %v6563_v11 }
 0xe3c   : > { %3630 = vst [vmem:[#allocation26] sm:$0xff] %v3628_v26 }
 0xe3d   : > { %v3611_v27 = vpop.f32.mrf.mxu0  ;;  %v3625_v29 = vpop.f32.mrf.mxu1 }
 0xe3e   : > { %v3612_v28 = vadd.f32 %v4862_v54, %v3611_v27 }
 0xe40   : > { %v3626_v23 = vadd.f32 %v3625_v29, %v3612_v28  ;;  %3635 = sbr.rel (%p4581_p5) target bundleno = 3930 (0xf5a), region = 208 }
 0xe42   : > { %v3629_v30 = vadd.f32 %v3626_v23, %v6567_v14 }
 0xe44   : > { %3631 = vst [vmem:[#allocation26 + $0x8] sm:$0xff] %v3629_v30 }
 0xe45   : > { %3638 = vadd.xlane.f32.xlu0 %v3628_v26  ;;  %v4943_v46 = vld [vmem:[%s6816_s6] ss:$0 sm:$0xff] }
 0xe46   : > { %v4944_v53 = vld [vmem:[%s6817_s0] ss:$0 sm:$0xff] }
 0xe4d   : > { %3640 = vadd.xlane.f32.xlu0 %v3629_v30 }
 0xeb8   : > { %v3639_v32 = vpop.xlane.xlu0 %3638 }
 0xeb9   : > { %v3642_v34 = vmul.f32 %v3639_v32, %v6202_v15 }
 0xebb   : > { %v3644_v36 = vsub.f32 %v3628_v26, %v3642_v34 }
 0xebd   : > { %v3646_v31 = vmul.f32 %v3644_v36, %v3644_v36 }
 0xebf   : > { %3648 = vadd.xlane.f32.xlu1 %v3646_v31 }
 0xec0   : > { %v3641_v11 = vpop.xlane.xlu0 %3640 }
 0xec1   : > { %v3643_v37 = vmul.f32 %v3641_v11, %v6202_v15 }
 0xec3   : > { %v3645_v38 = vsub.f32 %v3629_v30, %v3643_v37 }
 0xec5   : > { %v3647_v39 = vmul.f32 %v3645_v38, %v3645_v38 }
 0xec7   : > { %3650 = vadd.xlane.f32.xlu1 %v3647_v39 }
 0xf32   : > { %v3649_v41 = vpop.xlane.xlu1 %3648 }
 0xf33   : > { %v3652_v14 = vmul.f32 %v3649_v41, %v6202_v15 }
 0xf35   : > { %v3654_v40 = vadd.f32 1e-06, %v3652_v14 }
 0xf37   : > { %4945 = vrsqrt.f32 %v3654_v40  ;;  %vm3662_vm11 = vweird.f32 %v3654_v40 }
 0xf3a   : > { %v3651_v42 = vpop.xlane.xlu1 %3650 }
 0xf3b   : > { %v3653_v43 = vmul.f32 %v3651_v42, %v6202_v15 }
 0xf3d   : > { %v4946_v44 = vpop.eup %4945  ;;  %v3655_v45 = vadd.f32 1e-06, %v3653_v43 }
 0xf3e   : > { %v3657_v47 = vmul.f32 %v4946_v44, %v3654_v40  ;;  %vm3663_vm10 = vweird.f32 %v4946_v44 }
 0xf3f   : > { %4947 = vrsqrt.f32 %v3655_v45  ;;  %vm3664_vm12 = vmor %vm3662_vm11, %vm3663_vm10  ;;  %vm3672_vm14 = vweird.f32 %v3655_v45 }
 0xf40   : > { %v3658_v33 = vmul.f32 %v4946_v44, %v3657_v47 }
 0xf42   : > { %v3659_v48 = vmul.f32 0.5, %v3658_v33 }
 0xf44   : > { %v3660_v19 = vsub.f32 1.5, %v3659_v48 }
 0xf45   : > { %v4948_v49 = vpop.eup %4947 }
 0xf46   : > { %v3661_v50 = vmul.f32 %v4946_v44, %v3660_v19  ;;  %v3667_v21 = vmul.f32 %v4948_v49, %v3655_v45  ;;  %vm3673_vm13 = vweird.f32 %v4948_v49 }
 0xf47   : > { %vm3674_vm15 = vmor %vm3672_vm14, %vm3673_vm13 }
 0xf48   : > { %v3665_v51 = vsel %vm3664_vm12, %v4946_v44, %v3661_v50  ;;  %v3668_v52 = vmul.f32 %v4948_v49, %v3667_v21 }
 0xf49   : > { %v3676_v15 = vmul.f32 %v3665_v51, %v3644_v36 }
 0xf4a   : > { %v3669_v56 = vmul.f32 0.5, %v3668_v52 }
 0xf4b   : > { %v3681_v55 = vmul.f32 %v4943_v46, %v3676_v15 }
 0xf4c   : > { %v3670_v57 = vsub.f32 1.5, %v3669_v56 }
 0xf4d   : > { %v3686_v59 = vadd.f32 %v4944_v53, %v3681_v55 }
 0xf4e   : > { %v3671_v60 = vmul.f32 %v4948_v49, %v3670_v57 }
 0xf4f   : > { %3688 = vst [vmem:[#allocation26] sm:$0xff] %v3686_v59 }
 0xf50   : > { %v3675_v61 = vsel %vm3674_vm15, %v4948_v49, %v3671_v60 }
 0xf51   : > { %v3677_v62 = vmul.f32 %v3675_v61, %v3645_v38 }
 0xf53   : > { %v3682_v63 = vmul.f32 %v4943_v46, %v3677_v62 }
 0xf55   : > { %v3687_v18 = vadd.f32 %v4944_v53, %v3682_v63 }
 0xf57   : > { %3689 = vst [vmem:[#allocation26 + $0x8] sm:$0xff] %v3687_v18  ;;  %v4694_v0 = vpack.c.bf16 %v3687_v18, %v3686_v59 }
 0xf59   : > { %4695 = vst [vmem:[#allocation27] sm:$0xff] %v4694_v0  }
 0xf5a PF: > { %s6818_s30 = sld [smem:[#allocation36_spill]]  ;;  %s5622_s19 = smov [#allocation26]  }
 0xf5b   : > { %s3699_s4 = sshll.u32 %s5622_s19, 4  ;;  %s6819_s28 = sld [smem:[#allocation66_spill]]  ;;  %s3700_s4 = int_to_ptr.vmem [resolvable:$true] %s3699_s4 }
 0xf5c   : > { %s5623_s29 = smov 128   ;;  %s5624_s26 = smov 8  }
 0xf5d   : > { %s6820_s16 = sld [smem:[#allocation67_spill]]  ;;  %s5625_s9 = smov [#allocation27]  }
 0xf5e   : > { %s3713_s17 = sshll.u32 %s5625_s9, 4  ;;  %s5626_s22 = smov 4   ;;  %s3714_s17 = int_to_ptr.vmem [resolvable:$true] %s3713_s17 }
 0xf60   : > { %p4775_p8 = scmp.eq.s32.totalorder %s6818_s30, 1 }
 0xf61   : > { %s3701_s5 = sshll.u32 %s6819_s28, 4  ;;  %s3702_s5 = int_to_ptr.hbm [resolvable:$true] %s3701_s5 }
 0xf62   : > { %4747 = dma.vmem_to_hbm [thread:$0]  (%p4775_p8), %s3700_s4, 256, %s3702_s5, [#allocation5], %s5623_s29, %s5623_s29, %s5624_s26  }
 0xf63   : > { %s3715_s18 = sshll.u32 %s6820_s16, 4  ;;  %s3716_s18 = int_to_ptr.hbm [resolvable:$true] %s3715_s18 }
 0xf64   : > { %4749 = dma.vmem_to_hbm [thread:$0]  (%p4775_p8), %s3714_s17, 128, %s3716_s18, [#allocation28], %s5619_s20, %s5619_s20, %s5626_s22  }
 0xf65   : > { %5578 = dma.done.wait (%p4775_p8), [#allocation5], 256  }
 0xf66   : > { %5580 = vsyncadd (%p4775_p8), [#allocation5], 4294967040 }
 0xf67   : > { %5582 = dma.done.wait (%p4775_p8), [#allocation28], 128  }
 0xf68   : > { %5584 = vsyncadd (%p4775_p8), [#allocation28], 4294967168 }
 0xf69 PF: > { %s6821_s30 = sld [smem:[#allocation37_spill]]  ;;  %s6824_s4 = smov %s5595_s8 }
 0xf6a   : > { %s6822_s7 = sld [smem:[#allocation35_spill]] }
 0xf6b   : > { %s6823_s24 = sld [smem:[#allocation38_spill]] }
 0xf6f   : > { %p40_p9 = scmp.ge.s32.totalorder %s6821_s30, 4  }
 0xf71   : > { %s6825_s8 = smov %s6823_s24  ;;  %42 = sbr.rel (!%p40_p9) target bundleno = 35 (0x23), region = 361 }
 0xf76   :  { %3737 = vsyncpa [#allocation4], 1 }
 0xf77   :  { %3739 = vsyncpa [#allocation4 + $0x1], 1 }
 0xf78   :  { %3740 = vsyncpa [#allocation7], 1 }
 0xf79   :  { %3741 = vsyncpa [#allocation10], 1 }
 0xf7a   :  { %3742 = vsyncpa [#allocation5], 1 }
 0xf7b   :  { %3744 = vsyncpa [#allocation5 + $0x1], 1 }
 0xf7c   :  { %3745 = vsyncpa [#allocation28], 1 }

</bundles_post_ra>
